<compile_context>
chip_gen: v7x
topology: tpu7x:2x2x1
jax: 0.10.0
libtpu: 0.0.40
codegen_flags: <defaults>
</compile_context>

<pallas_src>
import jax
import jax.numpy as jnp
from jax.experimental import pallas as pl
from jax.experimental.pallas import tpu as pltpu

# Hidden layer widths (fixed by the module definition).
ENC_DIMS = [64, 32, 16, 8, 4]
DEC_DIMS = [8, 16, 32, 64]  # final decoder layer maps 64 -> n_pixels

_HIDDEN_PAD = 64        # every middle-layer width (64,32,16,8,4,...) fits in 64
_N_MID_LAYERS = 8       # layers 1..8 of the 10-layer MLP (all 64x64 after padding)
_NO_RELU_MID_IDX = 3    # middle index of the encoder output layer (8 -> 4): no ReLU


def _ae_kernel(x_ref, w0_ref, b0_ref, wm_ref, bm_ref, w9_ref, b9_ref, out_ref):
    """Full autoencoder forward on one (batch_tile, n_pixels) tile."""
    x = x_ref[...]
    if x.dtype != jnp.float32:
        x = x.astype(jnp.float32)

    # Layer 0: n_pixels -> 64, ReLU.
    h = jnp.dot(x, w0_ref[...], preferred_element_type=jnp.float32) + b0_ref[...]
    h = jnp.maximum(h, 0.0)

    # Layers 1..8: run at zero-padded width 64. Padded weight rows/cols and bias
    # entries are exactly zero, so padded activation columns stay exactly zero
    # and the results match the unpadded network bit-for-bit.
    bm = bm_ref[...]  # (8, 64) — tiny, load once outside the unrolled loop
    for j in range(_N_MID_LAYERS):  # static, fully unrolled
        w = wm_ref[j]  # (64, 64) padded weight, static index into the packed ref
        h = jnp.dot(h, w, preferred_element_type=jnp.float32) + bm[j:j + 1, :]
        if j != _NO_RELU_MID_IDX:  # encoder output layer (8 -> 4) has no ReLU
            h = jnp.maximum(h, 0.0)

    # Layer 9: 64 -> n_pixels, no ReLU.
    y = jnp.dot(h, w9_ref[...], preferred_element_type=jnp.float32) + b9_ref[...]
    out_ref[...] = y.astype(out_ref.dtype)


def pack_params(params):
    """Pack flat [w1, b1, ..., w10, b10] into 6 arrays for the kernel.

    Returns (w0, b0, wm, bm, w9, b9) where wm is (8, 64, 64) and bm is (8, 64),
    zero-padded so the 8 middle layers all run at a uniform 64 width.
    """
    n_layers = len(params) // 2
    assert n_layers == 10, "AE has 10 linear layers"
    ws = [params[2 * i].astype(jnp.float32) for i in range(n_layers)]
    bs = [params[2 * i + 1].astype(jnp.float32) for i in range(n_layers)]

    w0, b0 = ws[0], bs[0]          # (n_pixels, 64), (1, 64)
    w9, b9 = ws[-1], bs[-1]        # (64, n_pixels), (1, n_pixels)

    wm = jnp.zeros((_N_MID_LAYERS, _HIDDEN_PAD, _HIDDEN_PAD), jnp.float32)
    bm = jnp.zeros((_N_MID_LAYERS, _HIDDEN_PAD), jnp.float32)
    for j, (w, b) in enumerate(zip(ws[1:-1], bs[1:-1])):
        wm = wm.at[j, : w.shape[0], : w.shape[1]].set(w)
        bm = bm.at[j, : b.shape[1]].set(b[0])
    return w0, b0, wm, bm, w9, b9


def ae_forward(x, packed_params, *, batch_tile=512):
    """x: (B, n_pixels) float32. packed_params: output of pack_params()."""
    B, n_pixels = x.shape
    w0, b0, wm, bm, w9, b9 = packed_params

    bt = min(batch_tile, B)
    pad = (-B) % bt
    if pad:
        x = jnp.pad(x, ((0, pad), (0, 0)))
    Bp = B + pad
    grid = (Bp // bt,)

    x_spec = pl.BlockSpec((bt, n_pixels), lambda i: (i, 0))
    out_spec = pl.BlockSpec((bt, n_pixels), lambda i: (i, 0))
    # Parameters: full-array blocks with constant index_maps — the pipeline
    # sees the same block index every grid step, so they stay resident in VMEM
    # and are not re-copied per step.
    param_specs = [
        pl.BlockSpec(w0.shape, lambda i: (0, 0)),
        pl.BlockSpec(b0.shape, lambda i: (0, 0)),
        pl.BlockSpec(wm.shape, lambda i: (0, 0, 0)),
        pl.BlockSpec(bm.shape, lambda i: (0, 0)),
        pl.BlockSpec(w9.shape, lambda i: (0, 0)),
        pl.BlockSpec(b9.shape, lambda i: (0, 0)),
    ]

    out = pl.pallas_call(
        _ae_kernel,
        out_shape=jax.ShapeDtypeStruct((Bp, n_pixels), x.dtype),
        grid_spec=pltpu.PrefetchScalarGridSpec(
            num_scalar_prefetch=0,
            grid=grid,
            in_specs=[x_spec] + param_specs,
            out_specs=out_spec,
        ),
        compiler_params=pltpu.CompilerParams(
            dimension_semantics=("parallel",),
        ),
    )(x, w0, b0, wm, bm, w9, b9)
    return out[:B] if pad else out


def init_params(n_pixels, key):
    """Deterministic synthetic init mimicking nn.Linear shapes.

    Returns a flat list [w1, b1, ..., w10, b10] with w: (in, out), b: (1, out).
    """
    dims = [n_pixels] + ENC_DIMS + DEC_DIMS + [n_pixels]
    params = []
    for fan_in, fan_out in zip(dims[:-1], dims[1:]):
        key, kw, kb = jax.random.split(key, 3)
        bound = 1.0 / jnp.sqrt(fan_in)
        w = jax.random.uniform(
            kw, (fan_in, fan_out), jnp.float32, minval=-bound, maxval=bound
        )
        b = jax.random.uniform(
            kb, (1, fan_out), jnp.float32, minval=-bound, maxval=bound
        )
        params.append(w)
        params.append(b)
    return params


def ae_reference(x, params):
    """Pure-JAX reference for correctness checking (unpacked params)."""
    n_layers = len(params) // 2
    h = x
    for layer in range(n_layers):
        w = params[2 * layer]
        b = params[2 * layer + 1]
        h = h @ w + b
        if layer != 4 and layer != n_layers - 1:  # no ReLU after 8->4 and the last layer
            h = jnp.maximum(h, 0.0)
    return h


if __name__ == "__main__":
    n_pixels = 256
    batch = 512           # small demo shape; 2 grid steps at batch_tile=256

    key = jax.random.PRNGKey(0)
    key, kx = jax.random.split(key)
    x = jax.random.normal(kx, (batch, n_pixels), jnp.float32)
    params = init_params(n_pixels, key)
    packed = pack_params(params)

    out = ae_forward(x, packed, batch_tile=256)
    out = jax.block_until_ready(out)

    ref = ae_reference(x, params)
    assert out.shape == (batch, n_pixels)
    assert jnp.allclose(out, ref, atol=1e-4, rtol=1e-4), "mismatch vs reference"

    print("KERNEL_OK")
</pallas_src>

<mosaic_0001>
module attributes {stable_mosaic.version = 11 : i64} {
  func.func @_ae_kernel(%arg0: i32, %arg1: memref<256x256xf32, #tpu.memory_space<vmem>>, %arg2: memref<256x64xf32, #tpu.memory_space<vmem>>, %arg3: memref<1x64xf32, #tpu.memory_space<vmem>>, %arg4: memref<8x64x64xf32, #tpu.memory_space<vmem>>, %arg5: memref<8x64xf32, #tpu.memory_space<vmem>>, %arg6: memref<64x256xf32, #tpu.memory_space<vmem>>, %arg7: memref<1x256xf32, #tpu.memory_space<vmem>>, %arg8: memref<256x256xf32, #tpu.memory_space<vmem>>) attributes {dimension_semantics = [#tpu.dimension_semantics<parallel>], iteration_bounds = array<i64: 2>, scalar_prefetch = 0 : i64, scratch_operands = 0 : i64, tpu.core_type = #tpu.core_type<tc>, window_params = [{transform_indices = @transform_0, window_bounds = array<i64: 256, 256>}, {pipeline_mode = #tpu.pipeline_mode<synchronous>, transform_indices = @transform_1, window_bounds = array<i64: 256, 64>}, {pipeline_mode = #tpu.pipeline_mode<synchronous>, transform_indices = @transform_2, window_bounds = array<i64: 1, 64>}, {pipeline_mode = #tpu.pipeline_mode<synchronous>, transform_indices = @transform_3, window_bounds = array<i64: 8, 64, 64>}, {pipeline_mode = #tpu.pipeline_mode<synchronous>, transform_indices = @transform_4, window_bounds = array<i64: 8, 64>}, {pipeline_mode = #tpu.pipeline_mode<synchronous>, transform_indices = @transform_5, window_bounds = array<i64: 64, 256>}, {pipeline_mode = #tpu.pipeline_mode<synchronous>, transform_indices = @transform_6, window_bounds = array<i64: 1, 256>}, {transform_indices = @transform_7, window_bounds = array<i64: 256, 256>}]} {
    %c0 = arith.constant 0 : index
    %c0_0 = arith.constant 0 : index
    %0 = vector.load %arg1[%c0, %c0_0] : memref<256x256xf32, #tpu.memory_space<vmem>>, vector<256x256xf32>
    %c0_1 = arith.constant 0 : index
    %c0_2 = arith.constant 0 : index
    %1 = vector.load %arg2[%c0_1, %c0_2] : memref<256x64xf32, #tpu.memory_space<vmem>>, vector<256x64xf32>
    %cst = arith.constant dense<0.000000e+00> : vector<256x64xf32>
    %2 = tpu.matmul %0, %1, %cst {dimension_numbers = #tpu.dot_dimension_numbers<[1], [0], [0], [1], [0, 0, 1, 1], [], []>} : vector<256x256xf32>, vector<256x64xf32>, vector<256x64xf32> -> vector<256x64xf32>
    %c0_3 = arith.constant 0 : index
    %c0_4 = arith.constant 0 : index
    %3 = vector.load %arg3[%c0_3, %c0_4] : memref<1x64xf32, #tpu.memory_space<vmem>>, vector<1x64xf32>
    %4 = vector.broadcast %3 : vector<1x64xf32> to vector<256x64xf32>
    %5 = arith.addf %2, %4 : vector<256x64xf32>
    %cst_5 = arith.constant 0.000000e+00 : f32
    %6 = vector.broadcast %cst_5 : f32 to vector<256x64xf32>
    %7 = arith.maximumf %5, %6 : vector<256x64xf32>
    %c0_6 = arith.constant 0 : index
    %c0_7 = arith.constant 0 : index
    %8 = vector.load %arg5[%c0_6, %c0_7] : memref<8x64xf32, #tpu.memory_space<vmem>>, vector<8x64xf32>
    %c0_8 = arith.constant 0 : index
    %c0_9 = arith.constant 0 : index
    %c0_10 = arith.constant 0 : index
    %9 = vector.load %arg4[%c0_8, %c0_9, %c0_10] : memref<8x64x64xf32, #tpu.memory_space<vmem>>, vector<1x64x64xf32>
    %10 = vector.shape_cast %9 : vector<1x64x64xf32> to vector<64x64xf32>
    %cst_11 = arith.constant dense<0.000000e+00> : vector<256x64xf32>
    %11 = tpu.matmul %7, %10, %cst_11 {dimension_numbers = #tpu.dot_dimension_numbers<[1], [0], [0], [1], [0, 0, 1, 1], [], []>} : vector<256x64xf32>, vector<64x64xf32>, vector<256x64xf32> -> vector<256x64xf32>
    %12 = vector.extract_strided_slice %8 {offsets = [0, 0], sizes = [1, 64], strides = [1, 1]} : vector<8x64xf32> to vector<1x64xf32>
    %13 = vector.broadcast %12 : vector<1x64xf32> to vector<256x64xf32>
    %14 = arith.addf %11, %13 : vector<256x64xf32>
    %cst_12 = arith.constant 0.000000e+00 : f32
    %15 = vector.broadcast %cst_12 : f32 to vector<256x64xf32>
    %16 = arith.maximumf %14, %15 : vector<256x64xf32>
    %c1 = arith.constant 1 : index
    %c0_13 = arith.constant 0 : index
    %c0_14 = arith.constant 0 : index
    %17 = vector.load %arg4[%c1, %c0_13, %c0_14] : memref<8x64x64xf32, #tpu.memory_space<vmem>>, vector<1x64x64xf32>
    %18 = vector.shape_cast %17 : vector<1x64x64xf32> to vector<64x64xf32>
    %cst_15 = arith.constant dense<0.000000e+00> : vector<256x64xf32>
    %19 = tpu.matmul %16, %18, %cst_15 {dimension_numbers = #tpu.dot_dimension_numbers<[1], [0], [0], [1], [0, 0, 1, 1], [], []>} : vector<256x64xf32>, vector<64x64xf32>, vector<256x64xf32> -> vector<256x64xf32>
    %20 = vector.extract_strided_slice %8 {offsets = [1, 0], sizes = [1, 64], strides = [1, 1]} : vector<8x64xf32> to vector<1x64xf32>
    %21 = vector.broadcast %20 : vector<1x64xf32> to vector<256x64xf32>
    %22 = arith.addf %19, %21 : vector<256x64xf32>
    %cst_16 = arith.constant 0.000000e+00 : f32
    %23 = vector.broadcast %cst_16 : f32 to vector<256x64xf32>
    %24 = arith.maximumf %22, %23 : vector<256x64xf32>
    %c2 = arith.constant 2 : index
    %c0_17 = arith.constant 0 : index
    %c0_18 = arith.constant 0 : index
    %25 = vector.load %arg4[%c2, %c0_17, %c0_18] : memref<8x64x64xf32, #tpu.memory_space<vmem>>, vector<1x64x64xf32>
    %26 = vector.shape_cast %25 : vector<1x64x64xf32> to vector<64x64xf32>
    %cst_19 = arith.constant dense<0.000000e+00> : vector<256x64xf32>
    %27 = tpu.matmul %24, %26, %cst_19 {dimension_numbers = #tpu.dot_dimension_numbers<[1], [0], [0], [1], [0, 0, 1, 1], [], []>} : vector<256x64xf32>, vector<64x64xf32>, vector<256x64xf32> -> vector<256x64xf32>
    %28 = vector.extract_strided_slice %8 {offsets = [2, 0], sizes = [1, 64], strides = [1, 1]} : vector<8x64xf32> to vector<1x64xf32>
    %29 = vector.broadcast %28 : vector<1x64xf32> to vector<256x64xf32>
    %30 = arith.addf %27, %29 : vector<256x64xf32>
    %cst_20 = arith.constant 0.000000e+00 : f32
    %31 = vector.broadcast %cst_20 : f32 to vector<256x64xf32>
    %32 = arith.maximumf %30, %31 : vector<256x64xf32>
    %c3 = arith.constant 3 : index
    %c0_21 = arith.constant 0 : index
    %c0_22 = arith.constant 0 : index
    %33 = vector.load %arg4[%c3, %c0_21, %c0_22] : memref<8x64x64xf32, #tpu.memory_space<vmem>>, vector<1x64x64xf32>
    %34 = vector.shape_cast %33 : vector<1x64x64xf32> to vector<64x64xf32>
    %cst_23 = arith.constant dense<0.000000e+00> : vector<256x64xf32>
    %35 = tpu.matmul %32, %34, %cst_23 {dimension_numbers = #tpu.dot_dimension_numbers<[1], [0], [0], [1], [0, 0, 1, 1], [], []>} : vector<256x64xf32>, vector<64x64xf32>, vector<256x64xf32> -> vector<256x64xf32>
    %36 = vector.extract_strided_slice %8 {offsets = [3, 0], sizes = [1, 64], strides = [1, 1]} : vector<8x64xf32> to vector<1x64xf32>
    %37 = vector.broadcast %36 : vector<1x64xf32> to vector<256x64xf32>
    %38 = arith.addf %35, %37 : vector<256x64xf32>
    %c4 = arith.constant 4 : index
    %c0_24 = arith.constant 0 : index
    %c0_25 = arith.constant 0 : index
    %39 = vector.load %arg4[%c4, %c0_24, %c0_25] : memref<8x64x64xf32, #tpu.memory_space<vmem>>, vector<1x64x64xf32>
    %40 = vector.shape_cast %39 : vector<1x64x64xf32> to vector<64x64xf32>
    %cst_26 = arith.constant dense<0.000000e+00> : vector<256x64xf32>
    %41 = tpu.matmul %38, %40, %cst_26 {dimension_numbers = #tpu.dot_dimension_numbers<[1], [0], [0], [1], [0, 0, 1, 1], [], []>} : vector<256x64xf32>, vector<64x64xf32>, vector<256x64xf32> -> vector<256x64xf32>
    %42 = vector.extract_strided_slice %8 {offsets = [4, 0], sizes = [1, 64], strides = [1, 1]} : vector<8x64xf32> to vector<1x64xf32>
    %43 = vector.broadcast %42 : vector<1x64xf32> to vector<256x64xf32>
    %44 = arith.addf %41, %43 : vector<256x64xf32>
    %cst_27 = arith.constant 0.000000e+00 : f32
    %45 = vector.broadcast %cst_27 : f32 to vector<256x64xf32>
    %46 = arith.maximumf %44, %45 : vector<256x64xf32>
    %c5 = arith.constant 5 : index
    %c0_28 = arith.constant 0 : index
    %c0_29 = arith.constant 0 : index
    %47 = vector.load %arg4[%c5, %c0_28, %c0_29] : memref<8x64x64xf32, #tpu.memory_space<vmem>>, vector<1x64x64xf32>
    %48 = vector.shape_cast %47 : vector<1x64x64xf32> to vector<64x64xf32>
    %cst_30 = arith.constant dense<0.000000e+00> : vector<256x64xf32>
    %49 = tpu.matmul %46, %48, %cst_30 {dimension_numbers = #tpu.dot_dimension_numbers<[1], [0], [0], [1], [0, 0, 1, 1], [], []>} : vector<256x64xf32>, vector<64x64xf32>, vector<256x64xf32> -> vector<256x64xf32>
    %50 = vector.extract_strided_slice %8 {offsets = [5, 0], sizes = [1, 64], strides = [1, 1]} : vector<8x64xf32> to vector<1x64xf32>
    %51 = vector.broadcast %50 : vector<1x64xf32> to vector<256x64xf32>
    %52 = arith.addf %49, %51 : vector<256x64xf32>
    %cst_31 = arith.constant 0.000000e+00 : f32
    %53 = vector.broadcast %cst_31 : f32 to vector<256x64xf32>
    %54 = arith.maximumf %52, %53 : vector<256x64xf32>
    %c6 = arith.constant 6 : index
    %c0_32 = arith.constant 0 : index
    %c0_33 = arith.constant 0 : index
    %55 = vector.load %arg4[%c6, %c0_32, %c0_33] : memref<8x64x64xf32, #tpu.memory_space<vmem>>, vector<1x64x64xf32>
    %56 = vector.shape_cast %55 : vector<1x64x64xf32> to vector<64x64xf32>
    %cst_34 = arith.constant dense<0.000000e+00> : vector<256x64xf32>
    %57 = tpu.matmul %54, %56, %cst_34 {dimension_numbers = #tpu.dot_dimension_numbers<[1], [0], [0], [1], [0, 0, 1, 1], [], []>} : vector<256x64xf32>, vector<64x64xf32>, vector<256x64xf32> -> vector<256x64xf32>
    %58 = vector.extract_strided_slice %8 {offsets = [6, 0], sizes = [1, 64], strides = [1, 1]} : vector<8x64xf32> to vector<1x64xf32>
    %59 = vector.broadcast %58 : vector<1x64xf32> to vector<256x64xf32>
    %60 = arith.addf %57, %59 : vector<256x64xf32>
    %cst_35 = arith.constant 0.000000e+00 : f32
    %61 = vector.broadcast %cst_35 : f32 to vector<256x64xf32>
    %62 = arith.maximumf %60, %61 : vector<256x64xf32>
    %c7 = arith.constant 7 : index
    %c0_36 = arith.constant 0 : index
    %c0_37 = arith.constant 0 : index
    %63 = vector.load %arg4[%c7, %c0_36, %c0_37] : memref<8x64x64xf32, #tpu.memory_space<vmem>>, vector<1x64x64xf32>
    %64 = vector.shape_cast %63 : vector<1x64x64xf32> to vector<64x64xf32>
    %cst_38 = arith.constant dense<0.000000e+00> : vector<256x64xf32>
    %65 = tpu.matmul %62, %64, %cst_38 {dimension_numbers = #tpu.dot_dimension_numbers<[1], [0], [0], [1], [0, 0, 1, 1], [], []>} : vector<256x64xf32>, vector<64x64xf32>, vector<256x64xf32> -> vector<256x64xf32>
    %66 = vector.extract_strided_slice %8 {offsets = [7, 0], sizes = [1, 64], strides = [1, 1]} : vector<8x64xf32> to vector<1x64xf32>
    %67 = vector.broadcast %66 : vector<1x64xf32> to vector<256x64xf32>
    %68 = arith.addf %65, %67 : vector<256x64xf32>
    %cst_39 = arith.constant 0.000000e+00 : f32
    %69 = vector.broadcast %cst_39 : f32 to vector<256x64xf32>
    %70 = arith.maximumf %68, %69 : vector<256x64xf32>
    %c0_40 = arith.constant 0 : index
    %c0_41 = arith.constant 0 : index
    %71 = vector.load %arg6[%c0_40, %c0_41] : memref<64x256xf32, #tpu.memory_space<vmem>>, vector<64x256xf32>
    %cst_42 = arith.constant dense<0.000000e+00> : vector<256x256xf32>
    %72 = tpu.matmul %70, %71, %cst_42 {dimension_numbers = #tpu.dot_dimension_numbers<[1], [0], [0], [1], [0, 0, 1, 1], [], []>} : vector<256x64xf32>, vector<64x256xf32>, vector<256x256xf32> -> vector<256x256xf32>
    %c0_43 = arith.constant 0 : index
    %c0_44 = arith.constant 0 : index
    %73 = vector.load %arg7[%c0_43, %c0_44] : memref<1x256xf32, #tpu.memory_space<vmem>>, vector<1x256xf32>
    %74 = vector.broadcast %73 : vector<1x256xf32> to vector<256x256xf32>
    %75 = arith.addf %72, %74 : vector<256x256xf32>
    %c0_45 = arith.constant 0 : index
    %c0_46 = arith.constant 0 : index
    %76 = vector.load %arg8[%c0_45, %c0_46] : memref<256x256xf32, #tpu.memory_space<vmem>>, vector<256x256xf32>
    tpu.vector_store %arg8[%c0_45, %c0_46], %75 {strides = array<i32>} : memref<256x256xf32, #tpu.memory_space<vmem>>, vector<256x256xf32>,
    return
  }
  func.func @transform_0(%arg0: i32) -> (i32, i32) {
    %c0_i32 = arith.constant 0 : i32
    %c0_i32_0 = arith.constant 0 : i32
    return %arg0, %c0_i32 : i32, i32
  }
  func.func @transform_1(%arg0: i32) -> (i32, i32) {
    %c0_i32 = arith.constant 0 : i32
    %c0_i32_0 = arith.constant 0 : i32
    %c0_i32_1 = arith.constant 0 : i32
    return %c0_i32, %c0_i32_0 : i32, i32
  }
  func.func @transform_2(%arg0: i32) -> (i32, i32) {
    %c0_i32 = arith.constant 0 : i32
    %c0_i32_0 = arith.constant 0 : i32
    %c0_i32_1 = arith.constant 0 : i32
    return %c0_i32, %c0_i32_0 : i32, i32
  }
  func.func @transform_3(%arg0: i32) -> (i32, i32, i32) {
    %c0_i32 = arith.constant 0 : i32
    %c0_i32_0 = arith.constant 0 : i32
    %c0_i32_1 = arith.constant 0 : i32
    %c0_i32_2 = arith.constant 0 : i32
    return %c0_i32, %c0_i32_0, %c0_i32_1 : i32, i32, i32
  }
  func.func @transform_4(%arg0: i32) -> (i32, i32) {
    %c0_i32 = arith.constant 0 : i32
    %c0_i32_0 = arith.constant 0 : i32
    %c0_i32_1 = arith.constant 0 : i32
    return %c0_i32, %c0_i32_0 : i32, i32
  }
  func.func @transform_5(%arg0: i32) -> (i32, i32) {
    %c0_i32 = arith.constant 0 : i32
    %c0_i32_0 = arith.constant 0 : i32
    %c0_i32_1 = arith.constant 0 : i32
    return %c0_i32, %c0_i32_0 : i32, i32
  }
  func.func @transform_6(%arg0: i32) -> (i32, i32) {
    %c0_i32 = arith.constant 0 : i32
    %c0_i32_0 = arith.constant 0 : i32
    %c0_i32_1 = arith.constant 0 : i32
    return %c0_i32, %c0_i32_0 : i32, i32
  }
  func.func @transform_7(%arg0: i32) -> (i32, i32) {
    %c0_i32 = arith.constant 0 : i32
    %c0_i32_0 = arith.constant 0 : i32
    return %arg0, %c0_i32 : i32, i32
  }
}

</mosaic_0001>

<bundles_post_ra>
// kernel: tpu_custom_call.1
= control target key start
LH: loop header
LB: loop body
LE: loop exit
PB: predicated region body
PF: predicated region fallthrough
CT: control target
= control target key end

     0   :  { %12 = vsyncpa [#allocation3], 0  ;;  %s6943_s0 = inlined_call_operand.hbm [shape: f32[512,256], index: 0, kind: input, shape index: {}]   ;;  %s6944_s1 = inlined_call_operand.vmem [shape: f32[256,64], index: 1, kind: input, shape index: {}]   ;;  %s6945_s2 = inlined_call_operand.vmem [shape: f32[1,64], index: 2, kind: input, shape index: {}]   ;;  %s6946_s3 = inlined_call_operand.hbm [shape: f32[8,64,64], index: 3, kind: input, shape index: {}]   ;;  %s6947_s4 = inlined_call_operand.vmem [shape: f32[8,64], index: 4, kind: input, shape index: {}]   ;;  %s6948_s5 = inlined_call_operand.vmem [shape: f32[64,256], index: 5, kind: input, shape index: {}]   ;;  %s6949_s6 = inlined_call_operand.vmem [shape: f32[1,256], index: 6, kind: input, shape index: {}]   ;;  %s6950_s7 = inlined_call_operand.hbm [shape: f32[512,256], index: 7, kind: output, shape index: {}]  }
   0x1   :  { %14 = vsyncpa [#allocation3 + $0x1], 0 }
   0x2   :  { %15 = vsyncpa [#allocation6], 0 }
   0x3   :  { %16 = vsyncpa [#allocation4], 0 }
   0x4   :  { %18 = vsyncpa [#allocation4 + $0x1], 0  ;;  %s5705_s24 = smov 0   ;;  %s5707_s25 = smov 0  }
   0x5   :  { %s5709_s26 = smov 0   ;;  %s5711_s27 = smov 0  }
   0x6 LB: > { %s5726_s28 = sadd.s32 4294967295, %s5652_s27   ;;  %s4115_s29 = sadd.s32 4294967294, %s5652_s27   ;;  %s5652_s27 = sphi %s5711_s27, %s6970_s27   ;;  %s5648_s26 = sphi %s5709_s26, %s6969_s26   ;;  %s5644_s25 = sphi %s5707_s25, %s6968_s25   ;;  %s5640_s24 = sphi %s5705_s24, %s6967_s24  }
   0x7   : > { %p44_p0 = scmp.ne.s32.totalorder %s5644_s25, %s5640_s24  ;;  %p6951_p1 = scmp.eq.s32.totalorder %s5726_s28, 0 }
   0x8   : > { %p200_p3 = scmp.eq.s32.totalorder %s4115_s29, 1  ;;  %p4116_p5 = scmp.ge.s32.totalorder %s5652_s27, 1 }
   0x9   : > { %p5735_p4 = por %p6951_p1, %p44_p0  ;;  %p207_p7 = scmp.lt.s32.totalorder %s5652_s27, 3 }
   0xa   : > { %p5740_p6 = por %p200_p3, %p44_p0  ;;  %s5654_s10 = smov [#allocation5]  }
   0xb   : > { %s6954_s30 = scalar_select %p5735_p4, 1, 0 }
   0xc   : > { %s6955_s8 = scalar_select %p5740_p6, 1, 0 }
   0xd   : > { %p5745_p8 = pnand %p4116_p5, %p207_p7  ;;  %s225_s11 = sshll.u32 %s5654_s10, 4  ;;  %s5749_s11 = int_to_ptr.vmem [resolvable:$true] %s225_s11 }
   0xe   : > { %s5761_s13 = sadd.s32 1, %s5652_s27   ;;  %s31_s14 = sadd.s32 1, %s5648_s26 }
   0xf   : > { %s6956_s9 = scalar_select %p5745_p8, 1, 0 }
  0x10   : > { %p5466_p9 = pneg %p5745_p8  ;;  %s28_s15 = ssub.s32 %s5652_s27, %s5761_s13 }
  0x11   : > { %s5524_s18 = scalar_lea.hbm %s6946_s3, 8192 }
  0x12   : > { %p5756_p11 = pnand %p5466_p9, %p6951_p1  ;;  %p5525_p12 = scmp.ne.s32.totalorder %s6946_s3, %s5524_s18 }
  0x13   : > { %p5531_p5 = scmp.lt.u32.totalorder %s5524_s18, %s6946_s3 }
  0x14   : > { %p5526_p13 = pneg %p5756_p11 }
  0x16   : > { %p5527_p0 = pnand %p5526_p13, %p5525_p12 }
  0x18   : > { %p5528_p3 = pneg %p5527_p0 }
  0x1a   : > { %p5533_p7 = pnand %p5531_p5, %p5528_p3 }
  0x1c   : > { %5536 = shalt.err (!%p5533_p7)
}
  0x1d   : > { %s5537_s23 = scalar_lea.vmem %s5749_s11, 8192  ;;  %p5545_p2 = scmp.lt.s32.totalorder %s5749_s11, %s5749_s11 }
  0x1e   : > { %p5538_p9 = scmp.ne.s32.totalorder %s5749_s11, %s5537_s23  ;;  %p5546_p6 = scmp.lt.s32.totalorder %s5537_s23, %s5537_s23 }
  0x20   : > { %p5540_p10 = pnand %p5538_p9, %p5526_p13  ;;  %p5547_p4 = por %p5546_p6, %p5545_p2 }
  0x22   : > { %p5541_p1 = pneg %p5540_p10 }
  0x24   : > { %p5548_p8 = pnand %p5547_p4, %p5541_p1 }
  0x26   : > { %5551 = shalt.err (!%p5548_p8)
}
  0x27   : > { %s5655_s29 = smov 128   ;;  %s5656_s10 = smov 8  }
  0x28   : > { %5469 = dma.hbm_to_vmem [thread:$0]  (!%p5756_p11), %s6946_s3, 8192, %s5749_s11, [#allocation6], %s5655_s29, %s5655_s29, %s5656_s10  }
  0x29   : > { %p29_p2 = scmp.eq.s32.totalorder %s28_s15, 0  ;;  %p38_p1 = scmp.ne.s32.totalorder %s5648_s26, %s5644_s25 }
  0x2a   : > { %p39_p4 = scmp.eq.s32.totalorder %s5652_s27, 0  ;;  %p5479_p6 = scmp.lt.s32.totalorder %s5652_s27, 2 }
  0x2b   : > { %s5792_s18 = scalar_select %p29_p2, %s5648_s26, %s31_s14  }
  0x2c   : > { %p40_p8 = por %p39_p4, %p38_p1  ;;  %p6958_p10 = scmp.eq.s32.totalorder %s5726_s28, 1 }
  0x2d   : > { %s248_s20 = sand.u32 1, %s5648_s26   ;;  %s4423_s21 = sshll.u32 %s5652_s27, 13 }
  0x2e   : > { %p5796_p12 = por %p6958_p10, %p38_p1  ;;  %s4119_s22 = sshll.u32 %s248_s20, 9 }
  0x2f   : > { %s5805_s16 = scalar_lea.hbm %s6943_s0, %s4423_s21  ;;  %s252_s11 = scalar_lea.vmem [#allocation2], %s4119_s22 }
  0x30   : > { %s260_s14 = sshll.u32 %s252_s11, 4  ;;  %p5807_p11 = pnand %p5479_p6, %p40_p8  ;;  %s5811_s14 = int_to_ptr.vmem [resolvable:$true] %s260_s14 }
  0x31   : > { %s5813_s29 = scalar_lea.sflag [#allocation3], %s248_s20  ;;  %s5552_s10 = scalar_lea.hbm %s5805_s16, 8192 }
  0x32   : > { %p5553_p13 = scmp.ne.s32.totalorder %s5805_s16, %s5552_s10  ;;  %p5554_p0 = pneg %p5807_p11 }
  0x33   : > { %s5557_s22 = scalar_lea.hbm %s6943_s0, 16384  ;;  %p5558_p7 = scmp.lt.u32.totalorder %s5805_s16, %s6943_s0 }
  0x34   : > { %p5555_p3 = pnand %p5554_p0, %p5553_p13  ;;  %p5559_p9 = scmp.lt.u32.totalorder %s5557_s22, %s5552_s10 }
  0x35   : > { %p5561_p1 = scmp.lt.u32.totalorder %s5552_s10, %s5805_s16 }
  0x36   : > { %p5556_p5 = pneg %p5555_p3  ;;  %p5560_p2 = por %p5559_p9, %p5558_p7 }
  0x38   : > { %p5562_p4 = por %p5561_p1, %p5560_p2 }
  0x3a   : > { %p5563_p6 = pnand %p5562_p4, %p5556_p5 }
  0x3c   : > { %5566 = shalt.err (!%p5563_p6)
}
  0x3d   : > { %s5567_s20 = scalar_lea.vmem %s5811_s14, 8192  ;;  %s5657_s11 = smov [#allocation2]  }
  0x3e   : > { %p5568_p8 = scmp.ne.s32.totalorder %s5811_s14, %s5567_s20  ;;  %s5572_s17 = sshll.u32 %s5657_s11, 4  ;;  %s5573_s17 = int_to_ptr.vmem [resolvable:$false] %s5572_s17 }
  0x3f   : > { %s5574_s21 = scalar_lea.vmem %s5573_s17, 16384  ;;  %p5575_p3 = scmp.lt.s32.totalorder %s5811_s14, %s5573_s17 }
  0x40   : > { %p5570_p10 = pnand %p5568_p8, %p5554_p0  ;;  %p5576_p7 = scmp.lt.s32.totalorder %s5574_s21, %s5567_s20 }
  0x42   : > { %p5571_p13 = pneg %p5570_p10  ;;  %p5577_p9 = por %p5576_p7, %p5575_p3 }
  0x44   : > { %p5578_p2 = pnand %p5577_p9, %p5571_p13 }
  0x46   : > { %5581 = shalt.err (!%p5578_p2)
}
  0x47   : > { %s5658_s10 = smov 256   ;;  %s5659_s22 = smov 16  }
  0x48   : > { %5473 = dma.hbm_to_vmem [thread:$0]  (!%p5807_p11), %s5805_s16, 8192, %s5811_s14, %s5813_s29, %s5658_s10, %s5658_s10, %s5659_s22  }
  0x49   : > { %p6961_p0 = scmp.ne.s32.totalorder %s6956_s9, 0 }
  0x4a   : > { %s5844_s12 = sand.u32 (!%p6961_p0), 1, %s5644_s25   ;;  %p6962_p5 = scmp.ne.s32.totalorder (!%p6961_p0), %s6954_s30, 0 }
  0x4b   : > { %272 = sbr.rel (%p6961_p0) target bundleno = 2467 (0x9a3), region = 48  ;;  %s4124_s23 = sshll.u32 (!%p6961_p0), %s5844_s12, 9 }
  0x4c   : > { %s275_s20 = scalar_lea.sflag (!%p6961_p0), [#allocation3], %s5844_s12  ;;  %s5850_s11 = scalar_lea.vmem (!%p6961_p0), [#allocation2], %s4124_s23 }
  0x52   : > { %5627 = dma.done.wait (%p6962_p5), %s275_s20, 8192  }
  0x53   : > { %5629 = vsyncadd (%p6962_p5), %s275_s20, 4294959104  ;;  %p6963_p11 = scmp.eq.s32.totalorder %s5726_s28, 0 }
  0x55   : > { %5631 = dma.done.wait (%p6963_p11), [#allocation6], 8192   ;;  %p6964_p1 = pmov %p6963_p11 }
  0x56   : > { %v5660_v0 = vmov 0.0|0.0   ;;  %v379_v1 = vld [vmem:[%s6944_s1] sm:$0xff]  ;;  %v380_v2 = vld [vmem:[%s6944_s1 + $0x8] sm:$0xff]  ;;  %v381_v3 = vld [vmem:[%s6944_s1 + $0x10] sm:$0xff]  ;;  %vm688_vm0 = vcmask 523264   ;;  %s6764_s16 = scalar_lea.vmem [#allocation7], %s4124_s23 }
  0x57   : > { %5633 = vsyncadd (%p6964_p1), [#allocation6], 4294959104  ;;  %5258 = vmatprep.subr.bf16.mxu0 %v5660_v0  ;;  %v5259_v4 = vpack.c.bf16 %v380_v2, %v379_v1  ;;  %v382_v5 = vld [vmem:[%s6944_s1 + $0x18] sm:$0xff]  ;;  %v383_v7 = vld [vmem:[%s6944_s1 + $0x20] sm:$0xff]  ;;  %s4425_s23 = sshll.u32 %s5726_s28, 13  ;;  %s4032_s14 = sshll.u32 %s6764_s16, 4  ;;  %s6896_s14 = int_to_ptr.vmem [resolvable:$true] %s4032_s14 }
  0x58   : > { %v5262_v6 = vpack.c.bf16 %v382_v5, %v381_v3  ;;  %v384_v8 = vld [vmem:[%s6944_s1 + $0x28] sm:$0xff]  ;;  %v385_v10 = vld [vmem:[%s6944_s1 + $0x30] sm:$0xff]  ;;  %v386_v11 = vld [vmem:[%s6944_s1 + $0x38] sm:$0xff]  ;;  %s6894_s29 = scalar_lea.hbm %s6950_s7, %s4425_s23  ;;  %s4018_s28 = scalar_lea.sflag [#allocation4], %s5844_s12 }
  0x59   : > { %5260 = vmatpush1.bf16.msra.mxu0 %v5259_v4  ;;  %v5265_v9 = vpack.c.bf16 %v384_v8, %v383_v7  ;;  %v316_v12 = vld [vmem:[%s5850_s11 + $0x8] sm:$0xff]  ;;  %v5268_v13 = vpack.c.bf16 %v386_v11, %v385_v10  ;;  %v387_v14 = vld [vmem:[%s6944_s1 + $0x40] sm:$0xff]  ;;  %v389_v17 = vld [vmem:[%s6944_s1 + $0x50] sm:$0xff]  ;;  %s5582_s17 = scalar_lea.vmem %s6896_s14, 8192  ;;  %s5662_s21 = smov [#allocation7]  }
  0x5a   : > { %5261 = vmatprep.subr.bf16.mxu0 %v5660_v0  ;;  %482 = vmatprep.mubr.f32.mxu0 %v316_v12  ;;  %v388_v15 = vld [vmem:[%s6944_s1 + $0x48] sm:$0xff]  ;;  %v390_v18 = vld [vmem:[%s6944_s1 + $0x58] sm:$0xff]  ;;  %v391_v20 = vld [vmem:[%s6944_s1 + $0x60] sm:$0xff]  ;;  %p5583_p4 = scmp.ne.s32.totalorder %s6896_s14, %s5582_s17  ;;  %s5586_s10 = sshll.u32 %s5662_s21, 4  ;;  %s5587_s10 = int_to_ptr.vmem [resolvable:$false] %s5586_s10 }
  0x5b   : > { %v5271_v16 = vpack.c.bf16 %v388_v15, %v387_v14  ;;  %v5274_v19 = vpack.c.bf16 %v390_v18, %v389_v17  ;;  %v392_v21 = vld [vmem:[%s6944_s1 + $0x68] sm:$0xff]  ;;  %v393_v23 = vld [vmem:[%s6944_s1 + $0x70] sm:$0xff]  ;;  %v394_v24 = vld [vmem:[%s6944_s1 + $0x78] sm:$0xff]  ;;  %s5588_s22 = scalar_lea.vmem %s5587_s10, 16384  ;;  %p5589_p10 = scmp.lt.s32.totalorder %s6896_s14, %s5587_s10 }
  0x5c   : > { %v5277_v22 = vpack.c.bf16 %v392_v21, %v391_v20  ;;  %v5280_v25 = vpack.c.bf16 %v394_v24, %v393_v23  ;;  %v676_v26 = vld [vmem:[#allocation5] sm:$0xff]  ;;  %v677_v27 = vld [vmem:[#allocation5 + $0x8] sm:$0xff]  ;;  %v397_v32 = vld [vmem:[%s6944_s1 + $0x90] sm:$0xff]  ;;  %p5584_p6 = pnand %p5583_p4, %p5796_p12  ;;  %p5590_p13 = scmp.lt.s32.totalorder %s5588_s22, %s5582_s17 }
  0x5d   : > { %5263 = vmatpush1.bf16.msra.mxu0 %v5262_v6  ;;  %v395_v28 = vld [vmem:[%s6944_s1 + $0x80] sm:$0xff]  ;;  %v396_v29 = vld [vmem:[%s6944_s1 + $0x88] sm:$0xff]  ;;  %v5306_v30 = vpack.c.bf16 %v677_v27, %v676_v26  ;;  %v398_v33 = vld [vmem:[%s6944_s1 + $0x98] sm:$0xff] }
  0x5e   : > { %5264 = vmatprep.subr.bf16.mxu0 %v5660_v0  ;;  %v5283_v31 = vpack.c.bf16 %v396_v29, %v395_v28  ;;  %v5286_v34 = vpack.c.bf16 %v398_v33, %v397_v32  ;;  %v399_v35 = vld [vmem:[%s6944_s1 + $0xa0] sm:$0xff]  ;;  %v400_v36 = vld [vmem:[%s6944_s1 + $0xa8] sm:$0xff]  ;;  %v401_v38 = vld [vmem:[%s6944_s1 + $0xb0] sm:$0xff]  ;;  %p5585_p8 = pneg %p5584_p6  ;;  %p5591_p3 = por %p5590_p13, %p5589_p10 }
  0x5f   : > { %5450 = vmatprep.subr.bf16.mxu1 %v5306_v30  ;;  %v5289_v37 = vpack.c.bf16 %v400_v36, %v399_v35  ;;  %v402_v39 = vld [vmem:[%s6944_s1 + $0xb8] sm:$0xff]  ;;  %v403_v41 = vld [vmem:[%s6944_s1 + $0xc0] sm:$0xff]  ;;  %v404_v42 = vld [vmem:[%s6944_s1 + $0xc8] sm:$0xff] }
  0x60   : > { %5454 = vmatpush3.bf16.msra.mxu1 %v5306_v30  ;;  %v5292_v40 = vpack.c.bf16 %v402_v39, %v401_v38  ;;  %v5295_v43 = vpack.c.bf16 %v404_v42, %v403_v41  ;;  %v405_v44 = vld [vmem:[%s6944_s1 + $0xd0] sm:$0xff]  ;;  %v406_v45 = vld [vmem:[%s6944_s1 + $0xd8] sm:$0xff]  ;;  %v407_v47 = vld [vmem:[%s6944_s1 + $0xe0] sm:$0xff]  ;;  %p5592_p7 = pnand %p5591_p3, %p5585_p8 }
  0x61   : > { %5266 = vmatpush1.bf16.msra.mxu0 %v5265_v9  ;;  %v5298_v46 = vpack.c.bf16 %v406_v45, %v405_v44  ;;  %v408_v48 = vld [vmem:[%s6944_s1 + $0xe8] sm:$0xff]  ;;  %v409_v50 = vld [vmem:[%s6944_s1 + $0xf0] sm:$0xff]  ;;  %v410_v51 = vld [vmem:[%s6944_s1 + $0xf8] sm:$0xff] }
  0x62   : > { %5267 = vmatprep.subr.bf16.mxu0 %v5660_v0  ;;  %v5301_v49 = vpack.c.bf16 %v408_v48, %v407_v47  ;;  %v5304_v52 = vpack.c.bf16 %v410_v51, %v409_v50  ;;  %v678_v53 = vld [vmem:[#allocation5 + $0x10] sm:$0xff]  ;;  %v679_v54 = vld [vmem:[#allocation5 + $0x18] sm:$0xff]  ;;  %v680_v56 = vld [vmem:[#allocation5 + $0x20] sm:$0xff] }
  0x63   : > { %v5310_v55 = vpack.c.bf16 %v679_v54, %v678_v53  ;;  %v681_v57 = vld [vmem:[#allocation5 + $0x28] sm:$0xff]  ;;  %v315_v58 = vld [vmem:[%s5850_s11] sm:$0xff]  ;;  %v318_v60 = vld [vmem:[%s5850_s11 + $0x18] sm:$0xff] }
  0x64   : > { %v5314_v59 = vpack.c.bf16 %v681_v57, %v680_v56  ;;  %v682_v61 = vld [vmem:[#allocation5 + $0x30] sm:$0xff]  ;;  %v683_v62 = vld [vmem:[#allocation5 + $0x38] sm:$0xff]  ;;  %v320_v1 = vld [vmem:[%s5850_s11 + $0x28] sm:$0xff] }
  0x65   : > { %5269 = vmatpush1.bf16.msra.mxu0 %v5268_v13  ;;  %5451 = vmatprep.subr.bf16.mxu1 %v5310_v55  ;;  %v317_v63 = vld [vmem:[%s5850_s11 + $0x10] sm:$0xff]  ;;  %v319_v2 = vld [vmem:[%s5850_s11 + $0x20] sm:$0xff]  ;;  %v322_v3 = vld [vmem:[%s5850_s11 + $0x38] sm:$0xff] }
  0x66   : > { %5270 = vmatprep.subr.bf16.mxu0 %v5660_v0  ;;  %5455 = vmatpush3.bf16.msra.mxu1 %v5310_v55  ;;  %v321_v4 = vld [vmem:[%s5850_s11 + $0x30] sm:$0xff]  ;;  %v324_v5 = vld [vmem:[%s5850_s11 + $0x48] sm:$0xff]  ;;  %v323_v6 = vld [vmem:[%s5850_s11 + $0x40] sm:$0xff] }
  0x67   : > { %5452 = vmatprep.subr.bf16.mxu1 %v5314_v59  ;;  %v326_v7 = vld [vmem:[%s5850_s11 + $0x58] sm:$0xff]  ;;  %v325_v8 = vld [vmem:[%s5850_s11 + $0x50] sm:$0xff]  ;;  %v328_v9 = vld [vmem:[%s5850_s11 + $0x68] sm:$0xff] }
  0x68   : > { %v327_v10 = vld [vmem:[%s5850_s11 + $0x60] sm:$0xff]  ;;  %v330_v11 = vld [vmem:[%s5850_s11 + $0x78] sm:$0xff]  ;;  %v329_v12 = vld [vmem:[%s5850_s11 + $0x70] sm:$0xff] }
  0x69   : > { %5272 = vmatpush1.bf16.msra.mxu0 %v5271_v16  ;;  %v332_v13 = vld [vmem:[%s5850_s11 + $0x88] sm:$0xff]  ;;  %v331_v14 = vld [vmem:[%s5850_s11 + $0x80] sm:$0xff]  ;;  %v334_v15 = vld [vmem:[%s5850_s11 + $0x98] sm:$0xff] }
  0x6a   : > { %5273 = vmatprep.subr.bf16.mxu0 %v5660_v0  ;;  %5456 = vmatpush3.bf16.msra.mxu1 %v5314_v59  ;;  %v333_v16 = vld [vmem:[%s5850_s11 + $0x90] sm:$0xff]  ;;  %v336_v17 = vld [vmem:[%s5850_s11 + $0xa8] sm:$0xff]  ;;  %v335_v18 = vld [vmem:[%s5850_s11 + $0xa0] sm:$0xff] }
  0x6b   : > { %v337_v20 = vld [vmem:[%s5850_s11 + $0xb0] sm:$0xff]  ;;  %v340_v21 = vld [vmem:[%s5850_s11 + $0xc8] sm:$0xff]  ;;  %v342_v23 = vld [vmem:[%s5850_s11 + $0xd8] sm:$0xff] }
  0x6c   : > { %v341_v24 = vld [vmem:[%s5850_s11 + $0xd0] sm:$0xff]  ;;  %v343_v26 = vld [vmem:[%s5850_s11 + $0xe0] sm:$0xff]  ;;  %v346_v27 = vld [vmem:[%s5850_s11 + $0xf8] sm:$0xff] }
  0x6d   : > { %5275 = vmatpush1.bf16.msra.mxu0 %v5274_v19  ;;  %v338_v19 = vld [vmem:[%s5850_s11 + $0xb8] sm:$0xff]  ;;  %v345_v28 = vld [vmem:[%s5850_s11 + $0xf0] sm:$0xff]  ;;  %v348_v29 = vld [vmem:[%s5850_s11 + $0x108] sm:$0xff] }
  0x6e   : > { %5276 = vmatprep.subr.bf16.mxu0 %v5660_v0  ;;  %v349_v32 = vld [vmem:[%s5850_s11 + $0x110] sm:$0xff]  ;;  %v352_v33 = vld [vmem:[%s5850_s11 + $0x128] sm:$0xff]  ;;  %v354_v35 = vld [vmem:[%s5850_s11 + $0x138] sm:$0xff] }
  0x6f   : > { %v353_v36 = vld [vmem:[%s5850_s11 + $0x130] sm:$0xff]  ;;  %v355_v38 = vld [vmem:[%s5850_s11 + $0x140] sm:$0xff]  ;;  %v358_v39 = vld [vmem:[%s5850_s11 + $0x158] sm:$0xff] }
  0x70   : > { %v360_v41 = vld [vmem:[%s5850_s11 + $0x168] sm:$0xff]  ;;  %v359_v42 = vld [vmem:[%s5850_s11 + $0x160] sm:$0xff]  ;;  %v361_v44 = vld [vmem:[%s5850_s11 + $0x170] sm:$0xff] }
  0x71   : > { %5278 = vmatpush1.bf16.msra.mxu0 %v5277_v22  ;;  %v339_v22 = vld [vmem:[%s5850_s11 + $0xc0] sm:$0xff]  ;;  %v364_v45 = vld [vmem:[%s5850_s11 + $0x188] sm:$0xff]  ;;  %v366_v47 = vld [vmem:[%s5850_s11 + $0x198] sm:$0xff] }
  0x72   : > { %5279 = vmatprep.subr.bf16.mxu0 %v5660_v0  ;;  %v365_v48 = vld [vmem:[%s5850_s11 + $0x190] sm:$0xff]  ;;  %v367_v50 = vld [vmem:[%s5850_s11 + $0x1a0] sm:$0xff]  ;;  %v370_v51 = vld [vmem:[%s5850_s11 + $0x1b8] sm:$0xff] }
  0x73   : > { %v372_v53 = vld [vmem:[%s5850_s11 + $0x1c8] sm:$0xff]  ;;  %v371_v54 = vld [vmem:[%s5850_s11 + $0x1c0] sm:$0xff]  ;;  %v373_v56 = vld [vmem:[%s5850_s11 + $0x1d0] sm:$0xff] }
  0x74   : > { %v376_v57 = vld [vmem:[%s5850_s11 + $0x1e8] sm:$0xff] }
  0x75   : > { %5281 = vmatpush1.bf16.msra.mxu0 %v5280_v25  ;;  %v344_v25 = vld [vmem:[%s5850_s11 + $0xe8] sm:$0xff] }
  0x76   : > { %5282 = vmatprep.subr.bf16.mxu0 %v5660_v0 }
  0x79   : > { %5284 = vmatpush1.bf16.msra.mxu0 %v5283_v31  ;;  %v350_v31 = vld [vmem:[%s5850_s11 + $0x118] sm:$0xff] }
  0x7a   : > { %5285 = vmatprep.subr.bf16.mxu0 %v5660_v0 }
  0x7d   : > { %5287 = vmatpush1.bf16.msra.mxu0 %v5286_v34  ;;  %v351_v34 = vld [vmem:[%s5850_s11 + $0x120] sm:$0xff] }
  0x7e   : > { %5288 = vmatprep.subr.bf16.mxu0 %v5660_v0 }
  0x81   : > { %5290 = vmatpush1.bf16.msra.mxu0 %v5289_v37  ;;  %v356_v37 = vld [vmem:[%s5850_s11 + $0x148] sm:$0xff] }
  0x82   : > { %5291 = vmatprep.subr.bf16.mxu0 %v5660_v0 }
  0x85   : > { %5293 = vmatpush1.bf16.msra.mxu0 %v5292_v40  ;;  %v357_v40 = vld [vmem:[%s5850_s11 + $0x150] sm:$0xff] }
  0x86   : > { %5294 = vmatprep.subr.bf16.mxu0 %v5660_v0 }
  0x89   : > { %5296 = vmatpush1.bf16.msra.mxu0 %v5295_v43  ;;  %v362_v43 = vld [vmem:[%s5850_s11 + $0x178] sm:$0xff] }
  0x8a   : > { %5297 = vmatprep.subr.bf16.mxu0 %v5660_v0 }
  0x8d   : > { %5299 = vmatpush1.bf16.msra.mxu0 %v5298_v46  ;;  %v363_v46 = vld [vmem:[%s5850_s11 + $0x180] sm:$0xff] }
  0x8e   : > { %5300 = vmatprep.subr.bf16.mxu0 %v5660_v0 }
  0x91   : > { %5302 = vmatpush1.bf16.msra.mxu0 %v5301_v49  ;;  %v368_v49 = vld [vmem:[%s5850_s11 + $0x1a8] sm:$0xff] }
  0x92   : > { %5303 = vmatprep.subr.bf16.mxu0 %v5660_v0  ;;  %v5318_v0 = vpack.c.bf16 %v683_v62, %v682_v61  ;;  %v6039_v61 = vld [vmem:[%s6945_s2] ss:$0 sm:$0xff] }
  0x94   : > { %5453 = vmatprep.subr.bf16.mxu1 %v5318_v0 }
  0x95   : > { %5305 = vmatpush1.bf16.msra.mxu0 %v5304_v52  ;;  %5457 = vmatpush3.bf16.msra.mxu1 %v5318_v0  ;;  %v369_v52 = vld [vmem:[%s5850_s11 + $0x1b0] sm:$0xff] }
  0x96   : > { %5307 = vmatprep.subr.bf16.mxu0 %v5306_v30 }
  0x98   : > { %483 = vmatmul.mubr.f32.vlgmr.msra.gmra.mrb[0].mxu0 %v315_v58  ;;  %v375_v58 = vld [vmem:[%s5850_s11 + $0x1e0] sm:$0xff] }
  0x99   : > { %487 = vmatprep.mubr.f32.mxu0 %v318_v60  ;;  %5309 = vmatpush3.bf16.msra.mxu0 %v5306_v30  ;;  %v347_v30 = vld [vmem:[%s5850_s11 + $0x100] sm:$0xff]  ;;  %v377_v60 = vld [vmem:[%s5850_s11 + $0x1f0] sm:$0xff] }
  0x9a   : > { %5311 = vmatprep.subr.bf16.mxu0 %v5310_v55 }
  0x9c   : > { %488 = vmatmul.mubr.f32.gmra.mrb[2].mxu0 %v317_v63 }
  0x9d   : > { %492 = vmatprep.mubr.f32.mxu0 %v320_v1  ;;  %5313 = vmatpush3.bf16.msra.mxu0 %v5310_v55  ;;  %v374_v55 = vld [vmem:[%s5850_s11 + $0x1d8] sm:$0xff]  ;;  %v1043_v1 = vld [vmem:[#allocation5 + $0x40] sm:$0xff] }
  0x9e   : > { %5315 = vmatprep.subr.bf16.mxu0 %v5314_v59 }
  0xa0   : > { %493 = vmatmul.mubr.f32.gmra.mrb[4].mxu0 %v319_v2  ;;  %v1044_v2 = vld [vmem:[#allocation5 + $0x48] sm:$0xff] }
  0xa1   : > { %497 = vmatprep.mubr.f32.mxu0 %v322_v3  ;;  %5317 = vmatpush3.bf16.msra.mxu0 %v5314_v59  ;;  %v378_v59 = vld [vmem:[%s5850_s11 + $0x1f8] sm:$0xff]  ;;  %v6042_v3 = vpack.c.bf16 %v1044_v2, %v1043_v1 }
  0xa2   : > { %5319 = vmatprep.subr.bf16.mxu0 %v5318_v0 }
  0xa3   : > { %5323 = vmatprep.subr.bf16.mxu1 %v6042_v3 }
  0xa4   : > { %498 = vmatmul.mubr.f32.gmra.mrb[6].mxu0 %v321_v4 }
  0xa5   : > { %502 = vmatprep.mubr.f32.mxu0 %v324_v5  ;;  %5321 = vmatpush3.bf16.msra.mxu0 %v5318_v0 }
  0xa8   : > { %503 = vmatmul.mubr.f32.gmra.mrb[8].mxu0 %v323_v6 }
  0xa9   : > { %507 = vmatprep.mubr.f32.mxu0 %v326_v7 }
  0xac   : > { %508 = vmatmul.mubr.f32.gmra.mrb[10].mxu0 %v325_v8 }
  0xad   : > { %512 = vmatprep.mubr.f32.mxu0 %v328_v9 }
  0xb0   : > { %513 = vmatmul.mubr.f32.gmra.mrb[12].mxu0 %v327_v10 }
  0xb1   : > { %517 = vmatprep.mubr.f32.mxu0 %v330_v11 }
  0xb4   : > { %518 = vmatmul.mubr.f32.gmra.mrb[14].mxu0 %v329_v12 }
  0xb5   : > { %522 = vmatprep.mubr.f32.mxu0 %v332_v13 }
  0xb8   : > { %523 = vmatmul.mubr.f32.gmra.mrb[16].mxu0 %v331_v14 }
  0xb9   : > { %527 = vmatprep.mubr.f32.mxu0 %v334_v15 }
  0xbc   : > { %528 = vmatmul.mubr.f32.gmra.mrb[18].mxu0 %v333_v16 }
  0xbd   : > { %532 = vmatprep.mubr.f32.mxu0 %v336_v17 }
  0xc0   : > { %533 = vmatmul.mubr.f32.gmra.mrb[20].mxu0 %v335_v18 }
  0xc1   : > { %537 = vmatprep.mubr.f32.mxu0 %v338_v19 }
  0xc4   : > { %538 = vmatmul.mubr.f32.gmra.mrb[22].mxu0 %v337_v20 }
  0xc5   : > { %542 = vmatprep.mubr.f32.mxu0 %v340_v21 }
  0xc8   : > { %543 = vmatmul.mubr.f32.gmra.mrb[24].mxu0 %v339_v22 }
  0xc9   : > { %547 = vmatprep.mubr.f32.mxu0 %v342_v23 }
  0xcc   : > { %548 = vmatmul.mubr.f32.gmra.mrb[26].mxu0 %v341_v24 }
  0xcd   : > { %552 = vmatprep.mubr.f32.mxu0 %v344_v25 }
  0xd0   : > { %553 = vmatmul.mubr.f32.gmra.mrb[28].mxu0 %v343_v26 }
  0xd1   : > { %557 = vmatprep.mubr.f32.mxu0 %v346_v27 }
  0xd4   : > { %558 = vmatmul.mubr.f32.gmra.mrb[30].mxu0 %v345_v28 }
  0xd5   : > { %562 = vmatprep.mubr.f32.mxu0 %v348_v29 }
  0xd8   : > { %563 = vmatmul.mubr.f32.gmra.mrb[32].mxu0 %v347_v30 }
  0xd9   : > { %567 = vmatprep.mubr.f32.mxu0 %v350_v31 }
  0xdc   : > { %568 = vmatmul.mubr.f32.gmra.mrb[34].mxu0 %v349_v32 }
  0xdd   : > { %572 = vmatprep.mubr.f32.mxu0 %v352_v33 }
  0xe0   : > { %573 = vmatmul.mubr.f32.gmra.mrb[36].mxu0 %v351_v34 }
  0xe1   : > { %577 = vmatprep.mubr.f32.mxu0 %v354_v35 }
  0xe4   : > { %578 = vmatmul.mubr.f32.gmra.mrb[38].mxu0 %v353_v36 }
  0xe5   : > { %582 = vmatprep.mubr.f32.mxu0 %v356_v37 }
  0xe8   : > { %583 = vmatmul.mubr.f32.gmra.mrb[40].mxu0 %v355_v38 }
  0xe9   : > { %587 = vmatprep.mubr.f32.mxu0 %v358_v39 }
  0xec   : > { %588 = vmatmul.mubr.f32.gmra.mrb[42].mxu0 %v357_v40 }
  0xed   : > { %592 = vmatprep.mubr.f32.mxu0 %v360_v41 }
  0xf0   : > { %593 = vmatmul.mubr.f32.gmra.mrb[44].mxu0 %v359_v42 }
  0xf1   : > { %597 = vmatprep.mubr.f32.mxu0 %v362_v43 }
  0xf4   : > { %598 = vmatmul.mubr.f32.gmra.mrb[46].mxu0 %v361_v44 }
  0xf5   : > { %602 = vmatprep.mubr.f32.mxu0 %v364_v45 }
  0xf8   : > { %603 = vmatmul.mubr.f32.gmra.mrb[48].mxu0 %v363_v46 }
  0xf9   : > { %607 = vmatprep.mubr.f32.mxu0 %v366_v47 }
  0xfc   : > { %608 = vmatmul.mubr.f32.gmra.mrb[50].mxu0 %v365_v48 }
  0xfd   : > { %612 = vmatprep.mubr.f32.mxu0 %v368_v49 }
 0x100   : > { %613 = vmatmul.mubr.f32.gmra.mrb[52].mxu0 %v367_v50 }
 0x101   : > { %617 = vmatprep.mubr.f32.mxu0 %v370_v51 }
 0x104   : > { %618 = vmatmul.mubr.f32.gmra.mrb[54].mxu0 %v369_v52 }
 0x105   : > { %622 = vmatprep.mubr.f32.mxu0 %v372_v53 }
 0x108   : > { %623 = vmatmul.mubr.f32.gmra.mrb[56].mxu0 %v371_v54 }
 0x109   : > { %627 = vmatprep.mubr.f32.mxu0 %v374_v55 }
 0x10c   : > { %628 = vmatmul.mubr.f32.gmra.mrb[58].mxu0 %v373_v56 }
 0x10d   : > { %632 = vmatprep.mubr.f32.mxu0 %v376_v57 }
 0x110   : > { %633 = vmatmul.mubr.f32.gmra.mrb[60].mxu0 %v375_v58 }
 0x111   : > { %637 = vmatprep.mubr.f32.mxu0 %v378_v59 }
 0x114   : > { %638 = vmatmul.mubr.f32.gmra.mrb[62].mxu0 %v377_v60 }
 0x16b   : > { %v484_v62 = vpop.f32.mrb[0].mxu0 }
 0x16c   : > { %v485_v63 = vadd.f32 %v6039_v61, %v484_v62  ;;  %v486_v0 = vpop.f32.mrb[1].mxu0 }
 0x16e   : > { %v643_v4 = vmax.f32 %v485_v63, 0.0 }
 0x16f   : > { %v489_v5 = vpop.f32.mrb[2].mxu0 }
 0x170   : > { %v490_v6 = vadd.f32 %v6039_v61, %v489_v5  ;;  %v491_v7 = vpop.f32.mrb[3].mxu0  ;;  %4762 = vmatprep.mubr.msk.f32.mxu0 %vm688_vm0, %v643_v4 }
 0x172   : > { %v644_v8 = vmax.f32 %v490_v6, 0.0 }
 0x173   : > { %v494_v9 = vpop.f32.mrb[4].mxu0 }
 0x174   : > { %v495_v10 = vadd.f32 %v6039_v61, %v494_v9  ;;  %v496_v11 = vpop.f32.mrb[5].mxu0  ;;  %4763 = vmatmul.mubr.msk.f32.vlgmr.msra.gmra.mrb[64].mxu0 %vm688_vm0, %v644_v8 }
 0x176   : > { %v645_v12 = vmax.f32 %v495_v10, 0.0 }
 0x177   : > { %v499_v13 = vpop.f32.mrb[6].mxu0 }
 0x178   : > { %v500_v14 = vadd.f32 %v6039_v61, %v499_v13  ;;  %v501_v15 = vpop.f32.mrb[7].mxu0  ;;  %4765 = vmatprep.mubr.msk.f32.mxu0 %vm688_vm0, %v645_v12 }
 0x17a   : > { %v646_v16 = vmax.f32 %v500_v14, 0.0 }
 0x17b   : > { %v504_v17 = vpop.f32.mrb[8].mxu0 }
 0x17c   : > { %v505_v18 = vadd.f32 %v6039_v61, %v504_v17  ;;  %v506_v19 = vpop.f32.mrb[9].mxu0  ;;  %4766 = vmatmul.mubr.msk.f32.gmra.mrb[66].mxu0 %vm688_vm0, %v646_v16 }
 0x17e   : > { %v647_v20 = vmax.f32 %v505_v18, 0.0 }
 0x17f   : > { %v509_v21 = vpop.f32.mrb[10].mxu0 }
 0x180   : > { %v510_v22 = vadd.f32 %v6039_v61, %v509_v21  ;;  %v511_v23 = vpop.f32.mrb[11].mxu0  ;;  %4768 = vmatprep.mubr.msk.f32.mxu0 %vm688_vm0, %v647_v20 }
 0x182   : > { %v648_v24 = vmax.f32 %v510_v22, 0.0 }
 0x183   : > { %v514_v25 = vpop.f32.mrb[12].mxu0 }
 0x184   : > { %v515_v26 = vadd.f32 %v6039_v61, %v514_v25  ;;  %v516_v27 = vpop.f32.mrb[13].mxu0  ;;  %4769 = vmatmul.mubr.msk.f32.gmra.mrb[68].mxu0 %vm688_vm0, %v648_v24  ;;  %v1045_v24 = vld [vmem:[#allocation5 + $0x50] sm:$0xff]  ;;  %v1046_v25 = vld [vmem:[#allocation5 + $0x58] sm:$0xff] }
 0x186   : > { %v649_v28 = vmax.f32 %v515_v26, 0.0 }
 0x187   : > { %v519_v29 = vpop.f32.mrb[14].mxu0 }
 0x188   : > { %v520_v30 = vadd.f32 %v6039_v61, %v519_v29  ;;  %v521_v31 = vpop.f32.mrb[15].mxu0  ;;  %4771 = vmatprep.mubr.msk.f32.mxu0 %vm688_vm0, %v649_v28  ;;  %v5326_v29 = vpack.c.bf16 %v1046_v25, %v1045_v24  ;;  %v1411_v24 = vld [vmem:[#allocation5 + $0x90] sm:$0xff]  ;;  %v1412_v25 = vld [vmem:[#allocation5 + $0x98] sm:$0xff] }
 0x189   : > { %v1047_v31 = vld [vmem:[#allocation5 + $0x60] sm:$0xff] }
 0x18a   : > { %v650_v32 = vmax.f32 %v520_v30, 0.0 }
 0x18b   : > { %v524_v33 = vpop.f32.mrb[16].mxu0 }
 0x18c   : > { %v525_v34 = vadd.f32 %v6039_v61, %v524_v33  ;;  %v526_v35 = vpop.f32.mrb[17].mxu0  ;;  %4772 = vmatmul.mubr.msk.f32.gmra.mrb[70].mxu0 %vm688_vm0, %v650_v32  ;;  %v1048_v32 = vld [vmem:[#allocation5 + $0x68] sm:$0xff] }
 0x18e   : > { %v651_v36 = vmax.f32 %v525_v34, 0.0 }
 0x18f   : > { %v529_v37 = vpop.f32.mrb[18].mxu0 }
 0x190   : > { %v530_v38 = vadd.f32 %v6039_v61, %v529_v37  ;;  %v531_v39 = vpop.f32.mrb[19].mxu0  ;;  %4774 = vmatprep.mubr.msk.f32.mxu0 %vm688_vm0, %v651_v36  ;;  %v5330_v36 = vpack.c.bf16 %v1048_v32, %v1047_v31 }
 0x191   : > { %v1050_v39 = vld [vmem:[#allocation5 + $0x78] sm:$0xff] }
 0x192   : > { %v652_v40 = vmax.f32 %v530_v38, 0.0  ;;  %v1049_v38 = vld [vmem:[#allocation5 + $0x70] sm:$0xff] }
 0x193   : > { %v534_v41 = vpop.f32.mrb[20].mxu0 }
 0x194   : > { %v535_v42 = vadd.f32 %v6039_v61, %v534_v41  ;;  %v536_v43 = vpop.f32.mrb[21].mxu0  ;;  %4775 = vmatmul.mubr.msk.f32.gmra.mrb[72].mxu0 %vm688_vm0, %v652_v40 }
 0x195   : > { %v5334_v43 = vpack.c.bf16 %v1050_v39, %v1049_v38 }
 0x196   : > { %v653_v44 = vmax.f32 %v535_v42, 0.0 }
 0x197   : > { %v539_v45 = vpop.f32.mrb[22].mxu0 }
 0x198   : > { %v540_v46 = vadd.f32 %v6039_v61, %v539_v45  ;;  %v541_v47 = vpop.f32.mrb[23].mxu0  ;;  %4777 = vmatprep.mubr.msk.f32.mxu0 %vm688_vm0, %v653_v44 }
 0x19a   : > { %v654_v48 = vmax.f32 %v540_v46, 0.0 }
 0x19b   : > { %v544_v49 = vpop.f32.mrb[24].mxu0 }
 0x19c   : > { %v545_v50 = vadd.f32 %v6039_v61, %v544_v49  ;;  %v546_v51 = vpop.f32.mrb[25].mxu0  ;;  %4778 = vmatmul.mubr.msk.f32.gmra.mrb[74].mxu0 %vm688_vm0, %v654_v48 }
 0x19e   : > { %v655_v52 = vmax.f32 %v545_v50, 0.0 }
 0x19f   : > { %v549_v53 = vpop.f32.mrb[26].mxu0 }
 0x1a0   : > { %v550_v54 = vadd.f32 %v6039_v61, %v549_v53  ;;  %v551_v55 = vpop.f32.mrb[27].mxu0  ;;  %4780 = vmatprep.mubr.msk.f32.mxu0 %vm688_vm0, %v655_v52 }
 0x1a2   : > { %v656_v56 = vmax.f32 %v550_v54, 0.0 }
 0x1a3   : > { %v554_v57 = vpop.f32.mrb[28].mxu0 }
 0x1a4   : > { %v555_v58 = vadd.f32 %v6039_v61, %v554_v57  ;;  %v556_v59 = vpop.f32.mrb[29].mxu0  ;;  %4781 = vmatmul.mubr.msk.f32.gmra.mrb[76].mxu0 %vm688_vm0, %v656_v56 }
 0x1a6   : > { %v657_v60 = vmax.f32 %v555_v58, 0.0 }
 0x1a7   : > { %v559_v62 = vpop.f32.mrb[30].mxu0 }
 0x1a8   : > { %v560_v63 = vadd.f32 %v6039_v61, %v559_v62  ;;  %v561_v0 = vpop.f32.mrb[31].mxu0  ;;  %4783 = vmatprep.mubr.msk.f32.mxu0 %vm688_vm0, %v657_v60 }
 0x1aa   : > { %v658_v1 = vmax.f32 %v560_v63, 0.0 }
 0x1ab   : > { %v564_v2 = vpop.f32.mrb[32].mxu0 }
 0x1ac   : > { %v565_v4 = vadd.f32 %v6039_v61, %v564_v2  ;;  %v566_v5 = vpop.f32.mrb[33].mxu0  ;;  %4784 = vmatmul.mubr.msk.f32.gmra.mrb[78].mxu0 %vm688_vm0, %v658_v1 }
 0x1ae   : > { %v659_v6 = vmax.f32 %v565_v4, 0.0 }
 0x1af   : > { %v569_v7 = vpop.f32.mrb[34].mxu0 }
 0x1b0   : > { %v570_v8 = vadd.f32 %v6039_v61, %v569_v7  ;;  %v571_v9 = vpop.f32.mrb[35].mxu0  ;;  %4786 = vmatprep.mubr.msk.f32.mxu0 %vm688_vm0, %v659_v6 }
 0x1b2   : > { %v660_v10 = vmax.f32 %v570_v8, 0.0 }
 0x1b3   : > { %v574_v11 = vpop.f32.mrb[36].mxu0 }
 0x1b4   : > { %v575_v12 = vadd.f32 %v6039_v61, %v574_v11  ;;  %v576_v13 = vpop.f32.mrb[37].mxu0  ;;  %4787 = vmatmul.mubr.msk.f32.gmra.mrb[80].mxu0 %vm688_vm0, %v660_v10 }
 0x1b5   : > { %v684_v13 = vlaneseq }
 0x1b6   : > { %v661_v14 = vmax.f32 %v575_v12, 0.0 }
 0x1b7   : > { %v579_v15 = vpop.f32.mrb[38].mxu0 }
 0x1b8   : > { %v580_v16 = vadd.f32 %v6039_v61, %v579_v15  ;;  %v581_v17 = vpop.f32.mrb[39].mxu0  ;;  %4789 = vmatprep.mubr.msk.f32.mxu0 %vm688_vm0, %v661_v14  ;;  %v6109_v14 = vshrl.u32 %v684_v13, 7 }
 0x1b9   : > { %v1409_v17 = vld [vmem:[#allocation5 + $0x80] sm:$0xff] }
 0x1ba   : > { %v662_v18 = vmax.f32 %v580_v16, 0.0  ;;  %v686_v15 = vsub.s32 0, %v6109_v14  ;;  %v6115_v16 = vld [vmem:[%s6947_s4] sm:$0xff] }
 0x1bb   : > { %v584_v19 = vpop.f32.mrb[40].mxu0 }
 0x1bc   : > { %v585_v20 = vadd.f32 %v6039_v61, %v584_v19  ;;  %v586_v21 = vpop.f32.mrb[41].mxu0  ;;  %4790 = vmatmul.mubr.msk.f32.gmra.mrb[82].mxu0 %vm688_vm0, %v662_v18  ;;  %v1410_v18 = vld [vmem:[#allocation5 + $0x88] sm:$0xff] }
 0x1be   : > { %v663_v22 = vmax.f32 %v585_v20, 0.0  ;;  %v5338_v20 = vpack.c.bf16 %v1410_v18, %v1409_v17 }
 0x1bf   : > { %v589_v23 = vpop.f32.mrb[42].mxu0 }
 0x1c0   : > { %v590_v26 = vadd.f32 %v6039_v61, %v589_v23  ;;  %v591_v27 = vpop.f32.mrb[43].mxu0  ;;  %4792 = vmatprep.mubr.msk.f32.mxu1 %vm688_vm0, %v663_v22 }
 0x1c2   : > { %v664_v28 = vmax.f32 %v590_v26, 0.0 }
 0x1c3   : > { %v594_v30 = vpop.f32.mrb[44].mxu0 }
 0x1c4   : > { %v595_v33 = vadd.f32 %v6039_v61, %v594_v30  ;;  %v596_v34 = vpop.f32.mrb[45].mxu0  ;;  %4793 = vmatmul.mubr.msk.f32.vlgmr.msra.gmra.mrb[0].mxu1 %vm688_vm0, %v664_v28  ;;  %v5342_v28 = vpack.c.bf16 %v1412_v25, %v1411_v24  ;;  %v1414_v30 = vld [vmem:[#allocation5 + $0xa8] sm:$0xff] }
 0x1c5   : > { %5325 = vmatpush3.bf16.msra.mxu1 %v6042_v3 }
 0x1c6   : > { %v665_v35 = vmax.f32 %v595_v33, 0.0  ;;  %5327 = vmatprep.subr.bf16.mxu1 %v5326_v29 }
 0x1c7   : > { %v599_v37 = vpop.f32.mrb[46].mxu0 }
 0x1c8   : > { %v600_v40 = vadd.f32 %v6039_v61, %v599_v37  ;;  %v601_v41 = vpop.f32.mrb[47].mxu0  ;;  %4795 = vmatprep.mubr.msk.f32.mxu1 %vm688_vm0, %v665_v35  ;;  %v1416_v37 = vld [vmem:[#allocation5 + $0xb8] sm:$0xff] }
 0x1c9   : > { %5329 = vmatpush3.bf16.msra.mxu1 %v5326_v29  ;;  %v1413_v29 = vld [vmem:[#allocation5 + $0xa0] sm:$0xff] }
 0x1ca   : > { %v666_v42 = vmax.f32 %v600_v40, 0.0  ;;  %5331 = vmatprep.subr.bf16.mxu1 %v5330_v36  ;;  %v5346_v34 = vpack.c.bf16 %v1414_v30, %v1413_v29 }
 0x1cb   : > { %v604_v44 = vpop.f32.mrb[48].mxu0 }
 0x1cc   : > { %v605_v45 = vadd.f32 %v6039_v61, %v604_v44  ;;  %v606_v46 = vpop.f32.mrb[49].mxu0  ;;  %4796 = vmatmul.mubr.msk.f32.gmra.mrb[2].mxu1 %vm688_vm0, %v666_v42 }
 0x1cd   : > { %5333 = vmatpush3.bf16.msra.mxu1 %v5330_v36  ;;  %v1415_v36 = vld [vmem:[#allocation5 + $0xb0] sm:$0xff] }
 0x1ce   : > { %v667_v3 = vmax.f32 %v605_v45, 0.0  ;;  %5335 = vmatprep.subr.bf16.mxu1 %v5334_v43  ;;  %v5350_v40 = vpack.c.bf16 %v1416_v37, %v1415_v36 }
 0x1cf   : > { %v609_v47 = vpop.f32.mrb[50].mxu0 }
 0x1d0   : > { %v610_v48 = vadd.f32 %v6039_v61, %v609_v47  ;;  %v611_v49 = vpop.f32.mrb[51].mxu0  ;;  %4798 = vmatprep.mubr.msk.f32.mxu1 %vm688_vm0, %v667_v3 }
 0x1d1   : > { %5337 = vmatpush3.bf16.msra.mxu1 %v5334_v43 }
 0x1d2   : > { %v668_v50 = vmax.f32 %v610_v48, 0.0  ;;  %5339 = vmatprep.subr.bf16.mxu1 %v5338_v20 }
 0x1d3   : > { %v614_v51 = vpop.f32.mrb[52].mxu0 }
 0x1d4   : > { %v615_v52 = vadd.f32 %v6039_v61, %v614_v51  ;;  %v616_v53 = vpop.f32.mrb[53].mxu0  ;;  %4799 = vmatmul.mubr.msk.f32.gmra.mrb[4].mxu1 %vm688_vm0, %v668_v50 }
 0x1d6   : > { %v669_v54 = vmax.f32 %v615_v52, 0.0 }
 0x1d7   : > { %v619_v55 = vpop.f32.mrb[54].mxu0 }
 0x1d8   : > { %v620_v56 = vadd.f32 %v6039_v61, %v619_v55  ;;  %v621_v57 = vpop.f32.mrb[55].mxu0  ;;  %4801 = vmatprep.mubr.msk.f32.mxu1 %vm688_vm0, %v669_v54 }
 0x1da   : > { %v670_v58 = vmax.f32 %v620_v56, 0.0 }
 0x1db   : > { %v624_v59 = vpop.f32.mrb[56].mxu0 }
 0x1dc   : > { %v625_v60 = vadd.f32 %v6039_v61, %v624_v59  ;;  %v626_v62 = vpop.f32.mrb[57].mxu0  ;;  %4802 = vmatmul.mubr.msk.f32.gmra.mrb[6].mxu1 %vm688_vm0, %v670_v58 }
 0x1de   : > { %v671_v63 = vmax.f32 %v625_v60, 0.0 }
 0x1df   : > { %v629_v0 = vpop.f32.mrb[58].mxu0 }
 0x1e0   : > { %v630_v1 = vadd.f32 %v6039_v61, %v629_v0  ;;  %v631_v2 = vpop.f32.mrb[59].mxu0  ;;  %4804 = vmatprep.mubr.msk.f32.mxu1 %vm688_vm0, %v671_v63 }
 0x1e2   : > { %v672_v4 = vmax.f32 %v630_v1, 0.0 }
 0x1e3   : > { %v634_v5 = vpop.f32.mrb[60].mxu0 }
 0x1e4   : > { %v635_v6 = vadd.f32 %v6039_v61, %v634_v5  ;;  %v636_v7 = vpop.f32.mrb[61].mxu0  ;;  %4805 = vmatmul.mubr.msk.f32.gmra.mrb[8].mxu1 %vm688_vm0, %v672_v4 }
 0x1e6   : > { %v673_v8 = vmax.f32 %v635_v6, 0.0 }
 0x1e7   : > { %v639_v9 = vpop.f32.mrb[62].mxu0 }
 0x1e8   : > { %v640_v10 = vadd.f32 %v6039_v61, %v639_v9  ;;  %v641_v11 = vpop.f32.mrb[63].mxu0  ;;  %4807 = vmatprep.mubr.msk.f32.mxu1 %vm688_vm0, %v673_v8  ;;  %v6120_v61 = vrot.slane %v6115_v16, %v686_v15 }
 0x1ea   : > { %v674_v12 = vmax.f32 %v640_v10, 0.0 }
 0x1ec   : > { %4808 = vmatmul.mubr.msk.f32.gmra.mrb[10].mxu1 %vm688_vm0, %v674_v12 }
 0x247   : > { %v4764_v19 = vpop.f32.mrb[64].mxu0 }
 0x248   : > { %v857_v21 = vadd.f32 %v4764_v19, %v6120_v61  ;;  %v851_v22 = vpop.f32.mrb[65].mxu0 }
 0x249   : > { %v852_v23 = vadd.f32 %v851_v22, %v6120_v61 }
 0x24a   : > { %v1011_v27 = vmax.f32 %v857_v21, 0.0 }
 0x24b   : > { %v1010_v26 = vmax.f32 %v852_v23, 0.0 }
 0x24d   : > { %4826 = vmatprep.mubr.msk.f32.mxu1 %vm688_vm0, %v1010_v26 }
 0x24e   : > { %4827 = vmatmul.mubr.msk.f32.vlgmr.msra.gmra.mrb[12].mxu1 %vm688_vm0, %v1011_v27 }
 0x24f   : > { %v4767_v31 = vpop.f32.mrb[66].mxu0  ;;  %5341 = vmatpush3.bf16.msra.mxu1 %v5338_v20 }
 0x250   : > { %v867_v32 = vadd.f32 %v4767_v31, %v6120_v61  ;;  %v861_v33 = vpop.f32.mrb[67].mxu0  ;;  %5343 = vmatprep.subr.bf16.mxu1 %v5342_v28 }
 0x251   : > { %v862_v35 = vadd.f32 %v861_v33, %v6120_v61 }
 0x252   : > { %v1013_v39 = vmax.f32 %v867_v32, 0.0 }
 0x253   : > { %v1012_v38 = vmax.f32 %v862_v35, 0.0  ;;  %5345 = vmatpush3.bf16.msra.mxu1 %v5342_v28 }
 0x254   : > { %5347 = vmatprep.subr.bf16.mxu1 %v5346_v34 }
 0x255   : > { %4829 = vmatprep.mubr.msk.f32.mxu1 %vm688_vm0, %v1012_v38 }
 0x256   : > { %4830 = vmatmul.mubr.msk.f32.gmra.mrb[14].mxu1 %vm688_vm0, %v1013_v39 }
 0x257   : > { %v4770_v41 = vpop.f32.mrb[68].mxu0  ;;  %5349 = vmatpush3.bf16.msra.mxu1 %v5346_v34 }
 0x258   : > { %v877_v42 = vadd.f32 %v4770_v41, %v6120_v61  ;;  %v871_v43 = vpop.f32.mrb[69].mxu0  ;;  %5351 = vmatprep.subr.bf16.mxu1 %v5350_v40 }
 0x259   : > { %v872_v44 = vadd.f32 %v871_v43, %v6120_v61 }
 0x25a   : > { %v1015_v46 = vmax.f32 %v877_v42, 0.0 }
 0x25b   : > { %v1014_v45 = vmax.f32 %v872_v44, 0.0  ;;  %5353 = vmatpush3.bf16.msra.mxu1 %v5350_v40 }
 0x25d   : > { %4832 = vmatprep.mubr.msk.f32.mxu1 %vm688_vm0, %v1014_v45 }
 0x25e   : > { %4833 = vmatmul.mubr.msk.f32.gmra.mrb[16].mxu1 %vm688_vm0, %v1015_v46 }
 0x25f   : > { %v4773_v3 = vpop.f32.mrb[70].mxu0 }
 0x260   : > { %v887_v47 = vadd.f32 %v4773_v3, %v6120_v61  ;;  %v881_v48 = vpop.f32.mrb[71].mxu0 }
 0x261   : > { %v882_v49 = vadd.f32 %v881_v48, %v6120_v61 }
 0x262   : > { %v1017_v51 = vmax.f32 %v887_v47, 0.0 }
 0x263   : > { %v1016_v50 = vmax.f32 %v882_v49, 0.0 }
 0x265   : > { %4835 = vmatprep.mubr.msk.f32.mxu1 %vm688_vm0, %v1016_v50 }
 0x266   : > { %4836 = vmatmul.mubr.msk.f32.gmra.mrb[18].mxu1 %vm688_vm0, %v1017_v51 }
 0x267   : > { %v4776_v52 = vpop.f32.mrb[72].mxu0 }
 0x268   : > { %v897_v53 = vadd.f32 %v4776_v52, %v6120_v61  ;;  %v891_v54 = vpop.f32.mrb[73].mxu0 }
 0x269   : > { %v892_v55 = vadd.f32 %v891_v54, %v6120_v61 }
 0x26a   : > { %v1019_v57 = vmax.f32 %v897_v53, 0.0 }
 0x26b   : > { %v1018_v56 = vmax.f32 %v892_v55, 0.0 }
 0x26d   : > { %4838 = vmatprep.mubr.msk.f32.mxu1 %vm688_vm0, %v1018_v56 }
 0x26e   : > { %4839 = vmatmul.mubr.msk.f32.gmra.mrb[20].mxu1 %vm688_vm0, %v1019_v57 }
 0x26f   : > { %v4779_v58 = vpop.f32.mrb[74].mxu0 }
 0x270   : > { %v907_v59 = vadd.f32 %v4779_v58, %v6120_v61  ;;  %v901_v60 = vpop.f32.mrb[75].mxu0 }
 0x271   : > { %v902_v62 = vadd.f32 %v901_v60, %v6120_v61 }
 0x272   : > { %v1021_v0 = vmax.f32 %v907_v59, 0.0 }
 0x273   : > { %v1020_v63 = vmax.f32 %v902_v62, 0.0 }
 0x275   : > { %4841 = vmatprep.mubr.msk.f32.mxu1 %vm688_vm0, %v1020_v63 }
 0x276   : > { %4842 = vmatmul.mubr.msk.f32.gmra.mrb[22].mxu1 %vm688_vm0, %v1021_v0 }
 0x277   : > { %v4782_v1 = vpop.f32.mrb[76].mxu0 }
 0x278   : > { %v917_v2 = vadd.f32 %v4782_v1, %v6120_v61  ;;  %v911_v4 = vpop.f32.mrb[77].mxu0  ;;  %v1053_v1 = vsub.s32 1, %v6109_v14 }
 0x279   : > { %v912_v5 = vadd.f32 %v911_v4, %v6120_v61  ;;  %v1775_v4 = vld [vmem:[#allocation5 + $0xc0] sm:$0xff] }
 0x27a   : > { %v1023_v7 = vmax.f32 %v917_v2, 0.0  ;;  %v6190_v2 = vrot.slane %v6115_v16, %v1053_v1 }
 0x27b   : > { %v1022_v6 = vmax.f32 %v912_v5, 0.0  ;;  %v1776_v5 = vld [vmem:[#allocation5 + $0xc8] sm:$0xff] }
 0x27d   : > { %4844 = vmatprep.mubr.msk.f32.mxu1 %vm688_vm0, %v1022_v6  ;;  %v1777_v6 = vld [vmem:[#allocation5 + $0xd0] sm:$0xff] }
 0x27e   : > { %4845 = vmatmul.mubr.msk.f32.gmra.mrb[24].mxu1 %vm688_vm0, %v1023_v7 }
 0x27f   : > { %v4785_v8 = vpop.f32.mrb[78].mxu0 }
 0x280   : > { %v927_v9 = vadd.f32 %v4785_v8, %v6120_v61  ;;  %v921_v10 = vpop.f32.mrb[79].mxu0  ;;  %v5354_v8 = vpack.c.bf16 %v1776_v5, %v1775_v4 }
 0x281   : > { %v922_v11 = vadd.f32 %v921_v10, %v6120_v61 }
 0x282   : > { %v1025_v13 = vmax.f32 %v927_v9, 0.0  ;;  %v1778_v9 = vld [vmem:[#allocation5 + $0xd8] sm:$0xff]  ;;  %5355 = vmatprep.subr.bf16.mxu0 %v5354_v8 }
 0x283   : > { %v1024_v12 = vmax.f32 %v922_v11, 0.0  ;;  %v5358_v11 = vpack.c.bf16 %v1778_v9, %v1777_v6  ;;  %5357 = vmatpush3.bf16.msra.mxu0 %v5354_v8 }
 0x285   : > { %4847 = vmatprep.mubr.msk.f32.mxu1 %vm688_vm0, %v1024_v12  ;;  %v1779_v12 = vld [vmem:[#allocation5 + $0xe0] sm:$0xff]  ;;  %5359 = vmatprep.subr.bf16.mxu0 %v5358_v11 }
 0x286   : > { %4848 = vmatmul.mubr.msk.f32.gmra.mrb[26].mxu1 %vm688_vm0, %v1025_v13  ;;  %v1780_v13 = vld [vmem:[#allocation5 + $0xe8] sm:$0xff] }
 0x287   : > { %v4788_v17 = vpop.f32.mrb[80].mxu0  ;;  %5361 = vmatpush3.bf16.msra.mxu0 %v5358_v11 }
 0x288   : > { %v937_v18 = vadd.f32 %v4788_v17, %v6120_v61  ;;  %v931_v19 = vpop.f32.mrb[81].mxu0 }
 0x289   : > { %v932_v20 = vadd.f32 %v931_v19, %v6120_v61  ;;  %v5362_v19 = vpack.c.bf16 %v1780_v13, %v1779_v12 }
 0x28a   : > { %v1027_v22 = vmax.f32 %v937_v18, 0.0 }
 0x28b   : > { %v1026_v21 = vmax.f32 %v932_v20, 0.0  ;;  %5363 = vmatprep.subr.bf16.mxu0 %v5362_v19 }
 0x28c   : > { %5365 = vmatpush3.bf16.msra.mxu0 %v5362_v19 }
 0x28d   : > { %4850 = vmatprep.mubr.msk.f32.mxu1 %vm688_vm0, %v1026_v21  ;;  %v1781_v21 = vld [vmem:[#allocation5 + $0xf0] sm:$0xff] }
 0x28e   : > { %4851 = vmatmul.mubr.msk.f32.gmra.mrb[28].mxu1 %vm688_vm0, %v1027_v22  ;;  %v1782_v22 = vld [vmem:[#allocation5 + $0xf8] sm:$0xff] }
 0x28f   : > { %v4791_v23 = vpop.f32.mrb[82].mxu0 }
 0x290   : > { %v947_v24 = vadd.f32 %v4791_v23, %v6120_v61  ;;  %v941_v25 = vpop.f32.mrb[83].mxu0 }
 0x291   : > { %v942_v26 = vadd.f32 %v941_v25, %v6120_v61 }
 0x292   : > { %v1029_v28 = vmax.f32 %v947_v24, 0.0  ;;  %v5366_v24 = vpack.c.bf16 %v1782_v22, %v1781_v21 }
 0x293   : > { %v1028_v27 = vmax.f32 %v942_v26, 0.0 }
 0x294   : > { %5367 = vmatprep.subr.bf16.mxu0 %v5366_v24 }
 0x295   : > { %4853 = vmatprep.mubr.msk.f32.mxu1 %vm688_vm0, %v1028_v27  ;;  %5369 = vmatpush3.bf16.msra.mxu0 %v5366_v24 }
 0x296   : > { %4854 = vmatmul.mubr.msk.f32.gmra.mrb[30].mxu1 %vm688_vm0, %v1029_v28 }
 0x297   : > { %v4794_v29 = vpop.f32.mrb[0].mxu1 }
 0x298   : > { %v957_v30 = vadd.f32 %v4794_v29, %v6120_v61  ;;  %v951_v31 = vpop.f32.mrb[1].mxu1 }
 0x299   : > { %v952_v32 = vadd.f32 %v951_v31, %v6120_v61 }
 0x29a   : > { %v1031_v34 = vmax.f32 %v957_v30, 0.0 }
 0x29b   : > { %v1030_v33 = vmax.f32 %v952_v32, 0.0 }
 0x29d   : > { %4856 = vmatprep.mubr.msk.f32.mxu1 %vm688_vm0, %v1030_v33 }
 0x29e   : > { %4857 = vmatmul.mubr.msk.f32.gmra.mrb[32].mxu1 %vm688_vm0, %v1031_v34 }
 0x29f   : > { %v4797_v35 = vpop.f32.mrb[2].mxu1 }
 0x2a0   : > { %v967_v36 = vadd.f32 %v4797_v35, %v6120_v61  ;;  %v961_v37 = vpop.f32.mrb[3].mxu1 }
 0x2a1   : > { %v962_v38 = vadd.f32 %v961_v37, %v6120_v61 }
 0x2a2   : > { %v1033_v40 = vmax.f32 %v967_v36, 0.0 }
 0x2a3   : > { %v1032_v39 = vmax.f32 %v962_v38, 0.0 }
 0x2a5   : > { %4859 = vmatprep.mubr.msk.f32.mxu1 %vm688_vm0, %v1032_v39 }
 0x2a6   : > { %4860 = vmatmul.mubr.msk.f32.gmra.mrb[34].mxu1 %vm688_vm0, %v1033_v40 }
 0x2a7   : > { %v4800_v41 = vpop.f32.mrb[4].mxu1 }
 0x2a8   : > { %v977_v42 = vadd.f32 %v4800_v41, %v6120_v61  ;;  %v971_v43 = vpop.f32.mrb[5].mxu1 }
 0x2a9   : > { %v972_v44 = vadd.f32 %v971_v43, %v6120_v61 }
 0x2aa   : > { %v1035_v46 = vmax.f32 %v977_v42, 0.0 }
 0x2ab   : > { %v1034_v45 = vmax.f32 %v972_v44, 0.0 }
 0x2ad   : > { %4862 = vmatprep.mubr.msk.f32.mxu1 %vm688_vm0, %v1034_v45 }
 0x2ae   : > { %4863 = vmatmul.mubr.msk.f32.gmra.mrb[36].mxu1 %vm688_vm0, %v1035_v46 }
 0x2af   : > { %v4803_v3 = vpop.f32.mrb[6].mxu1 }
 0x2b0   : > { %v987_v47 = vadd.f32 %v4803_v3, %v6120_v61  ;;  %v981_v48 = vpop.f32.mrb[7].mxu1 }
 0x2b1   : > { %v982_v49 = vadd.f32 %v981_v48, %v6120_v61 }
 0x2b2   : > { %v1037_v51 = vmax.f32 %v987_v47, 0.0 }
 0x2b3   : > { %v1036_v50 = vmax.f32 %v982_v49, 0.0 }
 0x2b5   : > { %4865 = vmatprep.mubr.msk.f32.mxu1 %vm688_vm0, %v1036_v50 }
 0x2b6   : > { %4866 = vmatmul.mubr.msk.f32.gmra.mrb[38].mxu1 %vm688_vm0, %v1037_v51 }
 0x2b7   : > { %v4806_v52 = vpop.f32.mrb[8].mxu1 }
 0x2b8   : > { %v997_v53 = vadd.f32 %v4806_v52, %v6120_v61  ;;  %v991_v54 = vpop.f32.mrb[9].mxu1 }
 0x2b9   : > { %v992_v55 = vadd.f32 %v991_v54, %v6120_v61 }
 0x2ba   : > { %v1039_v57 = vmax.f32 %v997_v53, 0.0 }
 0x2bb   : > { %v1038_v56 = vmax.f32 %v992_v55, 0.0 }
 0x2bd   : > { %4868 = vmatprep.mubr.msk.f32.mxu1 %vm688_vm0, %v1038_v56 }
 0x2be   : > { %4869 = vmatmul.mubr.msk.f32.gmra.mrb[40].mxu1 %vm688_vm0, %v1039_v57 }
 0x2bf   : > { %v4809_v58 = vpop.f32.mrb[10].mxu1 }
 0x2c0   : > { %v1007_v59 = vadd.f32 %v4809_v58, %v6120_v61  ;;  %v1001_v60 = vpop.f32.mrb[11].mxu1 }
 0x2c1   : > { %v1002_v62 = vadd.f32 %v1001_v60, %v6120_v61 }
 0x2c2   : > { %v1041_v0 = vmax.f32 %v1007_v59, 0.0 }
 0x2c3   : > { %v1040_v63 = vmax.f32 %v1002_v62, 0.0 }
 0x2c5   : > { %4871 = vmatprep.mubr.msk.f32.mxu1 %vm688_vm0, %v1040_v63 }
 0x2c6   : > { %4872 = vmatmul.mubr.msk.f32.gmra.mrb[42].mxu1 %vm688_vm0, %v1041_v0 }
 0x321   : > { %v4828_v7 = vpop.f32.mrb[12].mxu1 }
 0x322   : > { %v1223_v61 = vadd.f32 %v4828_v7, %v6190_v2  ;;  %v1217_v10 = vpop.f32.mrb[13].mxu1 }
 0x323   : > { %v1218_v17 = vadd.f32 %v1217_v10, %v6190_v2 }
 0x324   : > { %v1377_v20 = vmax.f32 %v1223_v61, 0.0 }
 0x325   : > { %v1376_v18 = vmax.f32 %v1218_v17, 0.0 }
 0x327   : > { %4890 = vmatprep.mubr.msk.f32.mxu1 %vm688_vm0, %v1376_v18 }
 0x328   : > { %4891 = vmatmul.mubr.msk.f32.vlgmr.msra.gmra.mrb[44].mxu1 %vm688_vm0, %v1377_v20 }
 0x329   : > { %v4831_v23 = vpop.f32.mrb[14].mxu1 }
 0x32a   : > { %v1233_v25 = vadd.f32 %v4831_v23, %v6190_v2  ;;  %v1227_v26 = vpop.f32.mrb[15].mxu1 }
 0x32b   : > { %v1228_v27 = vadd.f32 %v1227_v26, %v6190_v2 }
 0x32c   : > { %v1379_v29 = vmax.f32 %v1233_v25, 0.0 }
 0x32d   : > { %v1378_v28 = vmax.f32 %v1228_v27, 0.0 }
 0x32f   : > { %4893 = vmatprep.mubr.msk.f32.mxu1 %vm688_vm0, %v1378_v28 }
 0x330   : > { %4894 = vmatmul.mubr.msk.f32.gmra.mrb[46].mxu1 %vm688_vm0, %v1379_v29 }
 0x331   : > { %v4834_v30 = vpop.f32.mrb[16].mxu1 }
 0x332   : > { %v1243_v31 = vadd.f32 %v4834_v30, %v6190_v2  ;;  %v1237_v32 = vpop.f32.mrb[17].mxu1 }
 0x333   : > { %v1238_v33 = vadd.f32 %v1237_v32, %v6190_v2 }
 0x334   : > { %v1381_v35 = vmax.f32 %v1243_v31, 0.0 }
 0x335   : > { %v1380_v34 = vmax.f32 %v1238_v33, 0.0 }
 0x337   : > { %4896 = vmatprep.mubr.msk.f32.mxu1 %vm688_vm0, %v1380_v34 }
 0x338   : > { %4897 = vmatmul.mubr.msk.f32.gmra.mrb[48].mxu1 %vm688_vm0, %v1381_v35 }
 0x339   : > { %v4837_v36 = vpop.f32.mrb[18].mxu1 }
 0x33a   : > { %v1253_v37 = vadd.f32 %v4837_v36, %v6190_v2  ;;  %v1247_v38 = vpop.f32.mrb[19].mxu1 }
 0x33b   : > { %v1248_v39 = vadd.f32 %v1247_v38, %v6190_v2 }
 0x33c   : > { %v1383_v41 = vmax.f32 %v1253_v37, 0.0 }
 0x33d   : > { %v1382_v40 = vmax.f32 %v1248_v39, 0.0 }
 0x33f   : > { %4899 = vmatprep.mubr.msk.f32.mxu1 %vm688_vm0, %v1382_v40 }
 0x340   : > { %4900 = vmatmul.mubr.msk.f32.gmra.mrb[50].mxu1 %vm688_vm0, %v1383_v41 }
 0x341   : > { %v4840_v42 = vpop.f32.mrb[20].mxu1 }
 0x342   : > { %v1263_v43 = vadd.f32 %v4840_v42, %v6190_v2  ;;  %v1257_v44 = vpop.f32.mrb[21].mxu1 }
 0x343   : > { %v1258_v45 = vadd.f32 %v1257_v44, %v6190_v2 }
 0x344   : > { %v1385_v3 = vmax.f32 %v1263_v43, 0.0 }
 0x345   : > { %v1384_v46 = vmax.f32 %v1258_v45, 0.0 }
 0x347   : > { %4902 = vmatprep.mubr.msk.f32.mxu1 %vm688_vm0, %v1384_v46 }
 0x348   : > { %4903 = vmatmul.mubr.msk.f32.gmra.mrb[52].mxu1 %vm688_vm0, %v1385_v3 }
 0x349   : > { %v4843_v47 = vpop.f32.mrb[22].mxu1 }
 0x34a   : > { %v1273_v48 = vadd.f32 %v4843_v47, %v6190_v2  ;;  %v1267_v49 = vpop.f32.mrb[23].mxu1 }
 0x34b   : > { %v1268_v50 = vadd.f32 %v1267_v49, %v6190_v2 }
 0x34c   : > { %v1387_v52 = vmax.f32 %v1273_v48, 0.0 }
 0x34d   : > { %v1386_v51 = vmax.f32 %v1268_v50, 0.0 }
 0x34f   : > { %4905 = vmatprep.mubr.msk.f32.mxu1 %vm688_vm0, %v1386_v51 }
 0x350   : > { %4906 = vmatmul.mubr.msk.f32.gmra.mrb[54].mxu1 %vm688_vm0, %v1387_v52 }
 0x351   : > { %v4846_v53 = vpop.f32.mrb[24].mxu1 }
 0x352   : > { %v1283_v54 = vadd.f32 %v4846_v53, %v6190_v2  ;;  %v1277_v55 = vpop.f32.mrb[25].mxu1 }
 0x353   : > { %v1278_v56 = vadd.f32 %v1277_v55, %v6190_v2 }
 0x354   : > { %v1389_v58 = vmax.f32 %v1283_v54, 0.0  ;;  %v1419_v54 = vsub.s32 2, %v6109_v14 }
 0x355   : > { %v1388_v57 = vmax.f32 %v1278_v56, 0.0  ;;  %v2109_v56 = vld [vmem:[#allocation5 + $0x100] sm:$0xff] }
 0x356   : > { %v6258_v55 = vrot.slane %v6115_v16, %v1419_v54 }
 0x357   : > { %4908 = vmatprep.mubr.msk.f32.mxu1 %vm688_vm0, %v1388_v57  ;;  %v2110_v57 = vld [vmem:[#allocation5 + $0x108] sm:$0xff] }
 0x358   : > { %4909 = vmatmul.mubr.msk.f32.gmra.mrb[56].mxu1 %vm688_vm0, %v1389_v58  ;;  %v2111_v58 = vld [vmem:[#allocation5 + $0x110] sm:$0xff] }
 0x359   : > { %v4849_v59 = vpop.f32.mrb[26].mxu1 }
 0x35a   : > { %v1293_v60 = vadd.f32 %v4849_v59, %v6190_v2  ;;  %v1287_v62 = vpop.f32.mrb[27].mxu1 }
 0x35b   : > { %v1288_v63 = vadd.f32 %v1287_v62, %v6190_v2  ;;  %v2112_v62 = vld [vmem:[#allocation5 + $0x118] sm:$0xff] }
 0x35c   : > { %v1391_v4 = vmax.f32 %v1293_v60, 0.0  ;;  %v5370_v60 = vpack.c.bf16 %v2110_v57, %v2109_v56 }
 0x35d   : > { %v1390_v0 = vmax.f32 %v1288_v63, 0.0 }
 0x35e   : > { %5371 = vmatprep.subr.bf16.mxu1 %v5370_v60 }
 0x35f   : > { %4911 = vmatprep.mubr.msk.f32.mxu1 %vm688_vm0, %v1390_v0  ;;  %v5374_v0 = vpack.c.bf16 %v2112_v62, %v2111_v58  ;;  %5373 = vmatpush3.bf16.msra.mxu1 %v5370_v60 }
 0x360   : > { %4912 = vmatmul.mubr.msk.f32.gmra.mrb[58].mxu1 %vm688_vm0, %v1391_v4  ;;  %v2113_v4 = vld [vmem:[#allocation5 + $0x120] sm:$0xff] }
 0x361   : > { %v4852_v5 = vpop.f32.mrb[28].mxu1  ;;  %5375 = vmatprep.subr.bf16.mxu1 %v5374_v0 }
 0x362   : > { %v1303_v6 = vadd.f32 %v4852_v5, %v6190_v2  ;;  %v1297_v7 = vpop.f32.mrb[29].mxu1  ;;  %v2114_v5 = vld [vmem:[#allocation5 + $0x128] sm:$0xff] }
 0x363   : > { %v1298_v8 = vadd.f32 %v1297_v7, %v6190_v2  ;;  %5377 = vmatpush3.bf16.msra.mxu1 %v5374_v0 }
 0x364   : > { %v1393_v61 = vmax.f32 %v1303_v6, 0.0 }
 0x365   : > { %v1392_v9 = vmax.f32 %v1298_v8, 0.0  ;;  %v5378_v8 = vpack.c.bf16 %v2114_v5, %v2113_v4 }
 0x367   : > { %4914 = vmatprep.mubr.msk.f32.mxu1 %vm688_vm0, %v1392_v9  ;;  %5379 = vmatprep.subr.bf16.mxu1 %v5378_v8 }
 0x368   : > { %4915 = vmatmul.mubr.msk.f32.gmra.mrb[60].mxu1 %vm688_vm0, %v1393_v61  ;;  %v2115_v61 = vld [vmem:[#allocation5 + $0x130] sm:$0xff] }
 0x369   : > { %v4855_v10 = vpop.f32.mrb[30].mxu1  ;;  %5381 = vmatpush3.bf16.msra.mxu1 %v5378_v8 }
 0x36a   : > { %v1313_v11 = vadd.f32 %v4855_v10, %v6190_v2  ;;  %v1307_v12 = vpop.f32.mrb[31].mxu1  ;;  %v2116_v10 = vld [vmem:[#allocation5 + $0x138] sm:$0xff] }
 0x36b   : > { %v1308_v13 = vadd.f32 %v1307_v12, %v6190_v2  ;;  %v5382_v12 = vpack.c.bf16 %v2116_v10, %v2115_v61 }
 0x36c   : > { %v1395_v18 = vmax.f32 %v1313_v11, 0.0 }
 0x36d   : > { %v1394_v17 = vmax.f32 %v1308_v13, 0.0  ;;  %5383 = vmatprep.subr.bf16.mxu1 %v5382_v12 }
 0x36e   : > { %5385 = vmatpush3.bf16.msra.mxu1 %v5382_v12 }
 0x36f   : > { %4917 = vmatprep.mubr.msk.f32.mxu1 %vm688_vm0, %v1394_v17 }
 0x370   : > { %4918 = vmatmul.mubr.msk.f32.gmra.mrb[62].mxu1 %vm688_vm0, %v1395_v18 }
 0x371   : > { %v4858_v19 = vpop.f32.mrb[32].mxu1 }
 0x372   : > { %v1323_v20 = vadd.f32 %v4858_v19, %v6190_v2  ;;  %v1317_v21 = vpop.f32.mrb[33].mxu1 }
 0x373   : > { %v1318_v22 = vadd.f32 %v1317_v21, %v6190_v2 }
 0x374   : > { %v1397_v24 = vmax.f32 %v1323_v20, 0.0 }
 0x375   : > { %v1396_v23 = vmax.f32 %v1318_v22, 0.0 }
 0x377   : > { %4920 = vmatprep.mubr.msk.f32.mxu1 %vm688_vm0, %v1396_v23 }
 0x378   : > { %4921 = vmatmul.mubr.msk.f32.gmra.mrb[64].mxu1 %vm688_vm0, %v1397_v24 }
 0x379   : > { %v4861_v25 = vpop.f32.mrb[34].mxu1 }
 0x37a   : > { %v1333_v26 = vadd.f32 %v4861_v25, %v6190_v2  ;;  %v1327_v27 = vpop.f32.mrb[35].mxu1 }
 0x37b   : > { %v1328_v28 = vadd.f32 %v1327_v27, %v6190_v2 }
 0x37c   : > { %v1399_v30 = vmax.f32 %v1333_v26, 0.0 }
 0x37d   : > { %v1398_v29 = vmax.f32 %v1328_v28, 0.0 }
 0x37f   : > { %4923 = vmatprep.mubr.msk.f32.mxu1 %vm688_vm0, %v1398_v29 }
 0x380   : > { %4924 = vmatmul.mubr.msk.f32.gmra.mrb[66].mxu1 %vm688_vm0, %v1399_v30 }
 0x381   : > { %v4864_v31 = vpop.f32.mrb[36].mxu1 }
 0x382   : > { %v1343_v32 = vadd.f32 %v4864_v31, %v6190_v2  ;;  %v1337_v33 = vpop.f32.mrb[37].mxu1 }
 0x383   : > { %v1338_v34 = vadd.f32 %v1337_v33, %v6190_v2 }
 0x384   : > { %v1401_v36 = vmax.f32 %v1343_v32, 0.0 }
 0x385   : > { %v1400_v35 = vmax.f32 %v1338_v34, 0.0 }
 0x387   : > { %4926 = vmatprep.mubr.msk.f32.mxu1 %vm688_vm0, %v1400_v35 }
 0x388   : > { %4927 = vmatmul.mubr.msk.f32.gmra.mrb[68].mxu1 %vm688_vm0, %v1401_v36 }
 0x389   : > { %v4867_v37 = vpop.f32.mrb[38].mxu1 }
 0x38a   : > { %v1353_v38 = vadd.f32 %v4867_v37, %v6190_v2  ;;  %v1347_v39 = vpop.f32.mrb[39].mxu1 }
 0x38b   : > { %v1348_v40 = vadd.f32 %v1347_v39, %v6190_v2 }
 0x38c   : > { %v1403_v42 = vmax.f32 %v1353_v38, 0.0 }
 0x38d   : > { %v1402_v41 = vmax.f32 %v1348_v40, 0.0 }
 0x38f   : > { %4929 = vmatprep.mubr.msk.f32.mxu1 %vm688_vm0, %v1402_v41 }
 0x390   : > { %4930 = vmatmul.mubr.msk.f32.gmra.mrb[70].mxu1 %vm688_vm0, %v1403_v42 }
 0x391   : > { %v4870_v43 = vpop.f32.mrb[40].mxu1 }
 0x392   : > { %v1363_v44 = vadd.f32 %v4870_v43, %v6190_v2  ;;  %v1357_v45 = vpop.f32.mrb[41].mxu1 }
 0x393   : > { %v1358_v46 = vadd.f32 %v1357_v45, %v6190_v2 }
 0x394   : > { %v1405_v47 = vmax.f32 %v1363_v44, 0.0 }
 0x395   : > { %v1404_v3 = vmax.f32 %v1358_v46, 0.0 }
 0x397   : > { %4932 = vmatprep.mubr.msk.f32.mxu1 %vm688_vm0, %v1404_v3 }
 0x398   : > { %4933 = vmatmul.mubr.msk.f32.gmra.mrb[72].mxu1 %vm688_vm0, %v1405_v47 }
 0x399   : > { %v4873_v48 = vpop.f32.mrb[42].mxu1 }
 0x39a   : > { %v1373_v49 = vadd.f32 %v4873_v48, %v6190_v2  ;;  %v1367_v50 = vpop.f32.mrb[43].mxu1 }
 0x39b   : > { %v1368_v51 = vadd.f32 %v1367_v50, %v6190_v2 }
 0x39c   : > { %v1407_v53 = vmax.f32 %v1373_v49, 0.0 }
 0x39d   : > { %v1406_v52 = vmax.f32 %v1368_v51, 0.0 }
 0x39f   : > { %4935 = vmatprep.mubr.msk.f32.mxu1 %vm688_vm0, %v1406_v52 }
 0x3a0   : > { %4936 = vmatmul.mubr.msk.f32.gmra.mrb[74].mxu1 %vm688_vm0, %v1407_v53 }
 0x3fb   : > { %v4892_v59 = vpop.f32.mrb[44].mxu1 }
 0x3fc   : > { %v1589_v63 = vadd.f32 %v4892_v59, %v6258_v55  ;;  %v1583_v2 = vpop.f32.mrb[45].mxu1 }
 0x3fd   : > { %v1584_v6 = vadd.f32 %v1583_v2, %v6258_v55 }
 0x3fe   : > { %v1743_v9 = vmax.f32 %v1589_v63, 0.0 }
 0x3ff   : > { %v1742_v7 = vmax.f32 %v1584_v6, 0.0 }
 0x401   : > { %4954 = vmatprep.mubr.msk.f32.mxu0 %vm688_vm0, %v1742_v7 }
 0x402   : > { %4955 = vmatmul.mubr.msk.f32.vlgmr.msra.gmra.mrb[84].mxu0 %vm688_vm0, %v1743_v9 }
 0x403   : > { %v4895_v11 = vpop.f32.mrb[46].mxu1 }
 0x404   : > { %v1599_v13 = vadd.f32 %v4895_v11, %v6258_v55  ;;  %v1593_v17 = vpop.f32.mrb[47].mxu1 }
 0x405   : > { %v1594_v18 = vadd.f32 %v1593_v17, %v6258_v55 }
 0x406   : > { %v1745_v20 = vmax.f32 %v1599_v13, 0.0 }
 0x407   : > { %v1744_v19 = vmax.f32 %v1594_v18, 0.0 }
 0x409   : > { %4957 = vmatprep.mubr.msk.f32.mxu0 %vm688_vm0, %v1744_v19 }
 0x40a   : > { %4958 = vmatmul.mubr.msk.f32.gmra.mrb[86].mxu0 %vm688_vm0, %v1745_v20 }
 0x40b   : > { %v4898_v21 = vpop.f32.mrb[48].mxu1 }
 0x40c   : > { %v1609_v22 = vadd.f32 %v4898_v21, %v6258_v55  ;;  %v1603_v23 = vpop.f32.mrb[49].mxu1 }
 0x40d   : > { %v1604_v24 = vadd.f32 %v1603_v23, %v6258_v55 }
 0x40e   : > { %v1747_v26 = vmax.f32 %v1609_v22, 0.0 }
 0x40f   : > { %v1746_v25 = vmax.f32 %v1604_v24, 0.0 }
 0x411   : > { %4960 = vmatprep.mubr.msk.f32.mxu0 %vm688_vm0, %v1746_v25 }
 0x412   : > { %4961 = vmatmul.mubr.msk.f32.gmra.mrb[88].mxu0 %vm688_vm0, %v1747_v26 }
 0x413   : > { %v4901_v27 = vpop.f32.mrb[50].mxu1 }
 0x414   : > { %v1619_v28 = vadd.f32 %v4901_v27, %v6258_v55  ;;  %v1613_v29 = vpop.f32.mrb[51].mxu1 }
 0x415   : > { %v1614_v30 = vadd.f32 %v1613_v29, %v6258_v55 }
 0x416   : > { %v1749_v32 = vmax.f32 %v1619_v28, 0.0 }
 0x417   : > { %v1748_v31 = vmax.f32 %v1614_v30, 0.0 }
 0x419   : > { %4963 = vmatprep.mubr.msk.f32.mxu0 %vm688_vm0, %v1748_v31 }
 0x41a   : > { %4964 = vmatmul.mubr.msk.f32.gmra.mrb[90].mxu0 %vm688_vm0, %v1749_v32 }
 0x41b   : > { %v4904_v33 = vpop.f32.mrb[52].mxu1 }
 0x41c   : > { %v1629_v34 = vadd.f32 %v4904_v33, %v6258_v55  ;;  %v1623_v35 = vpop.f32.mrb[53].mxu1 }
 0x41d   : > { %v1624_v36 = vadd.f32 %v1623_v35, %v6258_v55 }
 0x41e   : > { %v1751_v38 = vmax.f32 %v1629_v34, 0.0 }
 0x41f   : > { %v1750_v37 = vmax.f32 %v1624_v36, 0.0 }
 0x421   : > { %4966 = vmatprep.mubr.msk.f32.mxu0 %vm688_vm0, %v1750_v37 }
 0x422   : > { %4967 = vmatmul.mubr.msk.f32.gmra.mrb[92].mxu0 %vm688_vm0, %v1751_v38 }
 0x423   : > { %v4907_v39 = vpop.f32.mrb[54].mxu1 }
 0x424   : > { %v1639_v40 = vadd.f32 %v4907_v39, %v6258_v55  ;;  %v1633_v41 = vpop.f32.mrb[55].mxu1 }
 0x425   : > { %v1634_v42 = vadd.f32 %v1633_v41, %v6258_v55 }
 0x426   : > { %v1753_v44 = vmax.f32 %v1639_v40, 0.0 }
 0x427   : > { %v1752_v43 = vmax.f32 %v1634_v42, 0.0 }
 0x429   : > { %4969 = vmatprep.mubr.msk.f32.mxu0 %vm688_vm0, %v1752_v43 }
 0x42a   : > { %4970 = vmatmul.mubr.msk.f32.gmra.mrb[94].mxu0 %vm688_vm0, %v1753_v44 }
 0x42b   : > { %v4910_v45 = vpop.f32.mrb[56].mxu1 }
 0x42c   : > { %v1649_v46 = vadd.f32 %v4910_v45, %v6258_v55  ;;  %v1643_v3 = vpop.f32.mrb[57].mxu1 }
 0x42d   : > { %v1644_v47 = vadd.f32 %v1643_v3, %v6258_v55  ;;  %v2475_v3 = vld [vmem:[#allocation5 + $0x140] sm:$0xff] }
 0x42e   : > { %v1755_v49 = vmax.f32 %v1649_v46, 0.0  ;;  %v1785_v46 = vsub.s32 3, %v6109_v14 }
 0x42f   : > { %v1754_v48 = vmax.f32 %v1644_v47, 0.0  ;;  %v2476_v47 = vld [vmem:[#allocation5 + $0x148] sm:$0xff] }
 0x431   : > { %4972 = vmatprep.mubr.msk.f32.mxu0 %vm688_vm0, %v1754_v48  ;;  %v2477_v48 = vld [vmem:[#allocation5 + $0x150] sm:$0xff] }
 0x432   : > { %4973 = vmatmul.mubr.msk.f32.gmra.mrb[96].mxu0 %vm688_vm0, %v1755_v49  ;;  %v6326_v49 = vrot.slane %v6115_v16, %v1785_v46 }
 0x433   : > { %v4913_v50 = vpop.f32.mrb[58].mxu1 }
 0x434   : > { %v1659_v51 = vadd.f32 %v4913_v50, %v6258_v55  ;;  %v1653_v52 = vpop.f32.mrb[59].mxu1  ;;  %v5386_v50 = vpack.c.bf16 %v2476_v47, %v2475_v3 }
 0x435   : > { %v1654_v53 = vadd.f32 %v1653_v52, %v6258_v55 }
 0x436   : > { %v1757_v56 = vmax.f32 %v1659_v51, 0.0  ;;  %v2478_v51 = vld [vmem:[#allocation5 + $0x158] sm:$0xff]  ;;  %5387 = vmatprep.subr.bf16.mxu0 %v5386_v50 }
 0x437   : > { %v1756_v54 = vmax.f32 %v1654_v53, 0.0  ;;  %v5390_v52 = vpack.c.bf16 %v2478_v51, %v2477_v48  ;;  %v2479_v53 = vld [vmem:[#allocation5 + $0x160] sm:$0xff]  ;;  %5389 = vmatpush3.bf16.msra.mxu0 %v5386_v50 }
 0x439   : > { %4975 = vmatprep.mubr.msk.f32.mxu0 %vm688_vm0, %v1756_v54  ;;  %v2480_v54 = vld [vmem:[#allocation5 + $0x168] sm:$0xff]  ;;  %5391 = vmatprep.subr.bf16.mxu0 %v5390_v52 }
 0x43a   : > { %4976 = vmatmul.mubr.msk.f32.gmra.mrb[98].mxu0 %vm688_vm0, %v1757_v56 }
 0x43b   : > { %v4916_v57 = vpop.f32.mrb[60].mxu1  ;;  %5393 = vmatpush3.bf16.msra.mxu0 %v5390_v52 }
 0x43c   : > { %v1669_v58 = vadd.f32 %v4916_v57, %v6258_v55  ;;  %v1663_v59 = vpop.f32.mrb[61].mxu1 }
 0x43d   : > { %v1664_v60 = vadd.f32 %v1663_v59, %v6258_v55 }
 0x43e   : > { %v1759_v63 = vmax.f32 %v1669_v58, 0.0  ;;  %v5394_v58 = vpack.c.bf16 %v2480_v54, %v2479_v53 }
 0x43f   : > { %v1758_v62 = vmax.f32 %v1664_v60, 0.0  ;;  %v2481_v60 = vld [vmem:[#allocation5 + $0x170] sm:$0xff] }
 0x440   : > { %5395 = vmatprep.subr.bf16.mxu0 %v5394_v58 }
 0x441   : > { %4978 = vmatprep.mubr.msk.f32.mxu0 %vm688_vm0, %v1758_v62  ;;  %v2482_v62 = vld [vmem:[#allocation5 + $0x178] sm:$0xff]  ;;  %5397 = vmatpush3.bf16.msra.mxu0 %v5394_v58 }
 0x442   : > { %4979 = vmatmul.mubr.msk.f32.gmra.mrb[100].mxu0 %vm688_vm0, %v1759_v63  ;;  %v5398_v16 = vpack.c.bf16 %v2482_v62, %v2481_v60 }
 0x443   : > { %v4919_v2 = vpop.f32.mrb[62].mxu1 }
 0x444   : > { %v1679_v0 = vadd.f32 %v4919_v2, %v6258_v55  ;;  %v1673_v4 = vpop.f32.mrb[63].mxu1  ;;  %5399 = vmatprep.subr.bf16.mxu0 %v5398_v16 }
 0x445   : > { %v1674_v5 = vadd.f32 %v1673_v4, %v6258_v55  ;;  %5401 = vmatpush3.bf16.msra.mxu0 %v5398_v16 }
 0x446   : > { %v1761_v7 = vmax.f32 %v1679_v0, 0.0 }
 0x447   : > { %v1760_v6 = vmax.f32 %v1674_v5, 0.0 }
 0x449   : > { %4981 = vmatprep.mubr.msk.f32.mxu0 %vm688_vm0, %v1760_v6 }
 0x44a   : > { %4982 = vmatmul.mubr.msk.f32.gmra.mrb[102].mxu0 %vm688_vm0, %v1761_v7 }
 0x44b   : > { %v4922_v8 = vpop.f32.mrb[64].mxu1 }
 0x44c   : > { %v1689_v9 = vadd.f32 %v4922_v8, %v6258_v55  ;;  %v1683_v61 = vpop.f32.mrb[65].mxu1 }
 0x44d   : > { %v1684_v10 = vadd.f32 %v1683_v61, %v6258_v55 }
 0x44e   : > { %v1763_v12 = vmax.f32 %v1689_v9, 0.0 }
 0x44f   : > { %v1762_v11 = vmax.f32 %v1684_v10, 0.0 }
 0x451   : > { %4984 = vmatprep.mubr.msk.f32.mxu0 %vm688_vm0, %v1762_v11 }
 0x452   : > { %4985 = vmatmul.mubr.msk.f32.gmra.mrb[104].mxu0 %vm688_vm0, %v1763_v12 }
 0x453   : > { %v4925_v13 = vpop.f32.mrb[66].mxu1 }
 0x454   : > { %v1699_v17 = vadd.f32 %v4925_v13, %v6258_v55  ;;  %v1693_v18 = vpop.f32.mrb[67].mxu1 }
 0x455   : > { %v1694_v19 = vadd.f32 %v1693_v18, %v6258_v55 }
 0x456   : > { %v1765_v21 = vmax.f32 %v1699_v17, 0.0 }
 0x457   : > { %v1764_v20 = vmax.f32 %v1694_v19, 0.0 }
 0x459   : > { %4987 = vmatprep.mubr.msk.f32.mxu0 %vm688_vm0, %v1764_v20 }
 0x45a   : > { %4988 = vmatmul.mubr.msk.f32.gmra.mrb[106].mxu0 %vm688_vm0, %v1765_v21 }
 0x45b   : > { %v4928_v22 = vpop.f32.mrb[68].mxu1 }
 0x45c   : > { %v1709_v23 = vadd.f32 %v4928_v22, %v6258_v55  ;;  %v1703_v24 = vpop.f32.mrb[69].mxu1 }
 0x45d   : > { %v1704_v25 = vadd.f32 %v1703_v24, %v6258_v55 }
 0x45e   : > { %v1767_v27 = vmax.f32 %v1709_v23, 0.0 }
 0x45f   : > { %v1766_v26 = vmax.f32 %v1704_v25, 0.0 }
 0x461   : > { %4990 = vmatprep.mubr.msk.f32.mxu0 %vm688_vm0, %v1766_v26 }
 0x462   : > { %4991 = vmatmul.mubr.msk.f32.gmra.mrb[108].mxu0 %vm688_vm0, %v1767_v27 }
 0x463   : > { %v4931_v28 = vpop.f32.mrb[70].mxu1 }
 0x464   : > { %v1719_v29 = vadd.f32 %v4931_v28, %v6258_v55  ;;  %v1713_v30 = vpop.f32.mrb[71].mxu1 }
 0x465   : > { %v1714_v31 = vadd.f32 %v1713_v30, %v6258_v55 }
 0x466   : > { %v1769_v33 = vmax.f32 %v1719_v29, 0.0 }
 0x467   : > { %v1768_v32 = vmax.f32 %v1714_v31, 0.0 }
 0x469   : > { %4993 = vmatprep.mubr.msk.f32.mxu0 %vm688_vm0, %v1768_v32 }
 0x46a   : > { %4994 = vmatmul.mubr.msk.f32.gmra.mrb[110].mxu0 %vm688_vm0, %v1769_v33 }
 0x46b   : > { %v4934_v34 = vpop.f32.mrb[72].mxu1 }
 0x46c   : > { %v1729_v35 = vadd.f32 %v4934_v34, %v6258_v55  ;;  %v1723_v36 = vpop.f32.mrb[73].mxu1 }
 0x46d   : > { %v1724_v37 = vadd.f32 %v1723_v36, %v6258_v55 }
 0x46e   : > { %v1771_v39 = vmax.f32 %v1729_v35, 0.0 }
 0x46f   : > { %v1770_v38 = vmax.f32 %v1724_v37, 0.0 }
 0x471   : > { %4996 = vmatprep.mubr.msk.f32.mxu0 %vm688_vm0, %v1770_v38 }
 0x472   : > { %4997 = vmatmul.mubr.msk.f32.gmra.mrb[112].mxu0 %vm688_vm0, %v1771_v39 }
 0x473   : > { %v4937_v40 = vpop.f32.mrb[74].mxu1 }
 0x474   : > { %v1739_v41 = vadd.f32 %v4937_v40, %v6258_v55  ;;  %v1733_v42 = vpop.f32.mrb[75].mxu1 }
 0x475   : > { %v1734_v43 = vadd.f32 %v1733_v42, %v6258_v55 }
 0x476   : > { %v1773_v45 = vmax.f32 %v1739_v41, 0.0 }
 0x477   : > { %v1772_v44 = vmax.f32 %v1734_v43, 0.0 }
 0x479   : > { %4999 = vmatprep.mubr.msk.f32.mxu0 %vm688_vm0, %v1772_v44 }
 0x47a   : > { %5000 = vmatmul.mubr.msk.f32.gmra.mrb[114].mxu0 %vm688_vm0, %v1773_v45 }
 0x4d5   : > { %v4956_v55 = vpop.f32.mrb[84].mxu0 }
 0x4d6   : > { %v1949_v56 = vpop.f32.mrb[85].mxu0  ;;  %v1955_v59 = vadd.f32 %v4956_v55, %v6326_v49 }
 0x4d7   : > { %v1950_v57 = vadd.f32 %v1949_v56, %v6326_v49 }
 0x4d9   : > { %5018 = vmatprep.mubr.msk.f32.mxu1 %vm688_vm0, %v1950_v57 }
 0x4da   : > { %5019 = vmatmul.mubr.msk.f32.vlgmr.msra.gmra.mrb[76].mxu1 %vm688_vm0, %v1955_v59 }
 0x4dd   : > { %v4959_v63 = vpop.f32.mrb[86].mxu0 }
 0x4de   : > { %v1959_v2 = vpop.f32.mrb[87].mxu0  ;;  %v1965_v4 = vadd.f32 %v4959_v63, %v6326_v49  ;;  %v2119_v63 = vsub.s32 4, %v6109_v14 }
 0x4df   : > { %v1960_v0 = vadd.f32 %v1959_v2, %v6326_v49  ;;  %v6396_v2 = vld [vmem:[%s6947_s4] sm:$0xff] }
 0x4e1   : > { %5021 = vmatprep.mubr.msk.f32.mxu1 %vm688_vm0, %v1960_v0  ;;  %v6399_v0 = vrot.slane %v6396_v2, %v2119_v63 }
 0x4e2   : > { %5022 = vmatmul.mubr.msk.f32.gmra.mrb[78].mxu1 %vm688_vm0, %v1965_v4  ;;  %v2841_v4 = vld [vmem:[#allocation5 + $0x180] sm:$0xff] }
 0x4e5   : > { %v4962_v5 = vpop.f32.mrb[88].mxu0 }
 0x4e6   : > { %v1969_v6 = vpop.f32.mrb[89].mxu0  ;;  %v1975_v8 = vadd.f32 %v4962_v5, %v6326_v49  ;;  %v2842_v5 = vld [vmem:[#allocation5 + $0x188] sm:$0xff] }
 0x4e7   : > { %v1970_v7 = vadd.f32 %v1969_v6, %v6326_v49  ;;  %v2843_v6 = vld [vmem:[#allocation5 + $0x190] sm:$0xff] }
 0x4e9   : > { %5024 = vmatprep.mubr.msk.f32.mxu1 %vm688_vm0, %v1970_v7 }
 0x4ea   : > { %5025 = vmatmul.mubr.msk.f32.gmra.mrb[80].mxu1 %vm688_vm0, %v1975_v8  ;;  %v5402_v8 = vpack.c.bf16 %v2842_v5, %v2841_v4 }
 0x4ec   : > { %5403 = vmatprep.subr.bf16.mxu1 %v5402_v8 }
 0x4ed   : > { %v4965_v9 = vpop.f32.mrb[90].mxu0  ;;  %5405 = vmatpush3.bf16.msra.mxu1 %v5402_v8 }
 0x4ee   : > { %v1979_v61 = vpop.f32.mrb[91].mxu0  ;;  %v1985_v11 = vadd.f32 %v4965_v9, %v6326_v49 }
 0x4ef   : > { %v1980_v10 = vadd.f32 %v1979_v61, %v6326_v49 }
 0x4f1   : > { %5027 = vmatprep.mubr.msk.f32.mxu1 %vm688_vm0, %v1980_v10 }
 0x4f2   : > { %5028 = vmatmul.mubr.msk.f32.gmra.mrb[82].mxu1 %vm688_vm0, %v1985_v11  ;;  %v2845_v11 = vld [vmem:[#allocation5 + $0x1a0] sm:$0xff] }
 0x4f5   : > { %v4968_v12 = vpop.f32.mrb[92].mxu0 }
 0x4f6   : > { %v1989_v13 = vpop.f32.mrb[93].mxu0  ;;  %v1995_v18 = vadd.f32 %v4968_v12, %v6326_v49  ;;  %v2846_v12 = vld [vmem:[#allocation5 + $0x1a8] sm:$0xff] }
 0x4f7   : > { %v1990_v17 = vadd.f32 %v1989_v13, %v6326_v49 }
 0x4f9   : > { %5030 = vmatprep.mubr.msk.f32.mxu1 %vm688_vm0, %v1990_v17 }
 0x4fa   : > { %5031 = vmatmul.mubr.msk.f32.gmra.mrb[84].mxu1 %vm688_vm0, %v1995_v18  ;;  %v5410_v18 = vpack.c.bf16 %v2846_v12, %v2845_v11 }
 0x4fd   : > { %v4971_v19 = vpop.f32.mrb[94].mxu0 }
 0x4fe   : > { %v1999_v20 = vpop.f32.mrb[95].mxu0  ;;  %v2005_v22 = vadd.f32 %v4971_v19, %v6326_v49 }
 0x4ff   : > { %v2000_v21 = vadd.f32 %v1999_v20, %v6326_v49  ;;  %v2847_v20 = vld [vmem:[#allocation5 + $0x1b0] sm:$0xff] }
 0x501   : > { %5033 = vmatprep.mubr.msk.f32.mxu1 %vm688_vm0, %v2000_v21  ;;  %v2848_v21 = vld [vmem:[#allocation5 + $0x1b8] sm:$0xff] }
 0x502   : > { %5034 = vmatmul.mubr.msk.f32.gmra.mrb[86].mxu1 %vm688_vm0, %v2005_v22 }
 0x505   : > { %v4974_v23 = vpop.f32.mrb[96].mxu0 }
 0x506   : > { %v2009_v24 = vpop.f32.mrb[97].mxu0  ;;  %v2015_v26 = vadd.f32 %v4974_v23, %v6326_v49  ;;  %v5414_v23 = vpack.c.bf16 %v2848_v21, %v2847_v20 }
 0x507   : > { %v2010_v25 = vadd.f32 %v2009_v24, %v6326_v49 }
 0x509   : > { %5036 = vmatprep.mubr.msk.f32.mxu1 %vm688_vm0, %v2010_v25 }
 0x50a   : > { %5037 = vmatmul.mubr.msk.f32.gmra.mrb[88].mxu1 %vm688_vm0, %v2015_v26 }
 0x50d   : > { %v4977_v27 = vpop.f32.mrb[98].mxu0 }
 0x50e   : > { %v2019_v28 = vpop.f32.mrb[99].mxu0  ;;  %v2025_v30 = vadd.f32 %v4977_v27, %v6326_v49 }
 0x50f   : > { %v2020_v29 = vadd.f32 %v2019_v28, %v6326_v49 }
 0x511   : > { %5039 = vmatprep.mubr.msk.f32.mxu1 %vm688_vm0, %v2020_v29 }
 0x512   : > { %5040 = vmatmul.mubr.msk.f32.gmra.mrb[90].mxu1 %vm688_vm0, %v2025_v30 }
 0x515   : > { %v4980_v31 = vpop.f32.mrb[100].mxu0 }
 0x516   : > { %v2029_v32 = vpop.f32.mrb[101].mxu0  ;;  %v2035_v34 = vadd.f32 %v4980_v31, %v6326_v49 }
 0x517   : > { %v2030_v33 = vadd.f32 %v2029_v32, %v6326_v49 }
 0x519   : > { %5042 = vmatprep.mubr.msk.f32.mxu1 %vm688_vm0, %v2030_v33 }
 0x51a   : > { %5043 = vmatmul.mubr.msk.f32.gmra.mrb[92].mxu1 %vm688_vm0, %v2035_v34 }
 0x51d   : > { %v4983_v35 = vpop.f32.mrb[102].mxu0 }
 0x51e   : > { %v2039_v36 = vpop.f32.mrb[103].mxu0  ;;  %v2045_v38 = vadd.f32 %v4983_v35, %v6326_v49 }
 0x51f   : > { %v2040_v37 = vadd.f32 %v2039_v36, %v6326_v49 }
 0x521   : > { %5045 = vmatprep.mubr.msk.f32.mxu1 %vm688_vm0, %v2040_v37 }
 0x522   : > { %5046 = vmatmul.mubr.msk.f32.gmra.mrb[94].mxu1 %vm688_vm0, %v2045_v38 }
 0x525   : > { %v4986_v39 = vpop.f32.mrb[104].mxu0 }
 0x526   : > { %v2049_v40 = vpop.f32.mrb[105].mxu0  ;;  %v2055_v42 = vadd.f32 %v4986_v39, %v6326_v49 }
 0x527   : > { %v2050_v41 = vadd.f32 %v2049_v40, %v6326_v49 }
 0x529   : > { %5048 = vmatprep.mubr.msk.f32.mxu1 %vm688_vm0, %v2050_v41 }
 0x52a   : > { %5049 = vmatmul.mubr.msk.f32.gmra.mrb[96].mxu1 %vm688_vm0, %v2055_v42 }
 0x52d   : > { %v4989_v43 = vpop.f32.mrb[106].mxu0 }
 0x52e   : > { %v2059_v44 = vpop.f32.mrb[107].mxu0  ;;  %v2065_v46 = vadd.f32 %v4989_v43, %v6326_v49 }
 0x52f   : > { %v2060_v45 = vadd.f32 %v2059_v44, %v6326_v49 }
 0x531   : > { %5051 = vmatprep.mubr.msk.f32.mxu1 %vm688_vm0, %v2060_v45 }
 0x532   : > { %5052 = vmatmul.mubr.msk.f32.gmra.mrb[98].mxu1 %vm688_vm0, %v2065_v46 }
 0x535   : > { %v4992_v3 = vpop.f32.mrb[108].mxu0 }
 0x536   : > { %v2069_v47 = vpop.f32.mrb[109].mxu0  ;;  %v2075_v50 = vadd.f32 %v4992_v3, %v6326_v49 }
 0x537   : > { %v2070_v48 = vadd.f32 %v2069_v47, %v6326_v49 }
 0x539   : > { %5054 = vmatprep.mubr.msk.f32.mxu1 %vm688_vm0, %v2070_v48 }
 0x53a   : > { %5055 = vmatmul.mubr.msk.f32.gmra.mrb[100].mxu1 %vm688_vm0, %v2075_v50 }
 0x53d   : > { %v4995_v51 = vpop.f32.mrb[110].mxu0 }
 0x53e   : > { %v2079_v52 = vpop.f32.mrb[111].mxu0  ;;  %v2085_v54 = vadd.f32 %v4995_v51, %v6326_v49 }
 0x53f   : > { %v2080_v53 = vadd.f32 %v2079_v52, %v6326_v49 }
 0x541   : > { %5057 = vmatprep.mubr.msk.f32.mxu1 %vm688_vm0, %v2080_v53 }
 0x542   : > { %5058 = vmatmul.mubr.msk.f32.gmra.mrb[102].mxu1 %vm688_vm0, %v2085_v54 }
 0x545   : > { %v4998_v55 = vpop.f32.mrb[112].mxu0 }
 0x546   : > { %v2089_v56 = vpop.f32.mrb[113].mxu0  ;;  %v2095_v58 = vadd.f32 %v4998_v55, %v6326_v49 }
 0x547   : > { %v2090_v57 = vadd.f32 %v2089_v56, %v6326_v49 }
 0x549   : > { %5060 = vmatprep.mubr.msk.f32.mxu1 %vm688_vm0, %v2090_v57 }
 0x54a   : > { %5061 = vmatmul.mubr.msk.f32.gmra.mrb[104].mxu1 %vm688_vm0, %v2095_v58 }
 0x54d   : > { %v5001_v59 = vpop.f32.mrb[114].mxu0 }
 0x54e   : > { %v2099_v60 = vpop.f32.mrb[115].mxu0  ;;  %v2105_v16 = vadd.f32 %v5001_v59, %v6326_v49 }
 0x54f   : > { %v2100_v62 = vadd.f32 %v2099_v60, %v6326_v49  ;;  %v2844_v49 = vld [vmem:[#allocation5 + $0x198] sm:$0xff] }
 0x550   : > { %v5406_v10 = vpack.c.bf16 %v2844_v49, %v2843_v6 }
 0x551   : > { %5063 = vmatprep.mubr.msk.f32.mxu1 %vm688_vm0, %v2100_v62 }
 0x552   : > { %5064 = vmatmul.mubr.msk.f32.gmra.mrb[106].mxu1 %vm688_vm0, %v2105_v16  ;;  %5407 = vmatprep.subr.bf16.mxu1 %v5406_v10 }
 0x553   : > { %5409 = vmatpush3.bf16.msra.mxu1 %v5406_v10 }
 0x554   : > { %5411 = vmatprep.subr.bf16.mxu1 %v5410_v18 }
 0x557   : > { %5413 = vmatpush3.bf16.msra.mxu1 %v5410_v18 }
 0x558   : > { %5415 = vmatprep.subr.bf16.mxu1 %v5414_v23 }
 0x55b   : > { %5417 = vmatpush3.bf16.msra.mxu1 %v5414_v23 }
 0x5ad   : > { %v5020_v7 = vpop.f32.mrb[76].mxu1 }
 0x5ae   : > { %v2289_v9 = vadd.f32 %v5020_v7, %v6399_v0  ;;  %v2283_v61 = vpop.f32.mrb[77].mxu1 }
 0x5af   : > { %v2284_v13 = vadd.f32 %v2283_v61, %v6399_v0 }
 0x5b0   : > { %v2443_v19 = vmax.f32 %v2289_v9, 0.0 }
 0x5b1   : > { %v2442_v17 = vmax.f32 %v2284_v13, 0.0 }
 0x5b3   : > { %5082 = vmatprep.mubr.msk.f32.mxu0 %vm688_vm0, %v2442_v17 }
 0x5b4   : > { %5083 = vmatmul.mubr.msk.f32.vlgmr.msra.gmra.mrb[116].mxu0 %vm688_vm0, %v2443_v19 }
 0x5b5   : > { %v5023_v22 = vpop.f32.mrb[78].mxu1 }
 0x5b6   : > { %v2299_v24 = vadd.f32 %v5023_v22, %v6399_v0  ;;  %v2293_v25 = vpop.f32.mrb[79].mxu1 }
 0x5b7   : > { %v2294_v26 = vadd.f32 %v2293_v25, %v6399_v0 }
 0x5b8   : > { %v2445_v28 = vmax.f32 %v2299_v24, 0.0 }
 0x5b9   : > { %v2444_v27 = vmax.f32 %v2294_v26, 0.0 }
 0x5bb   : > { %5085 = vmatprep.mubr.msk.f32.mxu0 %vm688_vm0, %v2444_v27 }
 0x5bc   : > { %5086 = vmatmul.mubr.msk.f32.gmra.mrb[118].mxu0 %vm688_vm0, %v2445_v28 }
 0x5bd   : > { %v5026_v29 = vpop.f32.mrb[80].mxu1 }
 0x5be   : > { %v2309_v30 = vadd.f32 %v5026_v29, %v6399_v0  ;;  %v2303_v31 = vpop.f32.mrb[81].mxu1 }
 0x5bf   : > { %v2304_v32 = vadd.f32 %v2303_v31, %v6399_v0 }
 0x5c0   : > { %v2447_v34 = vmax.f32 %v2309_v30, 0.0 }
 0x5c1   : > { %v2446_v33 = vmax.f32 %v2304_v32, 0.0 }
 0x5c3   : > { %5088 = vmatprep.mubr.msk.f32.mxu0 %vm688_vm0, %v2446_v33 }
 0x5c4   : > { %5089 = vmatmul.mubr.msk.f32.gmra.mrb[120].mxu0 %vm688_vm0, %v2447_v34 }
 0x5c5   : > { %v5029_v35 = vpop.f32.mrb[82].mxu1 }
 0x5c6   : > { %v2319_v36 = vadd.f32 %v5029_v35, %v6399_v0  ;;  %v2313_v37 = vpop.f32.mrb[83].mxu1 }
 0x5c7   : > { %v2314_v38 = vadd.f32 %v2313_v37, %v6399_v0 }
 0x5c8   : > { %v2449_v40 = vmax.f32 %v2319_v36, 0.0 }
 0x5c9   : > { %v2448_v39 = vmax.f32 %v2314_v38, 0.0 }
 0x5cb   : > { %5091 = vmatprep.mubr.msk.f32.mxu0 %vm688_vm0, %v2448_v39 }
 0x5cc   : > { %5092 = vmatmul.mubr.msk.f32.gmra.mrb[122].mxu0 %vm688_vm0, %v2449_v40 }
 0x5cd   : > { %v5032_v41 = vpop.f32.mrb[84].mxu1 }
 0x5ce   : > { %v2329_v42 = vadd.f32 %v5032_v41, %v6399_v0  ;;  %v2323_v43 = vpop.f32.mrb[85].mxu1 }
 0x5cf   : > { %v2324_v44 = vadd.f32 %v2323_v43, %v6399_v0 }
 0x5d0   : > { %v2451_v46 = vmax.f32 %v2329_v42, 0.0 }
 0x5d1   : > { %v2450_v45 = vmax.f32 %v2324_v44, 0.0 }
 0x5d3   : > { %5094 = vmatprep.mubr.msk.f32.mxu0 %vm688_vm0, %v2450_v45 }
 0x5d4   : > { %5095 = vmatmul.mubr.msk.f32.gmra.mrb[124].mxu0 %vm688_vm0, %v2451_v46 }
 0x5d5   : > { %v5035_v3 = vpop.f32.mrb[86].mxu1 }
 0x5d6   : > { %v2339_v47 = vadd.f32 %v5035_v3, %v6399_v0  ;;  %v2333_v48 = vpop.f32.mrb[87].mxu1 }
 0x5d7   : > { %v2334_v50 = vadd.f32 %v2333_v48, %v6399_v0 }
 0x5d8   : > { %v2453_v52 = vmax.f32 %v2339_v47, 0.0 }
 0x5d9   : > { %v2452_v51 = vmax.f32 %v2334_v50, 0.0 }
 0x5db   : > { %5097 = vmatprep.mubr.msk.f32.mxu0 %vm688_vm0, %v2452_v51 }
 0x5dc   : > { %5098 = vmatmul.mubr.msk.f32.gmra.mrb[126].mxu0 %vm688_vm0, %v2453_v52 }
 0x5dd   : > { %v5038_v53 = vpop.f32.mrb[88].mxu1 }
 0x5de   : > { %v2349_v54 = vadd.f32 %v5038_v53, %v6399_v0  ;;  %v2343_v55 = vpop.f32.mrb[89].mxu1 }
 0x5df   : > { %v2344_v56 = vadd.f32 %v2343_v55, %v6399_v0 }
 0x5e0   : > { %v2455_v58 = vmax.f32 %v2349_v54, 0.0  ;;  %v2485_v54 = vsub.s32 5, %v6109_v14 }
 0x5e1   : > { %v2454_v57 = vmax.f32 %v2344_v56, 0.0  ;;  %v3207_v56 = vld [vmem:[#allocation5 + $0x1c0] sm:$0xff] }
 0x5e2   : > { %v6467_v55 = vrot.slane %v6396_v2, %v2485_v54 }
 0x5e3   : > { %5100 = vmatprep.mubr.msk.f32.mxu0 %vm688_vm0, %v2454_v57  ;;  %v3208_v57 = vld [vmem:[#allocation5 + $0x1c8] sm:$0xff] }
 0x5e4   : > { %5101 = vmatmul.mubr.msk.f32.gmra.mrb[128].mxu0 %vm688_vm0, %v2455_v58  ;;  %v3209_v58 = vld [vmem:[#allocation5 + $0x1d0] sm:$0xff] }
 0x5e5   : > { %v5041_v59 = vpop.f32.mrb[90].mxu1 }
 0x5e6   : > { %v2359_v60 = vadd.f32 %v5041_v59, %v6399_v0  ;;  %v2353_v62 = vpop.f32.mrb[91].mxu1 }
 0x5e7   : > { %v2354_v16 = vadd.f32 %v2353_v62, %v6399_v0  ;;  %v3210_v62 = vld [vmem:[#allocation5 + $0x1d8] sm:$0xff] }
 0x5e8   : > { %v2457_v4 = vmax.f32 %v2359_v60, 0.0  ;;  %v5418_v60 = vpack.c.bf16 %v3208_v57, %v3207_v56 }
 0x5e9   : > { %v2456_v63 = vmax.f32 %v2354_v16, 0.0 }
 0x5ea   : > { %5419 = vmatprep.subr.bf16.mxu0 %v5418_v60 }
 0x5eb   : > { %5103 = vmatprep.mubr.msk.f32.mxu0 %vm688_vm0, %v2456_v63  ;;  %v5422_v63 = vpack.c.bf16 %v3210_v62, %v3209_v58  ;;  %5421 = vmatpush3.bf16.msra.mxu0 %v5418_v60 }
 0x5ec   : > { %5104 = vmatmul.mubr.msk.f32.gmra.mrb[130].mxu0 %vm688_vm0, %v2457_v4  ;;  %v3211_v4 = vld [vmem:[#allocation5 + $0x1e0] sm:$0xff] }
 0x5ed   : > { %v5044_v5 = vpop.f32.mrb[92].mxu1  ;;  %5423 = vmatprep.subr.bf16.mxu0 %v5422_v63 }
 0x5ee   : > { %v2369_v6 = vadd.f32 %v5044_v5, %v6399_v0  ;;  %v2363_v7 = vpop.f32.mrb[93].mxu1  ;;  %v3212_v5 = vld [vmem:[#allocation5 + $0x1e8] sm:$0xff] }
 0x5ef   : > { %v2364_v8 = vadd.f32 %v2363_v7, %v6399_v0  ;;  %5425 = vmatpush3.bf16.msra.mxu0 %v5422_v63 }
 0x5f0   : > { %v2459_v9 = vmax.f32 %v2369_v6, 0.0 }
 0x5f1   : > { %v2458_v49 = vmax.f32 %v2364_v8, 0.0  ;;  %v5426_v8 = vpack.c.bf16 %v3212_v5, %v3211_v4 }
 0x5f3   : > { %5106 = vmatprep.mubr.msk.f32.mxu0 %vm688_vm0, %v2458_v49  ;;  %5427 = vmatprep.subr.bf16.mxu0 %v5426_v8 }
 0x5f4   : > { %5107 = vmatmul.mubr.msk.f32.gmra.mrb[132].mxu0 %vm688_vm0, %v2459_v9  ;;  %v3213_v9 = vld [vmem:[#allocation5 + $0x1f0] sm:$0xff] }
 0x5f5   : > { %v5047_v61 = vpop.f32.mrb[94].mxu1  ;;  %5429 = vmatpush3.bf16.msra.mxu0 %v5426_v8 }
 0x5f6   : > { %v2379_v10 = vadd.f32 %v5047_v61, %v6399_v0  ;;  %v2373_v11 = vpop.f32.mrb[95].mxu1  ;;  %v3214_v61 = vld [vmem:[#allocation5 + $0x1f8] sm:$0xff] }
 0x5f7   : > { %v2374_v12 = vadd.f32 %v2373_v11, %v6399_v0  ;;  %v5430_v11 = vpack.c.bf16 %v3214_v61, %v3213_v9 }
 0x5f8   : > { %v2461_v17 = vmax.f32 %v2379_v10, 0.0 }
 0x5f9   : > { %v2460_v13 = vmax.f32 %v2374_v12, 0.0  ;;  %5431 = vmatprep.subr.bf16.mxu0 %v5430_v11 }
 0x5fa   : > { %5433 = vmatpush3.bf16.msra.mxu0 %v5430_v11 }
 0x5fb   : > { %5109 = vmatprep.mubr.msk.f32.mxu0 %vm688_vm0, %v2460_v13 }
 0x5fc   : > { %5110 = vmatmul.mubr.msk.f32.gmra.mrb[134].mxu0 %vm688_vm0, %v2461_v17 }
 0x5fd   : > { %v5050_v18 = vpop.f32.mrb[96].mxu1 }
 0x5fe   : > { %v2389_v19 = vadd.f32 %v5050_v18, %v6399_v0  ;;  %v2383_v20 = vpop.f32.mrb[97].mxu1 }
 0x5ff   : > { %v2384_v21 = vadd.f32 %v2383_v20, %v6399_v0 }
 0x600   : > { %v2463_v23 = vmax.f32 %v2389_v19, 0.0 }
 0x601   : > { %v2462_v22 = vmax.f32 %v2384_v21, 0.0 }
 0x603   : > { %5112 = vmatprep.mubr.msk.f32.mxu0 %vm688_vm0, %v2462_v22 }
 0x604   : > { %5113 = vmatmul.mubr.msk.f32.gmra.mrb[136].mxu0 %vm688_vm0, %v2463_v23 }
 0x605   : > { %v5053_v24 = vpop.f32.mrb[98].mxu1 }
 0x606   : > { %v2399_v25 = vadd.f32 %v5053_v24, %v6399_v0  ;;  %v2393_v26 = vpop.f32.mrb[99].mxu1 }
 0x607   : > { %v2394_v27 = vadd.f32 %v2393_v26, %v6399_v0 }
 0x608   : > { %v2465_v29 = vmax.f32 %v2399_v25, 0.0 }
 0x609   : > { %v2464_v28 = vmax.f32 %v2394_v27, 0.0 }
 0x60b   : > { %5115 = vmatprep.mubr.msk.f32.mxu0 %vm688_vm0, %v2464_v28 }
 0x60c   : > { %5116 = vmatmul.mubr.msk.f32.gmra.mrb[138].mxu0 %vm688_vm0, %v2465_v29 }
 0x60d   : > { %v5056_v30 = vpop.f32.mrb[100].mxu1 }
 0x60e   : > { %v2409_v31 = vadd.f32 %v5056_v30, %v6399_v0  ;;  %v2403_v32 = vpop.f32.mrb[101].mxu1 }
 0x60f   : > { %v2404_v33 = vadd.f32 %v2403_v32, %v6399_v0 }
 0x610   : > { %v2467_v35 = vmax.f32 %v2409_v31, 0.0 }
 0x611   : > { %v2466_v34 = vmax.f32 %v2404_v33, 0.0 }
 0x613   : > { %5118 = vmatprep.mubr.msk.f32.mxu0 %vm688_vm0, %v2466_v34 }
 0x614   : > { %5119 = vmatmul.mubr.msk.f32.gmra.mrb[140].mxu0 %vm688_vm0, %v2467_v35 }
 0x615   : > { %v5059_v36 = vpop.f32.mrb[102].mxu1 }
 0x616   : > { %v2419_v37 = vadd.f32 %v5059_v36, %v6399_v0  ;;  %v2413_v38 = vpop.f32.mrb[103].mxu1 }
 0x617   : > { %v2414_v39 = vadd.f32 %v2413_v38, %v6399_v0 }
 0x618   : > { %v2469_v41 = vmax.f32 %v2419_v37, 0.0 }
 0x619   : > { %v2468_v40 = vmax.f32 %v2414_v39, 0.0 }
 0x61b   : > { %5121 = vmatprep.mubr.msk.f32.mxu0 %vm688_vm0, %v2468_v40 }
 0x61c   : > { %5122 = vmatmul.mubr.msk.f32.gmra.mrb[142].mxu0 %vm688_vm0, %v2469_v41 }
 0x61d   : > { %v5062_v42 = vpop.f32.mrb[104].mxu1 }
 0x61e   : > { %v2429_v43 = vadd.f32 %v5062_v42, %v6399_v0  ;;  %v2423_v44 = vpop.f32.mrb[105].mxu1 }
 0x61f   : > { %v2424_v45 = vadd.f32 %v2423_v44, %v6399_v0 }
 0x620   : > { %v2471_v3 = vmax.f32 %v2429_v43, 0.0 }
 0x621   : > { %v2470_v46 = vmax.f32 %v2424_v45, 0.0 }
 0x623   : > { %5124 = vmatprep.mubr.msk.f32.mxu0 %vm688_vm0, %v2470_v46 }
 0x624   : > { %5125 = vmatmul.mubr.msk.f32.gmra.mrb[144].mxu0 %vm688_vm0, %v2471_v3 }
 0x625   : > { %v5065_v47 = vpop.f32.mrb[106].mxu1 }
 0x626   : > { %v2439_v48 = vadd.f32 %v5065_v47, %v6399_v0  ;;  %v2433_v50 = vpop.f32.mrb[107].mxu1 }
 0x627   : > { %v2434_v51 = vadd.f32 %v2433_v50, %v6399_v0 }
 0x628   : > { %v2473_v53 = vmax.f32 %v2439_v48, 0.0 }
 0x629   : > { %v2472_v52 = vmax.f32 %v2434_v51, 0.0 }
 0x62b   : > { %5127 = vmatprep.mubr.msk.f32.mxu0 %vm688_vm0, %v2472_v52 }
 0x62c   : > { %5128 = vmatmul.mubr.msk.f32.gmra.mrb[146].mxu0 %vm688_vm0, %v2473_v53 }
 0x687   : > { %v5084_v59 = vpop.f32.mrb[116].mxu0 }
 0x688   : > { %v2655_v16 = vadd.f32 %v5084_v59, %v6467_v55  ;;  %v2649_v0 = vpop.f32.mrb[117].mxu0 }
 0x689   : > { %v2650_v6 = vadd.f32 %v2649_v0, %v6467_v55 }
 0x68a   : > { %v2809_v49 = vmax.f32 %v2655_v16, 0.0 }
 0x68b   : > { %v2808_v7 = vmax.f32 %v2650_v6, 0.0 }
 0x68d   : > { %5146 = vmatprep.mubr.msk.f32.mxu1 %vm688_vm0, %v2808_v7 }
 0x68e   : > { %5147 = vmatmul.mubr.msk.f32.vlgmr.msra.gmra.mrb[108].mxu1 %vm688_vm0, %v2809_v49 }
 0x68f   : > { %v5087_v10 = vpop.f32.mrb[118].mxu0 }
 0x690   : > { %v2665_v12 = vadd.f32 %v5087_v10, %v6467_v55  ;;  %v2659_v13 = vpop.f32.mrb[119].mxu0 }
 0x691   : > { %v2660_v17 = vadd.f32 %v2659_v13, %v6467_v55 }
 0x692   : > { %v2811_v19 = vmax.f32 %v2665_v12, 0.0 }
 0x693   : > { %v2810_v18 = vmax.f32 %v2660_v17, 0.0 }
 0x695   : > { %5149 = vmatprep.mubr.msk.f32.mxu1 %vm688_vm0, %v2810_v18 }
 0x696   : > { %5150 = vmatmul.mubr.msk.f32.gmra.mrb[110].mxu1 %vm688_vm0, %v2811_v19 }
 0x697   : > { %v5090_v20 = vpop.f32.mrb[120].mxu0 }
 0x698   : > { %v2675_v21 = vadd.f32 %v5090_v20, %v6467_v55  ;;  %v2669_v22 = vpop.f32.mrb[121].mxu0 }
 0x699   : > { %v2670_v23 = vadd.f32 %v2669_v22, %v6467_v55 }
 0x69a   : > { %v2813_v25 = vmax.f32 %v2675_v21, 0.0 }
 0x69b   : > { %v2812_v24 = vmax.f32 %v2670_v23, 0.0 }
 0x69d   : > { %5152 = vmatprep.mubr.msk.f32.mxu1 %vm688_vm0, %v2812_v24 }
 0x69e   : > { %5153 = vmatmul.mubr.msk.f32.gmra.mrb[112].mxu1 %vm688_vm0, %v2813_v25 }
 0x69f   : > { %v5093_v26 = vpop.f32.mrb[122].mxu0 }
 0x6a0   : > { %v2685_v27 = vadd.f32 %v5093_v26, %v6467_v55  ;;  %v2679_v28 = vpop.f32.mrb[123].mxu0 }
 0x6a1   : > { %v2680_v29 = vadd.f32 %v2679_v28, %v6467_v55 }
 0x6a2   : > { %v2815_v31 = vmax.f32 %v2685_v27, 0.0 }
 0x6a3   : > { %v2814_v30 = vmax.f32 %v2680_v29, 0.0 }
 0x6a5   : > { %5155 = vmatprep.mubr.msk.f32.mxu1 %vm688_vm0, %v2814_v30 }
 0x6a6   : > { %5156 = vmatmul.mubr.msk.f32.gmra.mrb[114].mxu1 %vm688_vm0, %v2815_v31 }
 0x6a7   : > { %v5096_v32 = vpop.f32.mrb[124].mxu0 }
 0x6a8   : > { %v2695_v33 = vadd.f32 %v5096_v32, %v6467_v55  ;;  %v2689_v34 = vpop.f32.mrb[125].mxu0 }
 0x6a9   : > { %v2690_v35 = vadd.f32 %v2689_v34, %v6467_v55 }
 0x6aa   : > { %v2817_v37 = vmax.f32 %v2695_v33, 0.0 }
 0x6ab   : > { %v2816_v36 = vmax.f32 %v2690_v35, 0.0 }
 0x6ad   : > { %5158 = vmatprep.mubr.msk.f32.mxu1 %vm688_vm0, %v2816_v36 }
 0x6ae   : > { %5159 = vmatmul.mubr.msk.f32.gmra.mrb[116].mxu1 %vm688_vm0, %v2817_v37 }
 0x6af   : > { %v5099_v38 = vpop.f32.mrb[126].mxu0 }
 0x6b0   : > { %v2705_v39 = vadd.f32 %v5099_v38, %v6467_v55  ;;  %v2699_v40 = vpop.f32.mrb[127].mxu0 }
 0x6b1   : > { %v2700_v41 = vadd.f32 %v2699_v40, %v6467_v55 }
 0x6b2   : > { %v2819_v43 = vmax.f32 %v2705_v39, 0.0 }
 0x6b3   : > { %v2818_v42 = vmax.f32 %v2700_v41, 0.0 }
 0x6b5   : > { %5161 = vmatprep.mubr.msk.f32.mxu1 %vm688_vm0, %v2818_v42 }
 0x6b6   : > { %5162 = vmatmul.mubr.msk.f32.gmra.mrb[118].mxu1 %vm688_vm0, %v2819_v43 }
 0x6b7   : > { %v5102_v44 = vpop.f32.mrb[128].mxu0 }
 0x6b8   : > { %v2715_v45 = vadd.f32 %v5102_v44, %v6467_v55  ;;  %v2709_v46 = vpop.f32.mrb[129].mxu0 }
 0x6b9   : > { %v2710_v3 = vadd.f32 %v2709_v46, %v6467_v55 }
 0x6ba   : > { %v2821_v48 = vmax.f32 %v2715_v45, 0.0  ;;  %v2851_v45 = vsub.s32 6, %v6109_v14 }
 0x6bb   : > { %v2820_v47 = vmax.f32 %v2710_v3, 0.0  ;;  %v3573_v3 = vld [vmem:[%s6948_s5 + $0x8] sm:$0xff] }
 0x6bc   : > { %v6535_v46 = vrot.slane %v6396_v2, %v2851_v45 }
 0x6bd   : > { %5164 = vmatprep.mubr.msk.f32.mxu1 %vm688_vm0, %v2820_v47  ;;  %v3575_v47 = vld [vmem:[%s6948_s5 + $0x18] sm:$0xff] }
 0x6be   : > { %5165 = vmatmul.mubr.msk.f32.gmra.mrb[120].mxu1 %vm688_vm0, %v2821_v48 }
 0x6bf   : > { %v5105_v50 = vpop.f32.mrb[130].mxu0 }
 0x6c0   : > { %v2725_v51 = vadd.f32 %v5105_v50, %v6467_v55  ;;  %v2719_v52 = vpop.f32.mrb[131].mxu0  ;;  %v5434_v50 = vpack.c.bf16 %v3575_v47, %v3573_v3 }
 0x6c1   : > { %v2720_v53 = vadd.f32 %v2719_v52, %v6467_v55  ;;  %v3577_v52 = vld [vmem:[%s6948_s5 + $0x28] sm:$0xff] }
 0x6c2   : > { %v2823_v56 = vmax.f32 %v2725_v51, 0.0  ;;  %v3574_v51 = vld [vmem:[%s6948_s5 + $0x10] sm:$0xff]  ;;  %5435 = vmatprep.subr.bf16.mxu1 %v5434_v50 }
 0x6c3   : > { %v2822_v54 = vmax.f32 %v2720_v53, 0.0  ;;  %v3579_v53 = vld [vmem:[%s6948_s5 + $0x38] sm:$0xff] }
 0x6c5   : > { %5167 = vmatprep.mubr.msk.f32.mxu1 %vm688_vm0, %v2822_v54 }
 0x6c6   : > { %5168 = vmatmul.mubr.msk.f32.gmra.mrb[122].mxu1 %vm688_vm0, %v2823_v56 }
 0x6c7   : > { %v5108_v57 = vpop.f32.mrb[132].mxu0 }
 0x6c8   : > { %v2735_v58 = vadd.f32 %v5108_v57, %v6467_v55  ;;  %v2729_v59 = vpop.f32.mrb[133].mxu0 }
 0x6c9   : > { %v2730_v60 = vadd.f32 %v2729_v59, %v6467_v55  ;;  %v3576_v59 = vld [vmem:[%s6948_s5 + $0x20] sm:$0xff] }
 0x6ca   : > { %v2825_v16 = vmax.f32 %v2735_v58, 0.0  ;;  %v5438_v58 = vpack.c.bf16 %v3579_v53, %v3577_v52 }
 0x6cb   : > { %v2824_v62 = vmax.f32 %v2730_v60, 0.0  ;;  %v3578_v60 = vld [vmem:[%s6948_s5 + $0x30] sm:$0xff] }
 0x6cd   : > { %5170 = vmatprep.mubr.msk.f32.mxu1 %vm688_vm0, %v2824_v62  ;;  %v3581_v62 = vld [vmem:[%s6948_s5 + $0x48] sm:$0xff] }
 0x6ce   : > { %5171 = vmatmul.mubr.msk.f32.gmra.mrb[124].mxu1 %vm688_vm0, %v2825_v16 }
 0x6cf   : > { %v5111_v0 = vpop.f32.mrb[134].mxu0 }
 0x6d0   : > { %v2745_v63 = vadd.f32 %v5111_v0, %v6467_v55  ;;  %v2739_v4 = vpop.f32.mrb[135].mxu0  ;;  %v3583_v0 = vld [vmem:[%s6948_s5 + $0x58] sm:$0xff] }
 0x6d1   : > { %v2740_v5 = vadd.f32 %v2739_v4, %v6467_v55 }
 0x6d2   : > { %v2827_v7 = vmax.f32 %v2745_v63, 0.0  ;;  %v5440_v63 = vpack.c.bf16 %v3578_v60, %v3576_v59 }
 0x6d3   : > { %v2826_v6 = vmax.f32 %v2740_v5, 0.0  ;;  %v5442_v5 = vpack.c.bf16 %v3583_v0, %v3581_v62 }
 0x6d5   : > { %5173 = vmatprep.mubr.msk.f32.mxu1 %vm688_vm0, %v2826_v6  ;;  %v3580_v6 = vld [vmem:[%s6948_s5 + $0x40] sm:$0xff] }
 0x6d6   : > { %5174 = vmatmul.mubr.msk.f32.gmra.mrb[126].mxu1 %vm688_vm0, %v2827_v7  ;;  %v3582_v7 = vld [vmem:[%s6948_s5 + $0x50] sm:$0xff] }
 0x6d7   : > { %v5114_v8 = vpop.f32.mrb[136].mxu0 }
 0x6d8   : > { %v2755_v49 = vadd.f32 %v5114_v8, %v6467_v55  ;;  %v2749_v9 = vpop.f32.mrb[137].mxu0 }
 0x6d9   : > { %v2750_v61 = vadd.f32 %v2749_v9, %v6467_v55  ;;  %v3587_v9 = vld [vmem:[%s6948_s5 + $0x78] sm:$0xff] }
 0x6da   : > { %v2829_v11 = vmax.f32 %v2755_v49, 0.0  ;;  %v3585_v49 = vld [vmem:[%s6948_s5 + $0x68] sm:$0xff] }
 0x6db   : > { %v2828_v10 = vmax.f32 %v2750_v61, 0.0  ;;  %v5444_v61 = vpack.c.bf16 %v3582_v7, %v3580_v6 }
 0x6dd   : > { %5176 = vmatprep.mubr.msk.f32.mxu1 %vm688_vm0, %v2828_v10 }
 0x6de   : > { %5177 = vmatmul.mubr.msk.f32.gmra.mrb[128].mxu1 %vm688_vm0, %v2829_v11  ;;  %v5446_v11 = vpack.c.bf16 %v3587_v9, %v3585_v49 }
 0x6df   : > { %v5117_v12 = vpop.f32.mrb[138].mxu0 }
 0x6e0   : > { %v2765_v13 = vadd.f32 %v5117_v12, %v6467_v55  ;;  %v2759_v17 = vpop.f32.mrb[139].mxu0  ;;  %v3584_v12 = vld [vmem:[%s6948_s5 + $0x60] sm:$0xff] }
 0x6e1   : > { %v2760_v18 = vadd.f32 %v2759_v17, %v6467_v55 }
 0x6e2   : > { %v2831_v20 = vmax.f32 %v2765_v13, 0.0  ;;  %v3586_v13 = vld [vmem:[%s6948_s5 + $0x70] sm:$0xff] }
 0x6e3   : > { %v2830_v19 = vmax.f32 %v2760_v18, 0.0 }
 0x6e5   : > { %5179 = vmatprep.mubr.msk.f32.mxu1 %vm688_vm0, %v2830_v19 }
 0x6e6   : > { %5180 = vmatmul.mubr.msk.f32.gmra.mrb[130].mxu1 %vm688_vm0, %v2831_v20  ;;  %v5448_v20 = vpack.c.bf16 %v3586_v13, %v3584_v12 }
 0x6e7   : > { %v5120_v21 = vpop.f32.mrb[140].mxu0 }
 0x6e8   : > { %v2775_v22 = vadd.f32 %v5120_v21, %v6467_v55  ;;  %v2769_v23 = vpop.f32.mrb[141].mxu0 }
 0x6e9   : > { %v2770_v24 = vadd.f32 %v2769_v23, %v6467_v55 }
 0x6ea   : > { %v2833_v26 = vmax.f32 %v2775_v22, 0.0 }
 0x6eb   : > { %v2832_v25 = vmax.f32 %v2770_v24, 0.0 }
 0x6ed   : > { %5182 = vmatprep.mubr.msk.f32.mxu1 %vm688_vm0, %v2832_v25 }
 0x6ee   : > { %5183 = vmatmul.mubr.msk.f32.gmra.mrb[132].mxu1 %vm688_vm0, %v2833_v26 }
 0x6ef   : > { %v5123_v27 = vpop.f32.mrb[142].mxu0 }
 0x6f0   : > { %v2785_v28 = vadd.f32 %v5123_v27, %v6467_v55  ;;  %v2779_v29 = vpop.f32.mrb[143].mxu0 }
 0x6f1   : > { %v2780_v30 = vadd.f32 %v2779_v29, %v6467_v55 }
 0x6f2   : > { %v2835_v32 = vmax.f32 %v2785_v28, 0.0 }
 0x6f3   : > { %v2834_v31 = vmax.f32 %v2780_v30, 0.0 }
 0x6f5   : > { %5185 = vmatprep.mubr.msk.f32.mxu1 %vm688_vm0, %v2834_v31 }
 0x6f6   : > { %5186 = vmatmul.mubr.msk.f32.gmra.mrb[134].mxu1 %vm688_vm0, %v2835_v32 }
 0x6f7   : > { %v5126_v33 = vpop.f32.mrb[144].mxu0 }
 0x6f8   : > { %v2795_v34 = vadd.f32 %v5126_v33, %v6467_v55  ;;  %v2789_v35 = vpop.f32.mrb[145].mxu0 }
 0x6f9   : > { %v2790_v36 = vadd.f32 %v2789_v35, %v6467_v55 }
 0x6fa   : > { %v2837_v38 = vmax.f32 %v2795_v34, 0.0 }
 0x6fb   : > { %v2836_v37 = vmax.f32 %v2790_v36, 0.0 }
 0x6fd   : > { %5188 = vmatprep.mubr.msk.f32.mxu1 %vm688_vm0, %v2836_v37 }
 0x6fe   : > { %5189 = vmatmul.mubr.msk.f32.gmra.mrb[136].mxu1 %vm688_vm0, %v2837_v38 }
 0x6ff   : > { %v5129_v39 = vpop.f32.mrb[146].mxu0 }
 0x700   : > { %v2805_v40 = vadd.f32 %v5129_v39, %v6467_v55  ;;  %v2799_v41 = vpop.f32.mrb[147].mxu0 }
 0x701   : > { %v2800_v42 = vadd.f32 %v2799_v41, %v6467_v55  ;;  %v3572_v55 = vld [vmem:[%s6948_s5] sm:$0xff] }
 0x702   : > { %v2839_v44 = vmax.f32 %v2805_v40, 0.0  ;;  %v5436_v57 = vpack.c.bf16 %v3574_v51, %v3572_v55 }
 0x703   : > { %v2838_v43 = vmax.f32 %v2800_v42, 0.0 }
 0x704   : > { %5437 = vmatpush1.bf16.msra.mxu1 %v5436_v57 }
 0x705   : > { %5191 = vmatprep.mubr.msk.f32.mxu1 %vm688_vm0, %v2838_v43  ;;  %5439 = vmatprep.subr.bf16.mxu1 %v5438_v58 }
 0x706   : > { %5192 = vmatmul.mubr.msk.f32.gmra.mrb[138].mxu1 %vm688_vm0, %v2839_v44 }
 0x708   : > { %5441 = vmatpush1.bf16.msra.mxu1 %v5440_v63 }
 0x709   : > { %5443 = vmatprep.subr.bf16.mxu1 %v5442_v5 }
 0x70c   : > { %5445 = vmatpush1.bf16.msra.mxu1 %v5444_v61 }
 0x70d   : > { %5447 = vmatprep.subr.bf16.mxu1 %v5446_v11 }
 0x710   : > { %5449 = vmatpush1.bf16.msra.mxu1 %v5448_v20 }
 0x761   : > { %v5148_v48 = vpop.f32.mrb[108].mxu1 }
 0x762   : > { %v3021_v54 = vadd.f32 %v5148_v48, %v6535_v46  ;;  %v3015_v56 = vpop.f32.mrb[109].mxu1 }
 0x763   : > { %v3016_v16 = vadd.f32 %v3015_v56, %v6535_v46 }
 0x764   : > { %v3175_v8 = vmax.f32 %v3021_v54, 0.0 }
 0x765   : > { %v3174_v4 = vmax.f32 %v3016_v16, 0.0 }
 0x767   : > { %5210 = vmatprep.mubr.msk.f32.mxu0 %vm688_vm0, %v3174_v4 }
 0x768   : > { %5211 = vmatmul.mubr.msk.f32.vlgmr.msra.gmra.mrb[148].mxu0 %vm688_vm0, %v3175_v8 }
 0x769   : > { %v5151_v10 = vpop.f32.mrb[110].mxu1 }
 0x76a   : > { %v3031_v17 = vadd.f32 %v5151_v10, %v6535_v46  ;;  %v3025_v18 = vpop.f32.mrb[111].mxu1 }
 0x76b   : > { %v3026_v19 = vadd.f32 %v3025_v18, %v6535_v46 }
 0x76c   : > { %v3177_v22 = vmax.f32 %v3031_v17, 0.0 }
 0x76d   : > { %v3176_v21 = vmax.f32 %v3026_v19, 0.0 }
 0x76f   : > { %5213 = vmatprep.mubr.msk.f32.mxu0 %vm688_vm0, %v3176_v21 }
 0x770   : > { %5214 = vmatmul.mubr.msk.f32.gmra.mrb[150].mxu0 %vm688_vm0, %v3177_v22 }
 0x771   : > { %v5154_v23 = vpop.f32.mrb[112].mxu1 }
 0x772   : > { %v3041_v24 = vadd.f32 %v5154_v23, %v6535_v46  ;;  %v3035_v25 = vpop.f32.mrb[113].mxu1 }
 0x773   : > { %v3036_v26 = vadd.f32 %v3035_v25, %v6535_v46 }
 0x774   : > { %v3179_v28 = vmax.f32 %v3041_v24, 0.0  ;;  %v5661_v24 = vmov 0.0  }
 0x775   : > { %v3178_v27 = vmax.f32 %v3036_v26, 0.0  ;;  %3760 = vmatprep.mubr.f32.mxu1 %v5661_v24 }
 0x777   : > { %5216 = vmatprep.mubr.msk.f32.mxu0 %vm688_vm0, %v3178_v27 }
 0x778   : > { %5217 = vmatmul.mubr.msk.f32.gmra.mrb[152].mxu0 %vm688_vm0, %v3179_v28 }
 0x779   : > { %v5157_v29 = vpop.f32.mrb[114].mxu1 }
 0x77a   : > { %v3051_v30 = vadd.f32 %v5157_v29, %v6535_v46  ;;  %v3045_v31 = vpop.f32.mrb[115].mxu1 }
 0x77b   : > { %v3046_v32 = vadd.f32 %v3045_v31, %v6535_v46 }
 0x77c   : > { %v3181_v34 = vmax.f32 %v3051_v30, 0.0 }
 0x77d   : > { %v3180_v33 = vmax.f32 %v3046_v32, 0.0 }
 0x77f   : > { %5219 = vmatprep.mubr.msk.f32.mxu0 %vm688_vm0, %v3180_v33 }
 0x780   : > { %5220 = vmatmul.mubr.msk.f32.gmra.mrb[154].mxu0 %vm688_vm0, %v3181_v34 }
 0x781   : > { %v5160_v35 = vpop.f32.mrb[116].mxu1 }
 0x782   : > { %v3061_v36 = vadd.f32 %v5160_v35, %v6535_v46  ;;  %v3055_v37 = vpop.f32.mrb[117].mxu1 }
 0x783   : > { %v3056_v38 = vadd.f32 %v3055_v37, %v6535_v46 }
 0x784   : > { %v3183_v40 = vmax.f32 %v3061_v36, 0.0 }
 0x785   : > { %v3182_v39 = vmax.f32 %v3056_v38, 0.0 }
 0x787   : > { %5222 = vmatprep.mubr.msk.f32.mxu0 %vm688_vm0, %v3182_v39 }
 0x788   : > { %5223 = vmatmul.mubr.msk.f32.gmra.mrb[156].mxu0 %vm688_vm0, %v3183_v40 }
 0x789   : > { %v5163_v41 = vpop.f32.mrb[118].mxu1 }
 0x78a   : > { %v3071_v42 = vadd.f32 %v5163_v41, %v6535_v46  ;;  %v3065_v43 = vpop.f32.mrb[119].mxu1 }
 0x78b   : > { %v3066_v44 = vadd.f32 %v3065_v43, %v6535_v46 }
 0x78c   : > { %v3185_v3 = vmax.f32 %v3071_v42, 0.0 }
 0x78d   : > { %v3184_v45 = vmax.f32 %v3066_v44, 0.0 }
 0x78f   : > { %5225 = vmatprep.mubr.msk.f32.mxu0 %vm688_vm0, %v3184_v45 }
 0x790   : > { %5226 = vmatmul.mubr.msk.f32.gmra.mrb[158].mxu0 %vm688_vm0, %v3185_v3 }
 0x791   : > { %v5166_v47 = vpop.f32.mrb[120].mxu1 }
 0x792   : > { %v3081_v55 = vadd.f32 %v5166_v47, %v6535_v46  ;;  %v3075_v48 = vpop.f32.mrb[121].mxu1 }
 0x793   : > { %v3076_v50 = vadd.f32 %v3075_v48, %v6535_v46  ;;  %v3217_v48 = vsub.s32 7, %v6109_v14 }
 0x794   : > { %v3187_v52 = vmax.f32 %v3081_v55, 0.0 }
 0x795   : > { %v3186_v51 = vmax.f32 %v3076_v50, 0.0  ;;  %v6652_v50 = vrot.slane %v6396_v2, %v3217_v48 }
 0x797   : > { %5228 = vmatprep.mubr.msk.f32.mxu0 %vm688_vm0, %v3186_v51 }
 0x798   : > { %5229 = vmatmul.mubr.msk.f32.gmra.mrb[160].mxu0 %vm688_vm0, %v3187_v52 }
 0x799   : > { %v5169_v53 = vpop.f32.mrb[122].mxu1 }
 0x79a   : > { %v3091_v54 = vadd.f32 %v5169_v53, %v6535_v46  ;;  %v3085_v56 = vpop.f32.mrb[123].mxu1 }
 0x79b   : > { %v3086_v57 = vadd.f32 %v3085_v56, %v6535_v46 }
 0x79c   : > { %v3189_v59 = vmax.f32 %v3091_v54, 0.0 }
 0x79d   : > { %v3188_v58 = vmax.f32 %v3086_v57, 0.0 }
 0x79f   : > { %5231 = vmatprep.mubr.msk.f32.mxu0 %vm688_vm0, %v3188_v58 }
 0x7a0   : > { %5232 = vmatmul.mubr.msk.f32.gmra.mrb[162].mxu0 %vm688_vm0, %v3189_v59 }
 0x7a1   : > { %v5172_v60 = vpop.f32.mrb[124].mxu1 }
 0x7a2   : > { %v3101_v62 = vadd.f32 %v5172_v60, %v6535_v46  ;;  %v3095_v16 = vpop.f32.mrb[125].mxu1 }
 0x7a3   : > { %v3096_v0 = vadd.f32 %v3095_v16, %v6535_v46 }
 0x7a4   : > { %v3191_v4 = vmax.f32 %v3101_v62, 0.0 }
 0x7a5   : > { %v3190_v63 = vmax.f32 %v3096_v0, 0.0 }
 0x7a7   : > { %5234 = vmatprep.mubr.msk.f32.mxu0 %vm688_vm0, %v3190_v63 }
 0x7a8   : > { %5235 = vmatmul.mubr.msk.f32.gmra.mrb[164].mxu0 %vm688_vm0, %v3191_v4 }
 0x7a9   : > { %v5175_v5 = vpop.f32.mrb[126].mxu1 }
 0x7aa   : > { %v3111_v6 = vadd.f32 %v5175_v5, %v6535_v46  ;;  %v3105_v7 = vpop.f32.mrb[127].mxu1 }
 0x7ab   : > { %v3106_v8 = vadd.f32 %v3105_v7, %v6535_v46 }
 0x7ac   : > { %v3193_v9 = vmax.f32 %v3111_v6, 0.0 }
 0x7ad   : > { %v3192_v49 = vmax.f32 %v3106_v8, 0.0 }
 0x7af   : > { %5237 = vmatprep.mubr.msk.f32.mxu0 %vm688_vm0, %v3192_v49 }
 0x7b0   : > { %5238 = vmatmul.mubr.msk.f32.gmra.mrb[166].mxu0 %vm688_vm0, %v3193_v9 }
 0x7b1   : > { %v5178_v61 = vpop.f32.mrb[128].mxu1 }
 0x7b2   : > { %v3121_v10 = vadd.f32 %v5178_v61, %v6535_v46  ;;  %v3115_v11 = vpop.f32.mrb[129].mxu1 }
 0x7b3   : > { %v3116_v12 = vadd.f32 %v3115_v11, %v6535_v46 }
 0x7b4   : > { %v3195_v17 = vmax.f32 %v3121_v10, 0.0 }
 0x7b5   : > { %v3194_v13 = vmax.f32 %v3116_v12, 0.0 }
 0x7b7   : > { %5240 = vmatprep.mubr.msk.f32.mxu0 %vm688_vm0, %v3194_v13 }
 0x7b8   : > { %5241 = vmatmul.mubr.msk.f32.gmra.mrb[168].mxu0 %vm688_vm0, %v3195_v17 }
 0x7b9   : > { %v5181_v18 = vpop.f32.mrb[130].mxu1 }
 0x7ba   : > { %v3131_v19 = vadd.f32 %v5181_v18, %v6535_v46  ;;  %v3125_v20 = vpop.f32.mrb[131].mxu1 }
 0x7bb   : > { %v3126_v21 = vadd.f32 %v3125_v20, %v6535_v46 }
 0x7bc   : > { %v3197_v23 = vmax.f32 %v3131_v19, 0.0 }
 0x7bd   : > { %v3196_v22 = vmax.f32 %v3126_v21, 0.0 }
 0x7bf   : > { %5243 = vmatprep.mubr.msk.f32.mxu0 %vm688_vm0, %v3196_v22 }
 0x7c0   : > { %5244 = vmatmul.mubr.msk.f32.gmra.mrb[170].mxu0 %vm688_vm0, %v3197_v23 }
 0x7c1   : > { %v5184_v25 = vpop.f32.mrb[132].mxu1 }
 0x7c2   : > { %v3141_v26 = vadd.f32 %v5184_v25, %v6535_v46  ;;  %v3135_v27 = vpop.f32.mrb[133].mxu1 }
 0x7c3   : > { %v3136_v28 = vadd.f32 %v3135_v27, %v6535_v46 }
 0x7c4   : > { %v3199_v30 = vmax.f32 %v3141_v26, 0.0 }
 0x7c5   : > { %v3198_v29 = vmax.f32 %v3136_v28, 0.0 }
 0x7c7   : > { %5246 = vmatprep.mubr.msk.f32.mxu0 %vm688_vm0, %v3198_v29 }
 0x7c8   : > { %5247 = vmatmul.mubr.msk.f32.gmra.mrb[172].mxu0 %vm688_vm0, %v3199_v30 }
 0x7c9   : > { %v5187_v31 = vpop.f32.mrb[134].mxu1 }
 0x7ca   : > { %v3151_v32 = vadd.f32 %v5187_v31, %v6535_v46  ;;  %v3145_v33 = vpop.f32.mrb[135].mxu1 }
 0x7cb   : > { %v3146_v34 = vadd.f32 %v3145_v33, %v6535_v46 }
 0x7cc   : > { %v3201_v36 = vmax.f32 %v3151_v32, 0.0 }
 0x7cd   : > { %v3200_v35 = vmax.f32 %v3146_v34, 0.0 }
 0x7cf   : > { %5249 = vmatprep.mubr.msk.f32.mxu0 %vm688_vm0, %v3200_v35 }
 0x7d0   : > { %5250 = vmatmul.mubr.msk.f32.gmra.mrb[174].mxu0 %vm688_vm0, %v3201_v36 }
 0x7d1   : > { %v5190_v37 = vpop.f32.mrb[136].mxu1 }
 0x7d2   : > { %v3161_v38 = vadd.f32 %v5190_v37, %v6535_v46  ;;  %v3155_v39 = vpop.f32.mrb[137].mxu1 }
 0x7d3   : > { %v3156_v40 = vadd.f32 %v3155_v39, %v6535_v46 }
 0x7d4   : > { %v3203_v42 = vmax.f32 %v3161_v38, 0.0 }
 0x7d5   : > { %v3202_v41 = vmax.f32 %v3156_v40, 0.0 }
 0x7d7   : > { %5252 = vmatprep.mubr.msk.f32.mxu0 %vm688_vm0, %v3202_v41 }
 0x7d8   : > { %5253 = vmatmul.mubr.msk.f32.gmra.mrb[176].mxu0 %vm688_vm0, %v3203_v42 }
 0x7d9   : > { %v5193_v43 = vpop.f32.mrb[138].mxu1 }
 0x7da   : > { %v3171_v44 = vadd.f32 %v5193_v43, %v6535_v46  ;;  %v3165_v45 = vpop.f32.mrb[139].mxu1 }
 0x7db   : > { %v3166_v3 = vadd.f32 %v3165_v45, %v6535_v46 }
 0x7dc   : > { %v3205_v55 = vmax.f32 %v3171_v44, 0.0 }
 0x7dd   : > { %v3204_v47 = vmax.f32 %v3166_v3, 0.0 }
 0x7df   : > { %5255 = vmatprep.mubr.msk.f32.mxu0 %vm688_vm0, %v3204_v47 }
 0x7e0   : > { %5256 = vmatmul.mubr.msk.f32.gmra.mrb[178].mxu0 %vm688_vm0, %v3205_v55 }
 0x83b   : > { %v5212_v51 = vpop.f32.mrb[148].mxu0 }
 0x83c   : > { %v3381_v52 = vpop.f32.mrb[149].mxu0  ;;  %v3387_v54 = vadd.f32 %v5212_v51, %v6652_v50 }
 0x83d   : > { %v3382_v53 = vadd.f32 %v3381_v52, %v6652_v50 }
 0x83e   : > { %v3541_v46 = vmax.f32 %v3387_v54, 0.0 }
 0x83f   : > { %v3540_v56 = vmax.f32 %v3382_v53, 0.0 }
 0x841   : > { %4384 = vmatmul.mubr.msk.f32.vlgmr.msra.gmra.mrb[140].mxu1 %vm688_vm0, %v3540_v56 }
 0x842   : > { %3766 = vmatprep.mubr.f32.mxu1 %v5661_v24 }
 0x843   : > { %v5215_v57 = vpop.f32.mrb[150].mxu0 }
 0x844   : > { %v3391_v58 = vpop.f32.mrb[151].mxu0  ;;  %v3397_v2 = vadd.f32 %v5215_v57, %v6652_v50 }
 0x845   : > { %v3392_v59 = vadd.f32 %v3391_v58, %v6652_v50  ;;  %4385 = vmatmul.mubr.msk.f32.gmra.mrb[142].mxu1 %vm688_vm0, %v3541_v46 }
 0x846   : > { %3772 = vmatprep.mubr.f32.mxu1 %v5661_v24  ;;  %v3543_v62 = vmax.f32 %v3397_v2, 0.0 }
 0x847   : > { %v3542_v60 = vmax.f32 %v3392_v59, 0.0 }
 0x849   : > { %4386 = vmatmul.mubr.msk.f32.gmra.mrb[144].mxu1 %vm688_vm0, %v3542_v60 }
 0x84a   : > { %3778 = vmatprep.mubr.f32.mxu1 %v5661_v24 }
 0x84b   : > { %v5218_v16 = vpop.f32.mrb[152].mxu0 }
 0x84c   : > { %v3401_v0 = vpop.f32.mrb[153].mxu0  ;;  %v3407_v4 = vadd.f32 %v5218_v16, %v6652_v50 }
 0x84d   : > { %v3402_v63 = vadd.f32 %v3401_v0, %v6652_v50  ;;  %4387 = vmatmul.mubr.msk.f32.gmra.mrb[146].mxu1 %vm688_vm0, %v3543_v62 }
 0x84e   : > { %3784 = vmatprep.mubr.f32.mxu1 %v5661_v24  ;;  %v3545_v6 = vmax.f32 %v3407_v4, 0.0 }
 0x84f   : > { %v3544_v5 = vmax.f32 %v3402_v63, 0.0 }
 0x851   : > { %4388 = vmatmul.mubr.msk.f32.gmra.mrb[148].mxu1 %vm688_vm0, %v3544_v5 }
 0x852   : > { %3790 = vmatprep.mubr.f32.mxu1 %v5661_v24 }
 0x853   : > { %v5221_v7 = vpop.f32.mrb[154].mxu0 }
 0x854   : > { %v3411_v8 = vpop.f32.mrb[155].mxu0  ;;  %v3417_v9 = vadd.f32 %v5221_v7, %v6652_v50 }
 0x855   : > { %v3412_v49 = vadd.f32 %v3411_v8, %v6652_v50  ;;  %4389 = vmatmul.mubr.msk.f32.gmra.mrb[150].mxu1 %vm688_vm0, %v3545_v6 }
 0x856   : > { %3796 = vmatprep.mubr.f32.mxu1 %v5661_v24  ;;  %v3547_v10 = vmax.f32 %v3417_v9, 0.0 }
 0x857   : > { %v3546_v61 = vmax.f32 %v3412_v49, 0.0 }
 0x859   : > { %4390 = vmatmul.mubr.msk.f32.gmra.mrb[152].mxu1 %vm688_vm0, %v3546_v61 }
 0x85a   : > { %3802 = vmatprep.mubr.f32.mxu1 %v5661_v24 }
 0x85b   : > { %v5224_v11 = vpop.f32.mrb[156].mxu0 }
 0x85c   : > { %v3421_v12 = vpop.f32.mrb[157].mxu0  ;;  %v3427_v17 = vadd.f32 %v5224_v11, %v6652_v50 }
 0x85d   : > { %v3422_v13 = vadd.f32 %v3421_v12, %v6652_v50  ;;  %4391 = vmatmul.mubr.msk.f32.gmra.mrb[154].mxu1 %vm688_vm0, %v3547_v10 }
 0x85e   : > { %3808 = vmatprep.mubr.f32.mxu1 %v5661_v24  ;;  %v3549_v19 = vmax.f32 %v3427_v17, 0.0 }
 0x85f   : > { %v3548_v18 = vmax.f32 %v3422_v13, 0.0 }
 0x861   : > { %4392 = vmatmul.mubr.msk.f32.gmra.mrb[156].mxu1 %vm688_vm0, %v3548_v18 }
 0x862   : > { %3814 = vmatprep.mubr.f32.mxu1 %v5661_v24 }
 0x863   : > { %v5227_v20 = vpop.f32.mrb[158].mxu0 }
 0x864   : > { %v3431_v21 = vpop.f32.mrb[159].mxu0  ;;  %v3437_v23 = vadd.f32 %v5227_v20, %v6652_v50 }
 0x865   : > { %v3432_v22 = vadd.f32 %v3431_v21, %v6652_v50  ;;  %4393 = vmatmul.mubr.msk.f32.gmra.mrb[158].mxu1 %vm688_vm0, %v3549_v19 }
 0x866   : > { %3820 = vmatprep.mubr.f32.mxu1 %v5661_v24  ;;  %v3551_v26 = vmax.f32 %v3437_v23, 0.0 }
 0x867   : > { %v3550_v25 = vmax.f32 %v3432_v22, 0.0 }
 0x869   : > { %4394 = vmatmul.mubr.msk.f32.gmra.mrb[160].mxu1 %vm688_vm0, %v3550_v25 }
 0x86a   : > { %3826 = vmatprep.mubr.f32.mxu1 %v5661_v24 }
 0x86b   : > { %v5230_v27 = vpop.f32.mrb[160].mxu0 }
 0x86c   : > { %v3441_v28 = vpop.f32.mrb[161].mxu0  ;;  %v3447_v30 = vadd.f32 %v5230_v27, %v6652_v50 }
 0x86d   : > { %v3442_v29 = vadd.f32 %v3441_v28, %v6652_v50  ;;  %4395 = vmatmul.mubr.msk.f32.gmra.mrb[162].mxu1 %vm688_vm0, %v3551_v26  ;;  %v3588_v28 = vld [vmem:[%s6949_s6] sm:$0x3] }
 0x86e   : > { %3832 = vmatprep.mubr.f32.mxu1 %v5661_v24  ;;  %v3553_v32 = vmax.f32 %v3447_v30, 0.0  ;;  %v6758_v30 = vrot.slane %v3588_v28, %v1053_v1 }
 0x86f   : > { %v3552_v31 = vmax.f32 %v3442_v29, 0.0  ;;  %v6754_v29 = vrot.slane %v3588_v28, %v686_v15 }
 0x871   : > { %4396 = vmatmul.mubr.msk.f32.gmra.mrb[164].mxu1 %vm688_vm0, %v3552_v31 }
 0x872   : > { %3838 = vmatprep.mubr.f32.mxu1 %v5661_v24 }
 0x873   : > { %v5233_v33 = vpop.f32.mrb[162].mxu0 }
 0x874   : > { %v3451_v34 = vpop.f32.mrb[163].mxu0  ;;  %v3457_v36 = vadd.f32 %v5233_v33, %v6652_v50 }
 0x875   : > { %v3452_v35 = vadd.f32 %v3451_v34, %v6652_v50  ;;  %4397 = vmatmul.mubr.msk.f32.gmra.mrb[166].mxu1 %vm688_vm0, %v3553_v32 }
 0x876   : > { %3844 = vmatprep.mubr.f32.mxu1 %v5661_v24  ;;  %v3555_v38 = vmax.f32 %v3457_v36, 0.0 }
 0x877   : > { %v3554_v37 = vmax.f32 %v3452_v35, 0.0 }
 0x879   : > { %4398 = vmatmul.mubr.msk.f32.gmra.mrb[168].mxu1 %vm688_vm0, %v3554_v37 }
 0x87a   : > { %3850 = vmatprep.mubr.f32.mxu1 %v5661_v24 }
 0x87b   : > { %v5236_v39 = vpop.f32.mrb[164].mxu0 }
 0x87c   : > { %v3461_v40 = vpop.f32.mrb[165].mxu0  ;;  %v3467_v42 = vadd.f32 %v5236_v39, %v6652_v50 }
 0x87d   : > { %v3462_v41 = vadd.f32 %v3461_v40, %v6652_v50  ;;  %4399 = vmatmul.mubr.msk.f32.gmra.mrb[170].mxu1 %vm688_vm0, %v3555_v38 }
 0x87e   : > { %3856 = vmatprep.mubr.f32.mxu1 %v5661_v24  ;;  %v3557_v44 = vmax.f32 %v3467_v42, 0.0 }
 0x87f   : > { %v3556_v43 = vmax.f32 %v3462_v41, 0.0 }
 0x881   : > { %4400 = vmatmul.mubr.msk.f32.gmra.mrb[172].mxu1 %vm688_vm0, %v3556_v43 }
 0x882   : > { %3862 = vmatprep.mubr.f32.mxu1 %v5661_v24 }
 0x883   : > { %v5239_v45 = vpop.f32.mrb[166].mxu0 }
 0x884   : > { %v3471_v3 = vpop.f32.mrb[167].mxu0  ;;  %v3477_v55 = vadd.f32 %v5239_v45, %v6652_v50 }
 0x885   : > { %v3472_v47 = vadd.f32 %v3471_v3, %v6652_v50  ;;  %4401 = vmatmul.mubr.msk.f32.gmra.mrb[174].mxu1 %vm688_vm0, %v3557_v44 }
 0x886   : > { %3868 = vmatprep.mubr.f32.mxu1 %v5661_v24  ;;  %v3559_v51 = vmax.f32 %v3477_v55, 0.0 }
 0x887   : > { %v3558_v48 = vmax.f32 %v3472_v47, 0.0 }
 0x889   : > { %4402 = vmatmul.mubr.msk.f32.gmra.mrb[176].mxu1 %vm688_vm0, %v3558_v48 }
 0x88a   : > { %3874 = vmatprep.mubr.f32.mxu1 %v5661_v24 }
 0x88b   : > { %v5242_v52 = vpop.f32.mrb[168].mxu0 }
 0x88c   : > { %v3481_v53 = vpop.f32.mrb[169].mxu0  ;;  %v3487_v56 = vadd.f32 %v5242_v52, %v6652_v50 }
 0x88d   : > { %v3482_v54 = vadd.f32 %v3481_v53, %v6652_v50  ;;  %4403 = vmatmul.mubr.msk.f32.gmra.mrb[178].mxu1 %vm688_vm0, %v3559_v51 }
 0x88e   : > { %3880 = vmatprep.mubr.f32.mxu1 %v5661_v24  ;;  %v3561_v57 = vmax.f32 %v3487_v56, 0.0 }
 0x88f   : > { %v3560_v46 = vmax.f32 %v3482_v54, 0.0 }
 0x891   : > { %4404 = vmatmul.mubr.msk.f32.gmra.mrb[180].mxu1 %vm688_vm0, %v3560_v46 }
 0x892   : > { %3886 = vmatprep.mubr.f32.mxu1 %v5661_v24 }
 0x893   : > { %v5245_v58 = vpop.f32.mrb[170].mxu0 }
 0x894   : > { %v3491_v59 = vpop.f32.mrb[171].mxu0  ;;  %v3497_v60 = vadd.f32 %v5245_v58, %v6652_v50 }
 0x895   : > { %v3492_v2 = vadd.f32 %v3491_v59, %v6652_v50  ;;  %4405 = vmatmul.mubr.msk.f32.gmra.mrb[182].mxu1 %vm688_vm0, %v3561_v57 }
 0x896   : > { %3892 = vmatprep.mubr.f32.mxu1 %v5661_v24  ;;  %v3563_v16 = vmax.f32 %v3497_v60, 0.0 }
 0x897   : > { %v3562_v62 = vmax.f32 %v3492_v2, 0.0 }
 0x899   : > { %4406 = vmatmul.mubr.msk.f32.gmra.mrb[184].mxu1 %vm688_vm0, %v3562_v62 }
 0x89a   : > { %3898 = vmatprep.mubr.f32.mxu1 %v5661_v24 }
 0x89b   : > { %v5248_v0 = vpop.f32.mrb[172].mxu0 }
 0x89c   : > { %v3501_v63 = vpop.f32.mrb[173].mxu0  ;;  %v3507_v5 = vadd.f32 %v5248_v0, %v6652_v50 }
 0x89d   : > { %v3502_v4 = vadd.f32 %v3501_v63, %v6652_v50  ;;  %4407 = vmatmul.mubr.msk.f32.gmra.mrb[186].mxu1 %vm688_vm0, %v3563_v16 }
 0x89e   : > { %3904 = vmatprep.mubr.f32.mxu1 %v5661_v24  ;;  %v3565_v7 = vmax.f32 %v3507_v5, 0.0 }
 0x89f   : > { %v3564_v6 = vmax.f32 %v3502_v4, 0.0 }
 0x8a1   : > { %4408 = vmatmul.mubr.msk.f32.gmra.mrb[188].mxu1 %vm688_vm0, %v3564_v6 }
 0x8a2   : > { %3910 = vmatprep.mubr.f32.mxu1 %v5661_v24 }
 0x8a3   : > { %v5251_v8 = vpop.f32.mrb[174].mxu0 }
 0x8a4   : > { %v3511_v49 = vpop.f32.mrb[175].mxu0  ;;  %v3517_v61 = vadd.f32 %v5251_v8, %v6652_v50 }
 0x8a5   : > { %v3512_v9 = vadd.f32 %v3511_v49, %v6652_v50  ;;  %4409 = vmatmul.mubr.msk.f32.gmra.mrb[190].mxu1 %vm688_vm0, %v3565_v7 }
 0x8a6   : > { %3916 = vmatprep.mubr.f32.mxu1 %v5661_v24  ;;  %v3567_v11 = vmax.f32 %v3517_v61, 0.0 }
 0x8a7   : > { %v3566_v10 = vmax.f32 %v3512_v9, 0.0 }
 0x8a9   : > { %4410 = vmatmul.mubr.msk.f32.gmra.mrb[192].mxu1 %vm688_vm0, %v3566_v10 }
 0x8aa   : > { %3922 = vmatprep.mubr.f32.mxu1 %v5661_v24 }
 0x8ab   : > { %v5254_v12 = vpop.f32.mrb[176].mxu0 }
 0x8ac   : > { %v3521_v13 = vpop.f32.mrb[177].mxu0  ;;  %v3527_v18 = vadd.f32 %v5254_v12, %v6652_v50 }
 0x8ad   : > { %v3522_v17 = vadd.f32 %v3521_v13, %v6652_v50  ;;  %4411 = vmatmul.mubr.msk.f32.gmra.mrb[194].mxu1 %vm688_vm0, %v3567_v11 }
 0x8ae   : > { %3928 = vmatprep.mubr.f32.mxu1 %v5661_v24  ;;  %v3569_v20 = vmax.f32 %v3527_v18, 0.0 }
 0x8af   : > { %v3568_v19 = vmax.f32 %v3522_v17, 0.0 }
 0x8b1   : > { %4412 = vmatmul.mubr.msk.f32.gmra.mrb[196].mxu1 %vm688_vm0, %v3568_v19 }
 0x8b2   : > { %3934 = vmatprep.mubr.f32.mxu1 %v5661_v24 }
 0x8b3   : > { %v5257_v21 = vpop.f32.mrb[178].mxu0 }
 0x8b4   : > { %v3531_v22 = vpop.f32.mrb[179].mxu0  ;;  %v3537_v25 = vadd.f32 %v5257_v21, %v6652_v50 }
 0x8b5   : > { %v3532_v23 = vadd.f32 %v3531_v22, %v6652_v50  ;;  %4413 = vmatmul.mubr.msk.f32.gmra.mrb[198].mxu1 %vm688_vm0, %v3569_v20 }
 0x8b6   : > { %3940 = vmatprep.mubr.f32.mxu1 %v5661_v24  ;;  %v3571_v27 = vmax.f32 %v3537_v25, 0.0 }
 0x8b7   : > { %v3570_v26 = vmax.f32 %v3532_v23, 0.0 }
 0x8b9   : > { %4414 = vmatmul.mubr.msk.f32.gmra.mrb[200].mxu1 %vm688_vm0, %v3570_v26 }
 0x8ba   : > { %3946 = vmatprep.mubr.f32.mxu1 %v5661_v24 }
 0x8bd   : > { %4415 = vmatmul.mubr.msk.f32.gmra.mrb[202].mxu1 %vm688_vm0, %v3571_v27 }
 0x914   : > { %v3762_v50 = vpop.f32.mrb[140].mxu1 }
 0x915   : > { %v3763_v31 = vadd.f32 %v3762_v50, %v6754_v29  ;;  %v3764_v32 = vpop.f32.mrb[141].mxu1 }
 0x916   : > { %v3765_v24 = vadd.f32 %v3764_v32, %v6758_v30 }
 0x917   : > { %3953 = vst [vmem:[%s6764_s16] sm:$0xff] %v3763_v31 }
 0x918   : > { %3954 = vst [vmem:[%s6764_s16 + $0x8] sm:$0xff] %v3765_v24  ;;  %v3768_v14 = vpop.f32.mrb[142].mxu1 }
 0x919   : > { %v3769_v15 = vadd.f32 %v3768_v14, %v6754_v29  ;;  %v3770_v1 = vpop.f32.mrb[143].mxu1 }
 0x91a   : > { %v3771_v33 = vadd.f32 %v3770_v1, %v6758_v30 }
 0x91b   : > { %3955 = vst [vmem:[%s6764_s16 + $0x10] sm:$0xff] %v3769_v15 }
 0x91c   : > { %3956 = vst [vmem:[%s6764_s16 + $0x18] sm:$0xff] %v3771_v33  ;;  %v3774_v34 = vpop.f32.mrb[144].mxu1 }
 0x91d   : > { %v3775_v35 = vadd.f32 %v3774_v34, %v6754_v29  ;;  %v3776_v36 = vpop.f32.mrb[145].mxu1 }
 0x91e   : > { %v3777_v37 = vadd.f32 %v3776_v36, %v6758_v30 }
 0x91f   : > { %3957 = vst [vmem:[%s6764_s16 + $0x20] sm:$0xff] %v3775_v35 }
 0x920   : > { %3958 = vst [vmem:[%s6764_s16 + $0x28] sm:$0xff] %v3777_v37  ;;  %v3780_v38 = vpop.f32.mrb[146].mxu1 }
 0x921   : > { %v3781_v39 = vadd.f32 %v3780_v38, %v6754_v29  ;;  %v3782_v40 = vpop.f32.mrb[147].mxu1 }
 0x922   : > { %v3783_v41 = vadd.f32 %v3782_v40, %v6758_v30 }
 0x923   : > { %3959 = vst [vmem:[%s6764_s16 + $0x30] sm:$0xff] %v3781_v39 }
 0x924   : > { %3960 = vst [vmem:[%s6764_s16 + $0x38] sm:$0xff] %v3783_v41  ;;  %v3786_v42 = vpop.f32.mrb[148].mxu1 }
 0x925   : > { %v3787_v43 = vadd.f32 %v3786_v42, %v6754_v29  ;;  %v3788_v44 = vpop.f32.mrb[149].mxu1 }
 0x926   : > { %v3789_v45 = vadd.f32 %v3788_v44, %v6758_v30 }
 0x927   : > { %3961 = vst [vmem:[%s6764_s16 + $0x40] sm:$0xff] %v3787_v43 }
 0x928   : > { %3962 = vst [vmem:[%s6764_s16 + $0x48] sm:$0xff] %v3789_v45  ;;  %v3792_v3 = vpop.f32.mrb[150].mxu1 }
 0x929   : > { %v3793_v47 = vadd.f32 %v3792_v3, %v6754_v29  ;;  %v3794_v55 = vpop.f32.mrb[151].mxu1 }
 0x92a   : > { %v3795_v48 = vadd.f32 %v3794_v55, %v6758_v30 }
 0x92b   : > { %3963 = vst [vmem:[%s6764_s16 + $0x50] sm:$0xff] %v3793_v47 }
 0x92c   : > { %3964 = vst [vmem:[%s6764_s16 + $0x58] sm:$0xff] %v3795_v48  ;;  %v3798_v51 = vpop.f32.mrb[152].mxu1 }
 0x92d   : > { %v3799_v52 = vadd.f32 %v3798_v51, %v6754_v29  ;;  %v3800_v53 = vpop.f32.mrb[153].mxu1 }
 0x92e   : > { %v3801_v54 = vadd.f32 %v3800_v53, %v6758_v30 }
 0x92f   : > { %3965 = vst [vmem:[%s6764_s16 + $0x60] sm:$0xff] %v3799_v52 }
 0x930   : > { %3966 = vst [vmem:[%s6764_s16 + $0x68] sm:$0xff] %v3801_v54  ;;  %v3804_v56 = vpop.f32.mrb[154].mxu1 }
 0x931   : > { %v3805_v46 = vadd.f32 %v3804_v56, %v6754_v29  ;;  %v3806_v57 = vpop.f32.mrb[155].mxu1 }
 0x932   : > { %v3807_v58 = vadd.f32 %v3806_v57, %v6758_v30 }
 0x933   : > { %3967 = vst [vmem:[%s6764_s16 + $0x70] sm:$0xff] %v3805_v46 }
 0x934   : > { %3968 = vst [vmem:[%s6764_s16 + $0x78] sm:$0xff] %v3807_v58  ;;  %v3810_v59 = vpop.f32.mrb[156].mxu1 }
 0x935   : > { %v3811_v2 = vadd.f32 %v3810_v59, %v6754_v29  ;;  %v3812_v60 = vpop.f32.mrb[157].mxu1 }
 0x936   : > { %v3813_v62 = vadd.f32 %v3812_v60, %v6758_v30 }
 0x937   : > { %3969 = vst [vmem:[%s6764_s16 + $0x80] sm:$0xff] %v3811_v2 }
 0x938   : > { %3970 = vst [vmem:[%s6764_s16 + $0x88] sm:$0xff] %v3813_v62  ;;  %v3816_v16 = vpop.f32.mrb[158].mxu1 }
 0x939   : > { %v3817_v0 = vadd.f32 %v3816_v16, %v6754_v29  ;;  %v3818_v63 = vpop.f32.mrb[159].mxu1 }
 0x93a   : > { %v3819_v4 = vadd.f32 %v3818_v63, %v6758_v30 }
 0x93b   : > { %3971 = vst [vmem:[%s6764_s16 + $0x90] sm:$0xff] %v3817_v0 }
 0x93c   : > { %3972 = vst [vmem:[%s6764_s16 + $0x98] sm:$0xff] %v3819_v4  ;;  %v3822_v5 = vpop.f32.mrb[160].mxu1 }
 0x93d   : > { %v3823_v6 = vadd.f32 %v3822_v5, %v6754_v29  ;;  %v3824_v7 = vpop.f32.mrb[161].mxu1 }
 0x93e   : > { %v3825_v8 = vadd.f32 %v3824_v7, %v6758_v30 }
 0x93f   : > { %3973 = vst [vmem:[%s6764_s16 + $0xa0] sm:$0xff] %v3823_v6 }
 0x940   : > { %3974 = vst [vmem:[%s6764_s16 + $0xa8] sm:$0xff] %v3825_v8  ;;  %v3828_v49 = vpop.f32.mrb[162].mxu1 }
 0x941   : > { %v3829_v9 = vadd.f32 %v3828_v49, %v6754_v29  ;;  %v3830_v61 = vpop.f32.mrb[163].mxu1 }
 0x942   : > { %v3831_v10 = vadd.f32 %v3830_v61, %v6758_v30 }
 0x943   : > { %3975 = vst [vmem:[%s6764_s16 + $0xb0] sm:$0xff] %v3829_v9 }
 0x944   : > { %3976 = vst [vmem:[%s6764_s16 + $0xb8] sm:$0xff] %v3831_v10  ;;  %v3834_v11 = vpop.f32.mrb[164].mxu1 }
 0x945   : > { %v3835_v12 = vadd.f32 %v3834_v11, %v6754_v29  ;;  %v3836_v13 = vpop.f32.mrb[165].mxu1 }
 0x946   : > { %v3837_v17 = vadd.f32 %v3836_v13, %v6758_v30 }
 0x947   : > { %3977 = vst [vmem:[%s6764_s16 + $0xc0] sm:$0xff] %v3835_v12 }
 0x948   : > { %3978 = vst [vmem:[%s6764_s16 + $0xc8] sm:$0xff] %v3837_v17  ;;  %v3840_v18 = vpop.f32.mrb[166].mxu1 }
 0x949   : > { %v3841_v19 = vadd.f32 %v3840_v18, %v6754_v29  ;;  %v3842_v20 = vpop.f32.mrb[167].mxu1 }
 0x94a   : > { %v3843_v21 = vadd.f32 %v3842_v20, %v6758_v30 }
 0x94b   : > { %3979 = vst [vmem:[%s6764_s16 + $0xd0] sm:$0xff] %v3841_v19 }
 0x94c   : > { %3980 = vst [vmem:[%s6764_s16 + $0xd8] sm:$0xff] %v3843_v21  ;;  %v3846_v22 = vpop.f32.mrb[168].mxu1 }
 0x94d   : > { %v3847_v23 = vadd.f32 %v3846_v22, %v6754_v29  ;;  %v3848_v25 = vpop.f32.mrb[169].mxu1 }
 0x94e   : > { %v3849_v26 = vadd.f32 %v3848_v25, %v6758_v30 }
 0x94f   : > { %3981 = vst [vmem:[%s6764_s16 + $0xe0] sm:$0xff] %v3847_v23 }
 0x950   : > { %3982 = vst [vmem:[%s6764_s16 + $0xe8] sm:$0xff] %v3849_v26  ;;  %v3852_v27 = vpop.f32.mrb[170].mxu1 }
 0x951   : > { %v3853_v28 = vadd.f32 %v3852_v27, %v6754_v29  ;;  %v3854_v50 = vpop.f32.mrb[171].mxu1 }
 0x952   : > { %v3855_v31 = vadd.f32 %v3854_v50, %v6758_v30 }
 0x953   : > { %3983 = vst [vmem:[%s6764_s16 + $0xf0] sm:$0xff] %v3853_v28 }
 0x954   : > { %3984 = vst [vmem:[%s6764_s16 + $0xf8] sm:$0xff] %v3855_v31  ;;  %v3858_v32 = vpop.f32.mrb[172].mxu1 }
 0x955   : > { %v3859_v24 = vadd.f32 %v3858_v32, %v6754_v29  ;;  %v3860_v14 = vpop.f32.mrb[173].mxu1 }
 0x956   : > { %v3861_v15 = vadd.f32 %v3860_v14, %v6758_v30 }
 0x957   : > { %3985 = vst [vmem:[%s6764_s16 + $0x100] sm:$0xff] %v3859_v24 }
 0x958   : > { %3986 = vst [vmem:[%s6764_s16 + $0x108] sm:$0xff] %v3861_v15  ;;  %v3864_v1 = vpop.f32.mrb[174].mxu1 }
 0x959   : > { %v3865_v33 = vadd.f32 %v3864_v1, %v6754_v29  ;;  %v3866_v34 = vpop.f32.mrb[175].mxu1 }
 0x95a   : > { %v3867_v35 = vadd.f32 %v3866_v34, %v6758_v30 }
 0x95b   : > { %3987 = vst [vmem:[%s6764_s16 + $0x110] sm:$0xff] %v3865_v33 }
 0x95c   : > { %3988 = vst [vmem:[%s6764_s16 + $0x118] sm:$0xff] %v3867_v35  ;;  %v3870_v36 = vpop.f32.mrb[176].mxu1 }
 0x95d   : > { %v3871_v37 = vadd.f32 %v3870_v36, %v6754_v29  ;;  %v3872_v38 = vpop.f32.mrb[177].mxu1 }
 0x95e   : > { %v3873_v39 = vadd.f32 %v3872_v38, %v6758_v30 }
 0x95f   : > { %3989 = vst [vmem:[%s6764_s16 + $0x120] sm:$0xff] %v3871_v37 }
 0x960   : > { %3990 = vst [vmem:[%s6764_s16 + $0x128] sm:$0xff] %v3873_v39  ;;  %v3876_v40 = vpop.f32.mrb[178].mxu1 }
 0x961   : > { %v3877_v41 = vadd.f32 %v3876_v40, %v6754_v29  ;;  %v3878_v42 = vpop.f32.mrb[179].mxu1 }
 0x962   : > { %v3879_v43 = vadd.f32 %v3878_v42, %v6758_v30 }
 0x963   : > { %3991 = vst [vmem:[%s6764_s16 + $0x130] sm:$0xff] %v3877_v41 }
 0x964   : > { %3992 = vst [vmem:[%s6764_s16 + $0x138] sm:$0xff] %v3879_v43  ;;  %v3882_v44 = vpop.f32.mrb[180].mxu1 }
 0x965   : > { %v3883_v45 = vadd.f32 %v3882_v44, %v6754_v29  ;;  %v3884_v3 = vpop.f32.mrb[181].mxu1 }
 0x966   : > { %v3885_v47 = vadd.f32 %v3884_v3, %v6758_v30 }
 0x967   : > { %3993 = vst [vmem:[%s6764_s16 + $0x140] sm:$0xff] %v3883_v45 }
 0x968   : > { %3994 = vst [vmem:[%s6764_s16 + $0x148] sm:$0xff] %v3885_v47  ;;  %v3888_v55 = vpop.f32.mrb[182].mxu1 }
 0x969   : > { %v3889_v48 = vadd.f32 %v3888_v55, %v6754_v29  ;;  %v3890_v51 = vpop.f32.mrb[183].mxu1 }
 0x96a   : > { %v3891_v52 = vadd.f32 %v3890_v51, %v6758_v30 }
 0x96b   : > { %3995 = vst [vmem:[%s6764_s16 + $0x150] sm:$0xff] %v3889_v48 }
 0x96c   : > { %3996 = vst [vmem:[%s6764_s16 + $0x158] sm:$0xff] %v3891_v52  ;;  %v3894_v53 = vpop.f32.mrb[184].mxu1 }
 0x96d   : > { %v3895_v54 = vadd.f32 %v3894_v53, %v6754_v29  ;;  %v3896_v56 = vpop.f32.mrb[185].mxu1 }
 0x96e   : > { %v3897_v46 = vadd.f32 %v3896_v56, %v6758_v30 }
 0x96f   : > { %3997 = vst [vmem:[%s6764_s16 + $0x160] sm:$0xff] %v3895_v54 }
 0x970   : > { %3998 = vst [vmem:[%s6764_s16 + $0x168] sm:$0xff] %v3897_v46  ;;  %v3900_v57 = vpop.f32.mrb[186].mxu1 }
 0x971   : > { %v3901_v58 = vadd.f32 %v3900_v57, %v6754_v29  ;;  %v3902_v59 = vpop.f32.mrb[187].mxu1 }
 0x972   : > { %v3903_v2 = vadd.f32 %v3902_v59, %v6758_v30 }
 0x973   : > { %3999 = vst [vmem:[%s6764_s16 + $0x170] sm:$0xff] %v3901_v58 }
 0x974   : > { %4000 = vst [vmem:[%s6764_s16 + $0x178] sm:$0xff] %v3903_v2  ;;  %v3906_v60 = vpop.f32.mrb[188].mxu1 }
 0x975   : > { %v3907_v62 = vadd.f32 %v3906_v60, %v6754_v29  ;;  %v3908_v16 = vpop.f32.mrb[189].mxu1 }
 0x976   : > { %v3909_v0 = vadd.f32 %v3908_v16, %v6758_v30 }
 0x977   : > { %4001 = vst [vmem:[%s6764_s16 + $0x180] sm:$0xff] %v3907_v62 }
 0x978   : > { %4002 = vst [vmem:[%s6764_s16 + $0x188] sm:$0xff] %v3909_v0  ;;  %v3912_v63 = vpop.f32.mrb[190].mxu1 }
 0x979   : > { %v3913_v4 = vadd.f32 %v3912_v63, %v6754_v29  ;;  %v3914_v5 = vpop.f32.mrb[191].mxu1 }
 0x97a   : > { %v3915_v6 = vadd.f32 %v3914_v5, %v6758_v30 }
 0x97b   : > { %4003 = vst [vmem:[%s6764_s16 + $0x190] sm:$0xff] %v3913_v4 }
 0x97c   : > { %4004 = vst [vmem:[%s6764_s16 + $0x198] sm:$0xff] %v3915_v6  ;;  %v3918_v7 = vpop.f32.mrb[192].mxu1 }
 0x97d   : > { %v3919_v8 = vadd.f32 %v3918_v7, %v6754_v29  ;;  %v3920_v49 = vpop.f32.mrb[193].mxu1 }
 0x97e   : > { %v3921_v9 = vadd.f32 %v3920_v49, %v6758_v30 }
 0x97f   : > { %4005 = vst [vmem:[%s6764_s16 + $0x1a0] sm:$0xff] %v3919_v8 }
 0x980   : > { %4006 = vst [vmem:[%s6764_s16 + $0x1a8] sm:$0xff] %v3921_v9  ;;  %v3924_v61 = vpop.f32.mrb[194].mxu1 }
 0x981   : > { %v3925_v10 = vadd.f32 %v3924_v61, %v6754_v29  ;;  %v3926_v11 = vpop.f32.mrb[195].mxu1 }
 0x982   : > { %v3927_v12 = vadd.f32 %v3926_v11, %v6758_v30 }
 0x983   : > { %4007 = vst [vmem:[%s6764_s16 + $0x1b0] sm:$0xff] %v3925_v10 }
 0x984   : > { %4008 = vst [vmem:[%s6764_s16 + $0x1b8] sm:$0xff] %v3927_v12  ;;  %v3930_v13 = vpop.f32.mrb[196].mxu1 }
 0x985   : > { %v3931_v17 = vadd.f32 %v3930_v13, %v6754_v29  ;;  %v3932_v18 = vpop.f32.mrb[197].mxu1 }
 0x986   : > { %v3933_v19 = vadd.f32 %v3932_v18, %v6758_v30 }
 0x987   : > { %4009 = vst [vmem:[%s6764_s16 + $0x1c0] sm:$0xff] %v3931_v17 }
 0x988   : > { %4010 = vst [vmem:[%s6764_s16 + $0x1c8] sm:$0xff] %v3933_v19  ;;  %v3936_v20 = vpop.f32.mrb[198].mxu1 }
 0x989   : > { %v3937_v21 = vadd.f32 %v3936_v20, %v6754_v29  ;;  %v3938_v22 = vpop.f32.mrb[199].mxu1 }
 0x98a   : > { %v3939_v23 = vadd.f32 %v3938_v22, %v6758_v30 }
 0x98b   : > { %4011 = vst [vmem:[%s6764_s16 + $0x1d0] sm:$0xff] %v3937_v21 }
 0x98c   : > { %4012 = vst [vmem:[%s6764_s16 + $0x1d8] sm:$0xff] %v3939_v23  ;;  %v3942_v25 = vpop.f32.mrb[200].mxu1 }
 0x98d   : > { %v3943_v26 = vadd.f32 %v3942_v25, %v6754_v29  ;;  %v3944_v27 = vpop.f32.mrb[201].mxu1 }
 0x98e   : > { %v3945_v28 = vadd.f32 %v3944_v27, %v6758_v30 }
 0x98f   : > { %4013 = vst [vmem:[%s6764_s16 + $0x1e0] sm:$0xff] %v3943_v26 }
 0x990   : > { %4014 = vst [vmem:[%s6764_s16 + $0x1e8] sm:$0xff] %v3945_v28  ;;  %v3948_v50 = vpop.f32.mrb[202].mxu1 }
 0x991   : > { %v3949_v31 = vadd.f32 %v3948_v50, %v6754_v29  ;;  %v3950_v32 = vpop.f32.mrb[203].mxu1 }
 0x992   : > { %v3951_v24 = vadd.f32 %v3950_v32, %v6758_v30 }
 0x993   : > { %4015 = vst [vmem:[%s6764_s16 + $0x1f0] sm:$0xff] %v3949_v31 }
 0x994   : > { %4016 = vst [vmem:[%s6764_s16 + $0x1f8] sm:$0xff] %v3951_v24 }
 0x995   : > { %5595 = shalt.err (!%p5592_p7)
}
 0x996   : > { %s5596_s20 = scalar_lea.hbm %s6894_s29, 8192  ;;  %s5600_s16 = scalar_lea.hbm %s6950_s7, 16384 }
 0x997   : > { %p5597_p9 = scmp.ne.s32.totalorder %s6894_s29, %s5596_s20  ;;  %p5601_p5 = scmp.lt.u32.totalorder %s6894_s29, %s6950_s7 }
 0x998   : > { %p5602_p11 = scmp.lt.u32.totalorder %s5600_s16, %s5596_s20  ;;  %p5604_p4 = scmp.lt.u32.totalorder %s5596_s20, %s6894_s29 }
 0x999   : > { %p5598_p2 = pnand %p5597_p9, %p5796_p12 }
 0x99a   : > { %p5603_p1 = por %p5602_p11, %p5601_p5 }
 0x99b   : > { %p5599_p0 = pneg %p5598_p2 }
 0x99c   : > { %p5605_p6 = por %p5604_p4, %p5603_p1 }
 0x99e   : > { %p5606_p8 = pnand %p5605_p6, %p5599_p0 }
 0x9a0   : > { %5609 = shalt.err (!%p5606_p8)
}
 0x9a1   : > { %s5663_s30 = smov 256   ;;  %s5664_s17 = smov 16  }
 0x9a2   : > { %5464 = dma.vmem_to_hbm [thread:$0]  (%p5796_p12), %s6896_s14, 8192, %s6894_s29, %s4018_s28, %s5663_s30, %s5663_s30, %s5664_s17  }
 0x9a3 PF: > { %s4047_s21 = sand.u32 1, %s5640_s24   ;;  %p6965_p10 = scmp.ne.s32.totalorder %s6955_s8, 0 }
 0x9a4   : > { %p6966_p13 = scmp.ge.s32.totalorder %s5652_s27, 2  ;;  %s4048_s10 = scalar_lea.sflag [#allocation4], %s4047_s21 }
 0x9a6   : > { %p5475_p3 = pnand %p6966_p13, %p6965_p10 }
 0x9a8   : > { %5635 = dma.done.wait (!%p5475_p3), %s4048_s10, 8192  }
 0x9a9   : > { %5637 = vsyncadd (!%p5475_p3), %s4048_s10, 4294959104  ;;  %p21_p7 = scmp.ge.s32.totalorder %s5761_s13, 4   ;;  %s6967_s24 = smov %s5644_s25 }
 0x9aa   : > { %s6968_s25 = smov %s5648_s26  ;;  %s6969_s26 = smov %s5792_s18 }
 0x9ab   : > { %s6970_s27 = smov %s5761_s13  ;;  %23 = sbr.rel (!%p21_p7) target bundleno = 6 (0x6), region = 104 }
 0x9b2   :  { %4053 = vsyncpa [#allocation3], 1 }
 0x9b3   :  { %4055 = vsyncpa [#allocation3 + $0x1], 1 }
 0x9b4   :  { %4056 = vsyncpa [#allocation6], 1 }
 0x9b5   :  { %4057 = vsyncpa [#allocation4], 1 }
 0x9b6   :  { %4059 = vsyncpa [#allocation4 + $0x1], 1 }

</bundles_post_ra>
